<compile_context>
chip_gen: v7x
topology: tpu7x:2x2x1
jax: 0.10.0
libtpu: 0.0.40
codegen_flags: <defaults>
</compile_context>

<pallas_src>
import functools

import jax
import jax.numpy as jnp
from jax import lax
from jax.experimental import pallas as pl
from jax.experimental.pallas import tpu as pltpu


# ----------------------------------------------------------------------------
# Pallas kernel: fused  out = relu?((X @ W) + shift)     (BN scale folded in W)
# ----------------------------------------------------------------------------
def _matmul_shift_relu_kernel(x_ref, w_ref, shift_ref, o_ref, *, apply_relu):
    # bf16 operands -> f32 MXU accumulation; f32 epilogue; single cast at store.
    acc = jnp.dot(x_ref[...], w_ref[...], preferred_element_type=jnp.float32)
    y = acc + shift_ref[...]
    if apply_relu:
        y = jnp.maximum(y, 0.0)
    o_ref[...] = y.astype(o_ref.dtype)


def _pick_tile_m(m, cap=1024):
    """Largest multiple-of-8 divisor of m that is <= cap (m is static Python int)."""
    if m <= cap or m % 8 != 0:
        return m
    for t in range(cap, 7, -8):
        if m % t == 0:
            return t
    return m


def fused_matmul_bn_relu(x, w, shift, apply_relu=True):
    """x: (M, K) bf16;  w: (K, Cout) bf16 with BN scale folded;  shift: (Cout,) f32.

    No K/Cout padding (block dims equal full array dims) and no ragged-M pad
    (tile_m divides M), so there are no extra HBM pad/depad passes.  Output is
    bf16 to halve writeback bytes; accumulation stays f32.
    """
    x = x.astype(jnp.bfloat16)
    m, k = x.shape
    cout = w.shape[1]
    shift2 = shift.reshape(1, cout)

    tile_m = _pick_tile_m(m)
    n_tiles = m // tile_m

    flops = 2 * m * k * cout
    bytes_accessed = m * k * 2 + k * cout * 2 + cout * 4 + m * cout * 2

    out = pl.pallas_call(
        functools.partial(_matmul_shift_relu_kernel, apply_relu=apply_relu),
        out_shape=jax.ShapeDtypeStruct((m, cout), jnp.bfloat16),
        grid=(n_tiles,),
        in_specs=[
            pl.BlockSpec((tile_m, k), lambda i: (i, 0)),
            pl.BlockSpec((k, cout), lambda i: (0, 0)),     # resident weight
            pl.BlockSpec((1, cout), lambda i: (0, 0)),     # resident shift
        ],
        out_specs=pl.BlockSpec((tile_m, cout), lambda i: (i, 0)),
        compiler_params=pltpu.CompilerParams(
            dimension_semantics=("parallel",),
            vmem_limit_bytes=48 * 1024 * 1024,             # under v7x 64 MiB physical
        ),
        cost_estimate=pl.CostEstimate(
            flops=flops, transcendentals=0, bytes_accessed=bytes_accessed),
    )(x, w, shift2)
    return out


# ----------------------------------------------------------------------------
# Conv building blocks (channels-last: N, T, H, W, C; activations bf16)
# ----------------------------------------------------------------------------
def pointwise_conv_bn_relu(x, layer, spatial_stride=1, apply_relu=True):
    """1x1x1 Conv3d + BN + ReLU == fused Pallas matmul (zero-copy reshape)."""
    if spatial_stride > 1:
        # TODO(synk): could fold the spatial stride into the Pallas read pattern
        # (strided pl.ds) instead of an XLA strided-slice copy.
        x = x[:, :, ::spatial_stride, ::spatial_stride, :]
    n, t, h, w, c = x.shape
    y = fused_matmul_bn_relu(x.reshape(n * t * h * w, c), layer["w"], layer["shift"],
                             apply_relu=apply_relu)
    return y.reshape(n, t, h, w, -1)


def stem_block(x, layer):
    """Spatial [kt,7,7] conv (stride [1,2,2]) via lax.conv, BN scale folded into w,
    shift + ReLU fused by XLA, cast to bf16, then maxpool [1,3,3]/[1,2,2]."""
    kt = layer["w"].shape[0]
    y = lax.conv_general_dilated(
        x, layer["w"], window_strides=(1, 2, 2),
        padding=((kt // 2, kt // 2), (3, 3), (3, 3)),
        dimension_numbers=("NDHWC", "DHWIO", "NDHWC"),
        preferred_element_type=jnp.float32)
    y = jnp.maximum(y + layer["shift"], 0.0).astype(jnp.bfloat16)
    return max_pool3d(y, (1, 3, 3), (1, 2, 2), (0, 1, 1))


def max_pool3d(x, kernel, stride, padding):
    if tuple(kernel) == (1, 1, 1) and tuple(stride) == (1, 1, 1):
        return x  # pathway{0,1}_pool with pool_size [1,1,1] is the identity
    kt, kh, kw = kernel
    st, sh, sw = stride
    pt, ph, pw = padding
    return lax.reduce_window(
        x, jnp.array(-jnp.inf, x.dtype), lax.max,
        window_dimensions=(1, kt, kh, kw, 1),
        window_strides=(1, st, sh, sw, 1),
        padding=((0, 0), (pt, pt), (ph, ph), (pw, pw), (0, 0)))


# ----------------------------------------------------------------------------
# pad_pathways + FuseFastToSlow (exact semantics from the provided source)
# ----------------------------------------------------------------------------
def pad_pathways(slow, fast):
    ts, tf = slow.shape[1], fast.shape[1]
    tout = max(ts, tf)
    ps, pf = tout - ts, tout - tf
    if ps > 0:
        slow = jnp.pad(slow, ((0, 0), (ps // 2, ps - ps // 2), (0, 0), (0, 0), (0, 0)))
    if pf > 0:
        fast = jnp.pad(fast, ((0, 0), (pf // 2, pf - pf // 2), (0, 0), (0, 0), (0, 0)))
    return slow, fast


def fuse_fast_to_slow(x_s, x_f, layer, alpha):
    """Conv3d [fk,1,1] stride [alpha,1,1] pad [fk//2,0,0] + BN + ReLU, then
    pad_pathways + channel (lane) concat.  Temporal taps are concatenated along
    the lane axis (K = fk*C, small fast-pathway C) into one fused bf16 matmul."""
    n, t, h, w, c = x_f.shape
    fk = layer["w"].shape[0] // c                 # static: derived from shapes
    pad = fk // 2
    xp = jnp.pad(x_f, ((0, 0), (pad, pad), (0, 0), (0, 0), (0, 0)))
    to = (t + 2 * pad - fk) // alpha + 1
    taps = [xp[:, dt:dt + alpha * (to - 1) + 1:alpha] for dt in range(fk)]
    # TODO(synk): the taps concat still materializes (N*to*H*W, fk*C) in HBM once;
    # a grid-over-taps VMEM-accumulator kernel would remove it, but needs >=8-row
    # sublane blocks which the late 2x2 / 1x1 spatial fusion points violate.
    xm = jnp.concatenate(taps, axis=-1).reshape(n * to * h * w, fk * c)
    fuse = fused_matmul_bn_relu(xm, layer["w"], layer["shift"], apply_relu=True)
    fuse = fuse.reshape(n, to, h, w, -1)
    x_s, fuse = pad_pathways(x_s, fuse)
    return jnp.concatenate([x_s, fuse], axis=-1), x_f


# ----------------------------------------------------------------------------
# Simplified stages / head (helper sources not provided)
# ----------------------------------------------------------------------------
def res_stage(xs, layers, spatial_stride):
    # TODO(synk): resnet_helper.ResStage source (bottleneck residual blocks,
    # nonlocal, temporal sampling) not provided; approximated by one 1x1x1
    # conv+BN+ReLU per pathway with the stage's spatial stride.
    return [pointwise_conv_bn_relu(x, p, spatial_stride) for x, p in zip(xs, layers)]


def adapt_head(xs, fc_w, fc_b):
    # TODO(synk): head_helper.ResNetAdaptHead source not provided; implemented as
    # per-pathway global average pool + concat + linear (eval mode, dropout off).
    # The head GEMM is (2, 320)x(320, 10): too small for a Pallas call -> plain jnp.
    feat = jnp.concatenate(
        [jnp.mean(x.astype(jnp.float32), axis=(1, 2, 3)) for x in xs], axis=-1)
    return feat @ fc_w + fc_b


# ----------------------------------------------------------------------------
# Deterministic parameter construction (synthetic; BN folded, weights bf16)
# ----------------------------------------------------------------------------
def _bn_affine(kg, kb, cout, eps=1e-5):
    gamma = 1.0 + 0.1 * jax.random.normal(kg, (cout,), jnp.float32)
    beta = 0.1 * jax.random.normal(kb, (cout,), jnp.float32)
    running_mean = jnp.zeros((cout,), jnp.float32)
    running_var = jnp.ones((cout,), jnp.float32)
    scale = gamma / jnp.sqrt(running_var + eps)
    shift = beta - running_mean * scale
    return scale, shift


def _init_stem(key, cin, cout, kt):
    kw_, kg, kb = jax.random.split(key, 3)
    w = jax.random.normal(kw_, (kt, 7, 7, cin, cout), jnp.float32) * 0.05
    scale, shift = _bn_affine(kg, kb, cout)
    return {"w": (w * scale).astype(jnp.bfloat16), "shift": shift}   # BN scale folded


def _init_fuse(key, cin, fk, ratio):
    cout = cin * ratio
    kw_, kg, kb = jax.random.split(key, 3)
    w = jax.random.normal(kw_, (fk, cin, cout), jnp.float32) * 0.05
    scale, shift = _bn_affine(kg, kb, cout)
    w_mat = (w * scale).reshape(fk * cin, cout).astype(jnp.bfloat16)
    return {"w": w_mat, "shift": shift}


def _init_pointwise(key, cin, cout):
    kw_, kg, kb = jax.random.split(key, 3)
    w = jax.random.normal(kw_, (cin, cout), jnp.float32) * 0.05
    scale, shift = _bn_affine(kg, kb, cout)
    return {"w": (w * scale).astype(jnp.bfloat16), "shift": shift}


def build_params(key, cfg):
    wpg = cfg["width_per_group"]
    beta_inv = cfg["beta_inv"]
    ratio = cfg["fusion_conv_channel_ratio"]
    fk = cfg["fusion_kernel_sz"]
    out_dim_ratio = beta_inv // ratio
    keys = iter(jax.random.split(key, 24))
    p = {}
    # s1 stem (slowfast temporal kernels: slow=1, fast=5; [tk,7,7] stride [1,2,2])
    p["s1_slow"] = _init_stem(next(keys), cfg["in_ch"], wpg, 1)
    p["s1_fast"] = _init_stem(next(keys), cfg["in_ch"], wpg // beta_inv, 5)
    # FuseFastToSlow modules
    p["s1_fuse"] = _init_fuse(next(keys), wpg // beta_inv, fk, ratio)
    p["s2_fuse"] = _init_fuse(next(keys), wpg * 4 // beta_inv, fk, ratio)
    p["s3_fuse"] = _init_fuse(next(keys), wpg * 8 // beta_inv, fk, ratio)
    p["s4_fuse"] = _init_fuse(next(keys), wpg * 16 // beta_inv, fk, ratio)
    # simplified res stages (dims match SlowFast dim_in/dim_out bookkeeping)
    def stage(din_s, din_f, dout_s, dout_f):
        return [_init_pointwise(next(keys), din_s, dout_s),
                _init_pointwise(next(keys), din_f, dout_f)]
    p["s2"] = stage(wpg + wpg // out_dim_ratio, wpg // beta_inv,
                    wpg * 4, wpg * 4 // beta_inv)
    p["s3"] = stage(wpg * 4 + wpg * 4 // out_dim_ratio, wpg * 4 // beta_inv,
                    wpg * 8, wpg * 8 // beta_inv)
    p["s4"] = stage(wpg * 8 + wpg * 8 // out_dim_ratio, wpg * 8 // beta_inv,
                    wpg * 16, wpg * 16 // beta_inv)
    p["s5"] = stage(wpg * 16 + wpg * 16 // out_dim_ratio, wpg * 16 // beta_inv,
                    wpg * 32, wpg * 32 // beta_inv)
    # head FC
    feat_dim = wpg * 32 + wpg * 32 // beta_inv
    kw_, _ = jax.random.split(next(keys))
    p["fc_w"] = jax.random.normal(kw_, (feat_dim, cfg["num_classes"]), jnp.float32) * 0.01
    p["fc_b"] = jnp.zeros((cfg["num_classes"],), jnp.float32)
    return p


# ----------------------------------------------------------------------------
# SlowFastModel.forward  (channels-last; `alpha` is static, bound via partial)
# ----------------------------------------------------------------------------
def slowfast_forward(x_slow, x_fast, P, *, alpha):
    x_slow = x_slow.astype(jnp.bfloat16)
    x_fast = x_fast.astype(jnp.bfloat16)
    # s1: VideoModelStem
    # TODO(synk): exact stem_helper source not provided; standard ResNetBasicStem
    # conv + BN + ReLU + maxpool[1,3,3]/[1,2,2] used.
    xs = stem_block(x_slow, P["s1_slow"])
    xf = stem_block(x_fast, P["s1_fast"])
    xs, xf = fuse_fast_to_slow(xs, xf, P["s1_fuse"], alpha)
    xs, xf = res_stage([xs, xf], P["s2"], 1)
    xs, xf = fuse_fast_to_slow(xs, xf, P["s2_fuse"], alpha)
    # pathway{0,1}_pool: pool_size [1,1,1] -> identity
    xs = max_pool3d(xs, (1, 1, 1), (1, 1, 1), (0, 0, 0))
    xf = max_pool3d(xf, (1, 1, 1), (1, 1, 1), (0, 0, 0))
    xs, xf = res_stage([xs, xf], P["s3"], 2)
    xs, xf = fuse_fast_to_slow(xs, xf, P["s3_fuse"], alpha)
    xs, xf = res_stage([xs, xf], P["s4"], 2)
    xs, xf = fuse_fast_to_slow(xs, xf, P["s4_fuse"], alpha)
    xs, xf = res_stage([xs, xf], P["s5"], 2)
    return adapt_head([xs, xf], P["fc_w"], P["fc_b"])


if __name__ == "__main__":
    cfg = dict(width_per_group=8, beta_inv=4, fusion_conv_channel_ratio=2,
               fusion_kernel_sz=5, alpha=4, in_ch=3, num_classes=10)
    key = jax.random.PRNGKey(0)
    kp, ks, kf = jax.random.split(key, 3)
    P = build_params(kp, cfg)
    # channels-last (N, T, H, W, C); slow pathway has alpha x fewer frames than fast.
    x_slow = jax.random.normal(ks, (2, 4, 32, 32, 3), jnp.float32)
    x_fast = jax.random.normal(kf, (2, 16, 32, 32, 3), jnp.float32)
    fwd = jax.jit(functools.partial(slowfast_forward, alpha=cfg["alpha"]))
    out = jax.block_until_ready(fwd(x_slow, x_fast, P))
    assert out.shape == (2, cfg["num_classes"])
    assert bool(jnp.all(jnp.isfinite(out)))
    print("KERNEL_OK")
</pallas_src>

<mosaic_0001>
module attributes {stable_mosaic.version = 11 : i64} {
  func.func @_matmul_shift_relu_kernel(%arg0: i32, %arg1: memref<1024x2xbf16, #tpu.memory_space<vmem>>, %arg2: memref<2x8xbf16, #tpu.memory_space<vmem>>, %arg3: memref<1x8xf32, #tpu.memory_space<vmem>>, %arg4: memref<1024x8xbf16, #tpu.memory_space<vmem>>) attributes {dimension_semantics = [#tpu.dimension_semantics<parallel>], iteration_bounds = array<i64: 2>, scalar_prefetch = 0 : i64, scratch_operands = 0 : i64, tpu.core_type = #tpu.core_type<tc>, window_params = [{transform_indices = @transform_0, window_bounds = array<i64: 1024, 2>}, {pipeline_mode = #tpu.pipeline_mode<synchronous>, transform_indices = @transform_1, window_bounds = array<i64: 2, 8>}, {pipeline_mode = #tpu.pipeline_mode<synchronous>, transform_indices = @transform_2, window_bounds = array<i64: 1, 8>}, {transform_indices = @transform_3, window_bounds = array<i64: 1024, 8>}]} {
    %c0 = arith.constant 0 : index
    %c0_0 = arith.constant 0 : index
    %0 = vector.load %arg1[%c0, %c0_0] : memref<1024x2xbf16, #tpu.memory_space<vmem>>, vector<1024x2xbf16>
    %c0_1 = arith.constant 0 : index
    %c0_2 = arith.constant 0 : index
    %1 = vector.load %arg2[%c0_1, %c0_2] : memref<2x8xbf16, #tpu.memory_space<vmem>>, vector<2x8xbf16>
    %cst = arith.constant dense<0.000000e+00> : vector<1024x8xf32>
    %2 = tpu.matmul %0, %1, %cst {dimension_numbers = #tpu.dot_dimension_numbers<[1], [0], [0], [1], [0, 0, 1, 1], [], []>} : vector<1024x2xbf16>, vector<2x8xbf16>, vector<1024x8xf32> -> vector<1024x8xf32>
    %c0_3 = arith.constant 0 : index
    %c0_4 = arith.constant 0 : index
    %3 = vector.load %arg3[%c0_3, %c0_4] : memref<1x8xf32, #tpu.memory_space<vmem>>, vector<1x8xf32>
    %4 = vector.broadcast %3 : vector<1x8xf32> to vector<1024x8xf32>
    %5 = arith.addf %2, %4 : vector<1024x8xf32>
    %cst_5 = arith.constant 0.000000e+00 : f32
    %6 = vector.broadcast %cst_5 : f32 to vector<1024x8xf32>
    %7 = arith.maximumf %5, %6 : vector<1024x8xf32>
    %8 = arith.truncf %7 : vector<1024x8xf32> to vector<1024x8xbf16>
    %c0_6 = arith.constant 0 : index
    %c0_7 = arith.constant 0 : index
    %9 = vector.load %arg4[%c0_6, %c0_7] : memref<1024x8xbf16, #tpu.memory_space<vmem>>, vector<1024x8xbf16>
    tpu.vector_store %arg4[%c0_6, %c0_7], %8 {strides = array<i32>} : memref<1024x8xbf16, #tpu.memory_space<vmem>>, vector<1024x8xbf16>,
    return
  }
  func.func @transform_0(%arg0: i32) -> (i32, i32) {
    %c0_i32 = arith.constant 0 : i32
    %c0_i32_0 = arith.constant 0 : i32
    return %arg0, %c0_i32 : i32, i32
  }
  func.func @transform_1(%arg0: i32) -> (i32, i32) {
    %c0_i32 = arith.constant 0 : i32
    %c0_i32_0 = arith.constant 0 : i32
    %c0_i32_1 = arith.constant 0 : i32
    return %c0_i32, %c0_i32_0 : i32, i32
  }
  func.func @transform_2(%arg0: i32) -> (i32, i32) {
    %c0_i32 = arith.constant 0 : i32
    %c0_i32_0 = arith.constant 0 : i32
    %c0_i32_1 = arith.constant 0 : i32
    return %c0_i32, %c0_i32_0 : i32, i32
  }
  func.func @transform_3(%arg0: i32) -> (i32, i32) {
    %c0_i32 = arith.constant 0 : i32
    %c0_i32_0 = arith.constant 0 : i32
    return %arg0, %c0_i32 : i32, i32
  }
}

module attributes {stable_mosaic.version = 11 : i64} {
  func.func @_matmul_shift_relu_kernel(%arg0: i32, %arg1: memref<512x40xbf16, #tpu.memory_space<vmem>>, %arg2: memref<40x16xbf16, #tpu.memory_space<vmem>>, %arg3: memref<1x16xf32, #tpu.memory_space<vmem>>, %arg4: memref<512x16xbf16, #tpu.memory_space<vmem>>) attributes {dimension_semantics = [#tpu.dimension_semantics<parallel>], iteration_bounds = array<i64: 1>, scalar_prefetch = 0 : i64, scratch_operands = 0 : i64, tpu.core_type = #tpu.core_type<tc>, window_params = [{transform_indices = @transform_0, window_bounds = array<i64: 512, 40>}, {pipeline_mode = #tpu.pipeline_mode<synchronous>, transform_indices = @transform_1, window_bounds = array<i64: 40, 16>}, {pipeline_mode = #tpu.pipeline_mode<synchronous>, transform_indices = @transform_2, window_bounds = array<i64: 1, 16>}, {transform_indices = @transform_3, window_bounds = array<i64: 512, 16>}]} {
    %c0 = arith.constant 0 : index
    %c0_0 = arith.constant 0 : index
    %0 = vector.load %arg1[%c0, %c0_0] : memref<512x40xbf16, #tpu.memory_space<vmem>>, vector<512x40xbf16>
    %c0_1 = arith.constant 0 : index
    %c0_2 = arith.constant 0 : index
    %1 = vector.load %arg2[%c0_1, %c0_2] : memref<40x16xbf16, #tpu.memory_space<vmem>>, vector<40x16xbf16>
    %cst = arith.constant dense<0.000000e+00> : vector<512x16xf32>
    %2 = tpu.matmul %0, %1, %cst {dimension_numbers = #tpu.dot_dimension_numbers<[1], [0], [0], [1], [0, 0, 1, 1], [], []>} : vector<512x40xbf16>, vector<40x16xbf16>, vector<512x16xf32> -> vector<512x16xf32>
    %c0_3 = arith.constant 0 : index
    %c0_4 = arith.constant 0 : index
    %3 = vector.load %arg3[%c0_3, %c0_4] : memref<1x16xf32, #tpu.memory_space<vmem>>, vector<1x16xf32>
    %4 = vector.broadcast %3 : vector<1x16xf32> to vector<512x16xf32>
    %5 = arith.addf %2, %4 : vector<512x16xf32>
    %cst_5 = arith.constant 0.000000e+00 : f32
    %6 = vector.broadcast %cst_5 : f32 to vector<512x16xf32>
    %7 = arith.maximumf %5, %6 : vector<512x16xf32>
    %8 = arith.truncf %7 : vector<512x16xf32> to vector<512x16xbf16>
    %c0_6 = arith.constant 0 : index
    %c0_7 = arith.constant 0 : index
    %9 = vector.load %arg4[%c0_6, %c0_7] : memref<512x16xbf16, #tpu.memory_space<vmem>>, vector<512x16xbf16>
    tpu.vector_store %arg4[%c0_6, %c0_7], %8 {strides = array<i32>} : memref<512x16xbf16, #tpu.memory_space<vmem>>, vector<512x16xbf16>,
    return
  }
  func.func @transform_0(%arg0: i32) -> (i32, i32) {
    %c0_i32 = arith.constant 0 : i32
    %c0_i32_0 = arith.constant 0 : i32
    return %arg0, %c0_i32 : i32, i32
  }
  func.func @transform_1(%arg0: i32) -> (i32, i32) {
    %c0_i32 = arith.constant 0 : i32
    %c0_i32_0 = arith.constant 0 : i32
    %c0_i32_1 = arith.constant 0 : i32
    return %c0_i32, %c0_i32_0 : i32, i32
  }
  func.func @transform_2(%arg0: i32) -> (i32, i32) {
    %c0_i32 = arith.constant 0 : i32
    %c0_i32_0 = arith.constant 0 : i32
    %c0_i32_1 = arith.constant 0 : i32
    return %c0_i32, %c0_i32_0 : i32, i32
  }
  func.func @transform_3(%arg0: i32) -> (i32, i32) {
    %c0_i32 = arith.constant 0 : i32
    %c0_i32_0 = arith.constant 0 : i32
    return %arg0, %c0_i32 : i32, i32
  }
}

module attributes {stable_mosaic.version = 11 : i64} {
  func.func @_matmul_shift_relu_kernel(%arg0: i32, %arg1: memref<512x10xbf16, #tpu.memory_space<vmem>>, %arg2: memref<10x4xbf16, #tpu.memory_space<vmem>>, %arg3: memref<1x4xf32, #tpu.memory_space<vmem>>, %arg4: memref<512x4xbf16, #tpu.memory_space<vmem>>) attributes {dimension_semantics = [#tpu.dimension_semantics<parallel>], iteration_bounds = array<i64: 1>, scalar_prefetch = 0 : i64, scratch_operands = 0 : i64, tpu.core_type = #tpu.core_type<tc>, window_params = [{transform_indices = @transform_0, window_bounds = array<i64: 512, 10>}, {pipeline_mode = #tpu.pipeline_mode<synchronous>, transform_indices = @transform_1, window_bounds = array<i64: 10, 4>}, {pipeline_mode = #tpu.pipeline_mode<synchronous>, transform_indices = @transform_2, window_bounds = array<i64: 1, 4>}, {transform_indices = @transform_3, window_bounds = array<i64: 512, 4>}]} {
    %c0 = arith.constant 0 : index
    %c0_0 = arith.constant 0 : index
    %0 = vector.load %arg1[%c0, %c0_0] : memref<512x10xbf16, #tpu.memory_space<vmem>>, vector<512x10xbf16>
    %c0_1 = arith.constant 0 : index
    %c0_2 = arith.constant 0 : index
    %1 = vector.load %arg2[%c0_1, %c0_2] : memref<10x4xbf16, #tpu.memory_space<vmem>>, vector<10x4xbf16>
    %cst = arith.constant dense<0.000000e+00> : vector<512x4xf32>
    %2 = tpu.matmul %0, %1, %cst {dimension_numbers = #tpu.dot_dimension_numbers<[1], [0], [0], [1], [0, 0, 1, 1], [], []>} : vector<512x10xbf16>, vector<10x4xbf16>, vector<512x4xf32> -> vector<512x4xf32>
    %c0_3 = arith.constant 0 : index
    %c0_4 = arith.constant 0 : index
    %3 = vector.load %arg3[%c0_3, %c0_4] : memref<1x4xf32, #tpu.memory_space<vmem>>, vector<1x4xf32>
    %4 = vector.broadcast %3 : vector<1x4xf32> to vector<512x4xf32>
    %5 = arith.addf %2, %4 : vector<512x4xf32>
    %cst_5 = arith.constant 0.000000e+00 : f32
    %6 = vector.broadcast %cst_5 : f32 to vector<512x4xf32>
    %7 = arith.maximumf %5, %6 : vector<512x4xf32>
    %8 = arith.truncf %7 : vector<512x4xf32> to vector<512x4xbf16>
    %c0_6 = arith.constant 0 : index
    %c0_7 = arith.constant 0 : index
    %9 = vector.load %arg4[%c0_6, %c0_7] : memref<512x4xbf16, #tpu.memory_space<vmem>>, vector<512x4xbf16>
    tpu.vector_store %arg4[%c0_6, %c0_7], %8 {strides = array<i32>} : memref<512x4xbf16, #tpu.memory_space<vmem>>, vector<512x4xbf16>,
    return
  }
  func.func @transform_0(%arg0: i32) -> (i32, i32) {
    %c0_i32 = arith.constant 0 : i32
    %c0_i32_0 = arith.constant 0 : i32
    return %arg0, %c0_i32 : i32, i32
  }
  func.func @transform_1(%arg0: i32) -> (i32, i32) {
    %c0_i32 = arith.constant 0 : i32
    %c0_i32_0 = arith.constant 0 : i32
    %c0_i32_1 = arith.constant 0 : i32
    return %c0_i32, %c0_i32_0 : i32, i32
  }
  func.func @transform_2(%arg0: i32) -> (i32, i32) {
    %c0_i32 = arith.constant 0 : i32
    %c0_i32_0 = arith.constant 0 : i32
    %c0_i32_1 = arith.constant 0 : i32
    return %c0_i32, %c0_i32_0 : i32, i32
  }
  func.func @transform_3(%arg0: i32) -> (i32, i32) {
    %c0_i32 = arith.constant 0 : i32
    %c0_i32_0 = arith.constant 0 : i32
    return %arg0, %c0_i32 : i32, i32
  }
}

module attributes {stable_mosaic.version = 11 : i64} {
  func.func @_matmul_shift_relu_kernel(%arg0: i32, %arg1: memref<512x12xbf16, #tpu.memory_space<vmem>>, %arg2: memref<12x32xbf16, #tpu.memory_space<vmem>>, %arg3: memref<1x32xf32, #tpu.memory_space<vmem>>, %arg4: memref<512x32xbf16, #tpu.memory_space<vmem>>) attributes {dimension_semantics = [#tpu.dimension_semantics<parallel>], iteration_bounds = array<i64: 1>, scalar_prefetch = 0 : i64, scratch_operands = 0 : i64, tpu.core_type = #tpu.core_type<tc>, window_params = [{transform_indices = @transform_0, window_bounds = array<i64: 512, 12>}, {pipeline_mode = #tpu.pipeline_mode<synchronous>, transform_indices = @transform_1, window_bounds = array<i64: 12, 32>}, {pipeline_mode = #tpu.pipeline_mode<synchronous>, transform_indices = @transform_2, window_bounds = array<i64: 1, 32>}, {transform_indices = @transform_3, window_bounds = array<i64: 512, 32>}]} {
    %c0 = arith.constant 0 : index
    %c0_0 = arith.constant 0 : index
    %0 = vector.load %arg1[%c0, %c0_0] : memref<512x12xbf16, #tpu.memory_space<vmem>>, vector<512x12xbf16>
    %c0_1 = arith.constant 0 : index
    %c0_2 = arith.constant 0 : index
    %1 = vector.load %arg2[%c0_1, %c0_2] : memref<12x32xbf16, #tpu.memory_space<vmem>>, vector<12x32xbf16>
    %cst = arith.constant dense<0.000000e+00> : vector<512x32xf32>
    %2 = tpu.matmul %0, %1, %cst {dimension_numbers = #tpu.dot_dimension_numbers<[1], [0], [0], [1], [0, 0, 1, 1], [], []>} : vector<512x12xbf16>, vector<12x32xbf16>, vector<512x32xf32> -> vector<512x32xf32>
    %c0_3 = arith.constant 0 : index
    %c0_4 = arith.constant 0 : index
    %3 = vector.load %arg3[%c0_3, %c0_4] : memref<1x32xf32, #tpu.memory_space<vmem>>, vector<1x32xf32>
    %4 = vector.broadcast %3 : vector<1x32xf32> to vector<512x32xf32>
    %5 = arith.addf %2, %4 : vector<512x32xf32>
    %cst_5 = arith.constant 0.000000e+00 : f32
    %6 = vector.broadcast %cst_5 : f32 to vector<512x32xf32>
    %7 = arith.maximumf %5, %6 : vector<512x32xf32>
    %8 = arith.truncf %7 : vector<512x32xf32> to vector<512x32xbf16>
    %c0_6 = arith.constant 0 : index
    %c0_7 = arith.constant 0 : index
    %9 = vector.load %arg4[%c0_6, %c0_7] : memref<512x32xbf16, #tpu.memory_space<vmem>>, vector<512x32xbf16>
    tpu.vector_store %arg4[%c0_6, %c0_7], %8 {strides = array<i32>} : memref<512x32xbf16, #tpu.memory_space<vmem>>, vector<512x32xbf16>,
    return
  }
  func.func @transform_0(%arg0: i32) -> (i32, i32) {
    %c0_i32 = arith.constant 0 : i32
    %c0_i32_0 = arith.constant 0 : i32
    return %arg0, %c0_i32 : i32, i32
  }
  func.func @transform_1(%arg0: i32) -> (i32, i32) {
    %c0_i32 = arith.constant 0 : i32
    %c0_i32_0 = arith.constant 0 : i32
    %c0_i32_1 = arith.constant 0 : i32
    return %c0_i32, %c0_i32_0 : i32, i32
  }
  func.func @transform_2(%arg0: i32) -> (i32, i32) {
    %c0_i32 = arith.constant 0 : i32
    %c0_i32_0 = arith.constant 0 : i32
    %c0_i32_1 = arith.constant 0 : i32
    return %c0_i32, %c0_i32_0 : i32, i32
  }
  func.func @transform_3(%arg0: i32) -> (i32, i32) {
    %c0_i32 = arith.constant 0 : i32
    %c0_i32_0 = arith.constant 0 : i32
    return %arg0, %c0_i32 : i32, i32
  }
}

module attributes {stable_mosaic.version = 11 : i64} {
  func.func @_matmul_shift_relu_kernel(%arg0: i32, %arg1: memref<128x48xbf16, #tpu.memory_space<vmem>>, %arg2: memref<48x64xbf16, #tpu.memory_space<vmem>>, %arg3: memref<1x64xf32, #tpu.memory_space<vmem>>, %arg4: memref<128x64xbf16, #tpu.memory_space<vmem>>) attributes {dimension_semantics = [#tpu.dimension_semantics<parallel>], iteration_bounds = array<i64: 1>, scalar_prefetch = 0 : i64, scratch_operands = 0 : i64, tpu.core_type = #tpu.core_type<tc>, window_params = [{transform_indices = @transform_0, window_bounds = array<i64: 128, 48>}, {pipeline_mode = #tpu.pipeline_mode<synchronous>, transform_indices = @transform_1, window_bounds = array<i64: 48, 64>}, {pipeline_mode = #tpu.pipeline_mode<synchronous>, transform_indices = @transform_2, window_bounds = array<i64: 1, 64>}, {transform_indices = @transform_3, window_bounds = array<i64: 128, 64>}]} {
    %c0 = arith.constant 0 : index
    %c0_0 = arith.constant 0 : index
    %0 = vector.load %arg1[%c0, %c0_0] : memref<128x48xbf16, #tpu.memory_space<vmem>>, vector<128x48xbf16>
    %c0_1 = arith.constant 0 : index
    %c0_2 = arith.constant 0 : index
    %1 = vector.load %arg2[%c0_1, %c0_2] : memref<48x64xbf16, #tpu.memory_space<vmem>>, vector<48x64xbf16>
    %cst = arith.constant dense<0.000000e+00> : vector<128x64xf32>
    %2 = tpu.matmul %0, %1, %cst {dimension_numbers = #tpu.dot_dimension_numbers<[1], [0], [0], [1], [0, 0, 1, 1], [], []>} : vector<128x48xbf16>, vector<48x64xbf16>, vector<128x64xf32> -> vector<128x64xf32>
    %c0_3 = arith.constant 0 : index
    %c0_4 = arith.constant 0 : index
    %3 = vector.load %arg3[%c0_3, %c0_4] : memref<1x64xf32, #tpu.memory_space<vmem>>, vector<1x64xf32>
    %4 = vector.broadcast %3 : vector<1x64xf32> to vector<128x64xf32>
    %5 = arith.addf %2, %4 : vector<128x64xf32>
    %cst_5 = arith.constant 0.000000e+00 : f32
    %6 = vector.broadcast %cst_5 : f32 to vector<128x64xf32>
    %7 = arith.maximumf %5, %6 : vector<128x64xf32>
    %8 = arith.truncf %7 : vector<128x64xf32> to vector<128x64xbf16>
    %c0_6 = arith.constant 0 : index
    %c0_7 = arith.constant 0 : index
    %9 = vector.load %arg4[%c0_6, %c0_7] : memref<128x64xbf16, #tpu.memory_space<vmem>>, vector<128x64xbf16>
    tpu.vector_store %arg4[%c0_6, %c0_7], %8 {strides = array<i32>} : memref<128x64xbf16, #tpu.memory_space<vmem>>, vector<128x64xbf16>,
    return
  }
  func.func @transform_0(%arg0: i32) -> (i32, i32) {
    %c0_i32 = arith.constant 0 : i32
    %c0_i32_0 = arith.constant 0 : i32
    return %arg0, %c0_i32 : i32, i32
  }
  func.func @transform_1(%arg0: i32) -> (i32, i32) {
    %c0_i32 = arith.constant 0 : i32
    %c0_i32_0 = arith.constant 0 : i32
    %c0_i32_1 = arith.constant 0 : i32
    return %c0_i32, %c0_i32_0 : i32, i32
  }
  func.func @transform_2(%arg0: i32) -> (i32, i32) {
    %c0_i32 = arith.constant 0 : i32
    %c0_i32_0 = arith.constant 0 : i32
    %c0_i32_1 = arith.constant 0 : i32
    return %c0_i32, %c0_i32_0 : i32, i32
  }
  func.func @transform_3(%arg0: i32) -> (i32, i32) {
    %c0_i32 = arith.constant 0 : i32
    %c0_i32_0 = arith.constant 0 : i32
    return %arg0, %c0_i32 : i32, i32
  }
}

module attributes {stable_mosaic.version = 11 : i64} {
  func.func @_matmul_shift_relu_kernel(%arg0: i32, %arg1: memref<512x8xbf16, #tpu.memory_space<vmem>>, %arg2: memref<8x16xbf16, #tpu.memory_space<vmem>>, %arg3: memref<1x16xf32, #tpu.memory_space<vmem>>, %arg4: memref<512x16xbf16, #tpu.memory_space<vmem>>) attributes {dimension_semantics = [#tpu.dimension_semantics<parallel>], iteration_bounds = array<i64: 1>, scalar_prefetch = 0 : i64, scratch_operands = 0 : i64, tpu.core_type = #tpu.core_type<tc>, window_params = [{transform_indices = @transform_0, window_bounds = array<i64: 512, 8>}, {pipeline_mode = #tpu.pipeline_mode<synchronous>, transform_indices = @transform_1, window_bounds = array<i64: 8, 16>}, {pipeline_mode = #tpu.pipeline_mode<synchronous>, transform_indices = @transform_2, window_bounds = array<i64: 1, 16>}, {transform_indices = @transform_3, window_bounds = array<i64: 512, 16>}]} {
    %c0 = arith.constant 0 : index
    %c0_0 = arith.constant 0 : index
    %0 = vector.load %arg1[%c0, %c0_0] : memref<512x8xbf16, #tpu.memory_space<vmem>>, vector<512x8xbf16>
    %c0_1 = arith.constant 0 : index
    %c0_2 = arith.constant 0 : index
    %1 = vector.load %arg2[%c0_1, %c0_2] : memref<8x16xbf16, #tpu.memory_space<vmem>>, vector<8x16xbf16>
    %cst = arith.constant dense<0.000000e+00> : vector<512x16xf32>
    %2 = tpu.matmul %0, %1, %cst {dimension_numbers = #tpu.dot_dimension_numbers<[1], [0], [0], [1], [0, 0, 1, 1], [], []>} : vector<512x8xbf16>, vector<8x16xbf16>, vector<512x16xf32> -> vector<512x16xf32>
    %c0_3 = arith.constant 0 : index
    %c0_4 = arith.constant 0 : index
    %3 = vector.load %arg3[%c0_3, %c0_4] : memref<1x16xf32, #tpu.memory_space<vmem>>, vector<1x16xf32>
    %4 = vector.broadcast %3 : vector<1x16xf32> to vector<512x16xf32>
    %5 = arith.addf %2, %4 : vector<512x16xf32>
    %cst_5 = arith.constant 0.000000e+00 : f32
    %6 = vector.broadcast %cst_5 : f32 to vector<512x16xf32>
    %7 = arith.maximumf %5, %6 : vector<512x16xf32>
    %8 = arith.truncf %7 : vector<512x16xf32> to vector<512x16xbf16>
    %c0_6 = arith.constant 0 : index
    %c0_7 = arith.constant 0 : index
    %9 = vector.load %arg4[%c0_6, %c0_7] : memref<512x16xbf16, #tpu.memory_space<vmem>>, vector<512x16xbf16>
    tpu.vector_store %arg4[%c0_6, %c0_7], %8 {strides = array<i32>} : memref<512x16xbf16, #tpu.memory_space<vmem>>, vector<512x16xbf16>,
    return
  }
  func.func @transform_0(%arg0: i32) -> (i32, i32) {
    %c0_i32 = arith.constant 0 : i32
    %c0_i32_0 = arith.constant 0 : i32
    return %arg0, %c0_i32 : i32, i32
  }
  func.func @transform_1(%arg0: i32) -> (i32, i32) {
    %c0_i32 = arith.constant 0 : i32
    %c0_i32_0 = arith.constant 0 : i32
    %c0_i32_1 = arith.constant 0 : i32
    return %c0_i32, %c0_i32_0 : i32, i32
  }
  func.func @transform_2(%arg0: i32) -> (i32, i32) {
    %c0_i32 = arith.constant 0 : i32
    %c0_i32_0 = arith.constant 0 : i32
    %c0_i32_1 = arith.constant 0 : i32
    return %c0_i32, %c0_i32_0 : i32, i32
  }
  func.func @transform_3(%arg0: i32) -> (i32, i32) {
    %c0_i32 = arith.constant 0 : i32
    %c0_i32_0 = arith.constant 0 : i32
    return %arg0, %c0_i32 : i32, i32
  }
}

module attributes {stable_mosaic.version = 11 : i64} {
  func.func @_matmul_shift_relu_kernel(%arg0: i32, %arg1: memref<128x80xbf16, #tpu.memory_space<vmem>>, %arg2: memref<80x32xbf16, #tpu.memory_space<vmem>>, %arg3: memref<1x32xf32, #tpu.memory_space<vmem>>, %arg4: memref<128x32xbf16, #tpu.memory_space<vmem>>) attributes {dimension_semantics = [#tpu.dimension_semantics<parallel>], iteration_bounds = array<i64: 1>, scalar_prefetch = 0 : i64, scratch_operands = 0 : i64, tpu.core_type = #tpu.core_type<tc>, window_params = [{transform_indices = @transform_0, window_bounds = array<i64: 128, 80>}, {pipeline_mode = #tpu.pipeline_mode<synchronous>, transform_indices = @transform_1, window_bounds = array<i64: 80, 32>}, {pipeline_mode = #tpu.pipeline_mode<synchronous>, transform_indices = @transform_2, window_bounds = array<i64: 1, 32>}, {transform_indices = @transform_3, window_bounds = array<i64: 128, 32>}]} {
    %c0 = arith.constant 0 : index
    %c0_0 = arith.constant 0 : index
    %0 = vector.load %arg1[%c0, %c0_0] : memref<128x80xbf16, #tpu.memory_space<vmem>>, vector<128x80xbf16>
    %c0_1 = arith.constant 0 : index
    %c0_2 = arith.constant 0 : index
    %1 = vector.load %arg2[%c0_1, %c0_2] : memref<80x32xbf16, #tpu.memory_space<vmem>>, vector<80x32xbf16>
    %cst = arith.constant dense<0.000000e+00> : vector<128x32xf32>
    %2 = tpu.matmul %0, %1, %cst {dimension_numbers = #tpu.dot_dimension_numbers<[1], [0], [0], [1], [0, 0, 1, 1], [], []>} : vector<128x80xbf16>, vector<80x32xbf16>, vector<128x32xf32> -> vector<128x32xf32>
    %c0_3 = arith.constant 0 : index
    %c0_4 = arith.constant 0 : index
    %3 = vector.load %arg3[%c0_3, %c0_4] : memref<1x32xf32, #tpu.memory_space<vmem>>, vector<1x32xf32>
    %4 = vector.broadcast %3 : vector<1x32xf32> to vector<128x32xf32>
    %5 = arith.addf %2, %4 : vector<128x32xf32>
    %cst_5 = arith.constant 0.000000e+00 : f32
    %6 = vector.broadcast %cst_5 : f32 to vector<128x32xf32>
    %7 = arith.maximumf %5, %6 : vector<128x32xf32>
    %8 = arith.truncf %7 : vector<128x32xf32> to vector<128x32xbf16>
    %c0_6 = arith.constant 0 : index
    %c0_7 = arith.constant 0 : index
    %9 = vector.load %arg4[%c0_6, %c0_7] : memref<128x32xbf16, #tpu.memory_space<vmem>>, vector<128x32xbf16>
    tpu.vector_store %arg4[%c0_6, %c0_7], %8 {strides = array<i32>} : memref<128x32xbf16, #tpu.memory_space<vmem>>, vector<128x32xbf16>,
    return
  }
  func.func @transform_0(%arg0: i32) -> (i32, i32) {
    %c0_i32 = arith.constant 0 : i32
    %c0_i32_0 = arith.constant 0 : i32
    return %arg0, %c0_i32 : i32, i32
  }
  func.func @transform_1(%arg0: i32) -> (i32, i32) {
    %c0_i32 = arith.constant 0 : i32
    %c0_i32_0 = arith.constant 0 : i32
    %c0_i32_1 = arith.constant 0 : i32
    return %c0_i32, %c0_i32_0 : i32, i32
  }
  func.func @transform_2(%arg0: i32) -> (i32, i32) {
    %c0_i32 = arith.constant 0 : i32
    %c0_i32_0 = arith.constant 0 : i32
    %c0_i32_1 = arith.constant 0 : i32
    return %c0_i32, %c0_i32_0 : i32, i32
  }
  func.func @transform_3(%arg0: i32) -> (i32, i32) {
    %c0_i32 = arith.constant 0 : i32
    %c0_i32_0 = arith.constant 0 : i32
    return %arg0, %c0_i32 : i32, i32
  }
}

module attributes {stable_mosaic.version = 11 : i64} {
  func.func @_matmul_shift_relu_kernel(%arg0: i32, %arg1: memref<32x96xbf16, #tpu.memory_space<vmem>>, %arg2: memref<96x128xbf16, #tpu.memory_space<vmem>>, %arg3: memref<1x128xf32, #tpu.memory_space<vmem>>, %arg4: memref<32x128xbf16, #tpu.memory_space<vmem>>) attributes {dimension_semantics = [#tpu.dimension_semantics<parallel>], iteration_bounds = array<i64: 1>, scalar_prefetch = 0 : i64, scratch_operands = 0 : i64, tpu.core_type = #tpu.core_type<tc>, window_params = [{transform_indices = @transform_0, window_bounds = array<i64: 32, 96>}, {pipeline_mode = #tpu.pipeline_mode<synchronous>, transform_indices = @transform_1, window_bounds = array<i64: 96, 128>}, {pipeline_mode = #tpu.pipeline_mode<synchronous>, transform_indices = @transform_2, window_bounds = array<i64: 1, 128>}, {transform_indices = @transform_3, window_bounds = array<i64: 32, 128>}]} {
    %c0 = arith.constant 0 : index
    %c0_0 = arith.constant 0 : index
    %0 = vector.load %arg1[%c0, %c0_0] : memref<32x96xbf16, #tpu.memory_space<vmem>>, vector<32x96xbf16>
    %c0_1 = arith.constant 0 : index
    %c0_2 = arith.constant 0 : index
    %1 = vector.load %arg2[%c0_1, %c0_2] : memref<96x128xbf16, #tpu.memory_space<vmem>>, vector<96x128xbf16>
    %cst = arith.constant dense<0.000000e+00> : vector<32x128xf32>
    %2 = tpu.matmul %0, %1, %cst {dimension_numbers = #tpu.dot_dimension_numbers<[1], [0], [0], [1], [0, 0, 1, 1], [], []>} : vector<32x96xbf16>, vector<96x128xbf16>, vector<32x128xf32> -> vector<32x128xf32>
    %c0_3 = arith.constant 0 : index
    %c0_4 = arith.constant 0 : index
    %3 = vector.load %arg3[%c0_3, %c0_4] : memref<1x128xf32, #tpu.memory_space<vmem>>, vector<1x128xf32>
    %4 = vector.broadcast %3 : vector<1x128xf32> to vector<32x128xf32>
    %5 = arith.addf %2, %4 : vector<32x128xf32>
    %cst_5 = arith.constant 0.000000e+00 : f32
    %6 = vector.broadcast %cst_5 : f32 to vector<32x128xf32>
    %7 = arith.maximumf %5, %6 : vector<32x128xf32>
    %8 = arith.truncf %7 : vector<32x128xf32> to vector<32x128xbf16>
    %c0_6 = arith.constant 0 : index
    %c0_7 = arith.constant 0 : index
    %9 = vector.load %arg4[%c0_6, %c0_7] : memref<32x128xbf16, #tpu.memory_space<vmem>>, vector<32x128xbf16>
    tpu.vector_store %arg4[%c0_6, %c0_7], %8 {strides = array<i32>} : memref<32x128xbf16, #tpu.memory_space<vmem>>, vector<32x128xbf16>,
    return
  }
  func.func @transform_0(%arg0: i32) -> (i32, i32) {
    %c0_i32 = arith.constant 0 : i32
    %c0_i32_0 = arith.constant 0 : i32
    return %arg0, %c0_i32 : i32, i32
  }
  func.func @transform_1(%arg0: i32) -> (i32, i32) {
    %c0_i32 = arith.constant 0 : i32
    %c0_i32_0 = arith.constant 0 : i32
    %c0_i32_1 = arith.constant 0 : i32
    return %c0_i32, %c0_i32_0 : i32, i32
  }
  func.func @transform_2(%arg0: i32) -> (i32, i32) {
    %c0_i32 = arith.constant 0 : i32
    %c0_i32_0 = arith.constant 0 : i32
    %c0_i32_1 = arith.constant 0 : i32
    return %c0_i32, %c0_i32_0 : i32, i32
  }
  func.func @transform_3(%arg0: i32) -> (i32, i32) {
    %c0_i32 = arith.constant 0 : i32
    %c0_i32_0 = arith.constant 0 : i32
    return %arg0, %c0_i32 : i32, i32
  }
}

module attributes {stable_mosaic.version = 11 : i64} {
  func.func @_matmul_shift_relu_kernel(%arg0: i32, %arg1: memref<128x16xbf16, #tpu.memory_space<vmem>>, %arg2: memref<16x32xbf16, #tpu.memory_space<vmem>>, %arg3: memref<1x32xf32, #tpu.memory_space<vmem>>, %arg4: memref<128x32xbf16, #tpu.memory_space<vmem>>) attributes {dimension_semantics = [#tpu.dimension_semantics<parallel>], iteration_bounds = array<i64: 1>, scalar_prefetch = 0 : i64, scratch_operands = 0 : i64, tpu.core_type = #tpu.core_type<tc>, window_params = [{transform_indices = @transform_0, window_bounds = array<i64: 128, 16>}, {pipeline_mode = #tpu.pipeline_mode<synchronous>, transform_indices = @transform_1, window_bounds = array<i64: 16, 32>}, {pipeline_mode = #tpu.pipeline_mode<synchronous>, transform_indices = @transform_2, window_bounds = array<i64: 1, 32>}, {transform_indices = @transform_3, window_bounds = array<i64: 128, 32>}]} {
    %c0 = arith.constant 0 : index
    %c0_0 = arith.constant 0 : index
    %0 = vector.load %arg1[%c0, %c0_0] : memref<128x16xbf16, #tpu.memory_space<vmem>>, vector<128x16xbf16>
    %c0_1 = arith.constant 0 : index
    %c0_2 = arith.constant 0 : index
    %1 = vector.load %arg2[%c0_1, %c0_2] : memref<16x32xbf16, #tpu.memory_space<vmem>>, vector<16x32xbf16>
    %cst = arith.constant dense<0.000000e+00> : vector<128x32xf32>
    %2 = tpu.matmul %0, %1, %cst {dimension_numbers = #tpu.dot_dimension_numbers<[1], [0], [0], [1], [0, 0, 1, 1], [], []>} : vector<128x16xbf16>, vector<16x32xbf16>, vector<128x32xf32> -> vector<128x32xf32>
    %c0_3 = arith.constant 0 : index
    %c0_4 = arith.constant 0 : index
    %3 = vector.load %arg3[%c0_3, %c0_4] : memref<1x32xf32, #tpu.memory_space<vmem>>, vector<1x32xf32>
    %4 = vector.broadcast %3 : vector<1x32xf32> to vector<128x32xf32>
    %5 = arith.addf %2, %4 : vector<128x32xf32>
    %cst_5 = arith.constant 0.000000e+00 : f32
    %6 = vector.broadcast %cst_5 : f32 to vector<128x32xf32>
    %7 = arith.maximumf %5, %6 : vector<128x32xf32>
    %8 = arith.truncf %7 : vector<128x32xf32> to vector<128x32xbf16>
    %c0_6 = arith.constant 0 : index
    %c0_7 = arith.constant 0 : index
    %9 = vector.load %arg4[%c0_6, %c0_7] : memref<128x32xbf16, #tpu.memory_space<vmem>>, vector<128x32xbf16>
    tpu.vector_store %arg4[%c0_6, %c0_7], %8 {strides = array<i32>} : memref<128x32xbf16, #tpu.memory_space<vmem>>, vector<128x32xbf16>,
    return
  }
  func.func @transform_0(%arg0: i32) -> (i32, i32) {
    %c0_i32 = arith.constant 0 : i32
    %c0_i32_0 = arith.constant 0 : i32
    return %arg0, %c0_i32 : i32, i32
  }
  func.func @transform_1(%arg0: i32) -> (i32, i32) {
    %c0_i32 = arith.constant 0 : i32
    %c0_i32_0 = arith.constant 0 : i32
    %c0_i32_1 = arith.constant 0 : i32
    return %c0_i32, %c0_i32_0 : i32, i32
  }
  func.func @transform_2(%arg0: i32) -> (i32, i32) {
    %c0_i32 = arith.constant 0 : i32
    %c0_i32_0 = arith.constant 0 : i32
    %c0_i32_1 = arith.constant 0 : i32
    return %c0_i32, %c0_i32_0 : i32, i32
  }
  func.func @transform_3(%arg0: i32) -> (i32, i32) {
    %c0_i32 = arith.constant 0 : i32
    %c0_i32_0 = arith.constant 0 : i32
    return %arg0, %c0_i32 : i32, i32
  }
}

module attributes {stable_mosaic.version = 11 : i64} {
  func.func @_matmul_shift_relu_kernel(%arg0: i32, %arg1: memref<32x160xbf16, #tpu.memory_space<vmem>>, %arg2: memref<160x64xbf16, #tpu.memory_space<vmem>>, %arg3: memref<1x64xf32, #tpu.memory_space<vmem>>, %arg4: memref<32x64xbf16, #tpu.memory_space<vmem>>) attributes {dimension_semantics = [#tpu.dimension_semantics<parallel>], iteration_bounds = array<i64: 1>, scalar_prefetch = 0 : i64, scratch_operands = 0 : i64, tpu.core_type = #tpu.core_type<tc>, window_params = [{transform_indices = @transform_0, window_bounds = array<i64: 32, 160>}, {pipeline_mode = #tpu.pipeline_mode<synchronous>, transform_indices = @transform_1, window_bounds = array<i64: 160, 64>}, {pipeline_mode = #tpu.pipeline_mode<synchronous>, transform_indices = @transform_2, window_bounds = array<i64: 1, 64>}, {transform_indices = @transform_3, window_bounds = array<i64: 32, 64>}]} {
    %c0 = arith.constant 0 : index
    %c0_0 = arith.constant 0 : index
    %0 = vector.load %arg1[%c0, %c0_0] : memref<32x160xbf16, #tpu.memory_space<vmem>>, vector<32x160xbf16>
    %c0_1 = arith.constant 0 : index
    %c0_2 = arith.constant 0 : index
    %1 = vector.load %arg2[%c0_1, %c0_2] : memref<160x64xbf16, #tpu.memory_space<vmem>>, vector<160x64xbf16>
    %cst = arith.constant dense<0.000000e+00> : vector<32x64xf32>
    %2 = tpu.matmul %0, %1, %cst {dimension_numbers = #tpu.dot_dimension_numbers<[1], [0], [0], [1], [0, 0, 1, 1], [], []>} : vector<32x160xbf16>, vector<160x64xbf16>, vector<32x64xf32> -> vector<32x64xf32>
    %c0_3 = arith.constant 0 : index
    %c0_4 = arith.constant 0 : index
    %3 = vector.load %arg3[%c0_3, %c0_4] : memref<1x64xf32, #tpu.memory_space<vmem>>, vector<1x64xf32>
    %4 = vector.broadcast %3 : vector<1x64xf32> to vector<32x64xf32>
    %5 = arith.addf %2, %4 : vector<32x64xf32>
    %cst_5 = arith.constant 0.000000e+00 : f32
    %6 = vector.broadcast %cst_5 : f32 to vector<32x64xf32>
    %7 = arith.maximumf %5, %6 : vector<32x64xf32>
    %8 = arith.truncf %7 : vector<32x64xf32> to vector<32x64xbf16>
    %c0_6 = arith.constant 0 : index
    %c0_7 = arith.constant 0 : index
    %9 = vector.load %arg4[%c0_6, %c0_7] : memref<32x64xbf16, #tpu.memory_space<vmem>>, vector<32x64xbf16>
    tpu.vector_store %arg4[%c0_6, %c0_7], %8 {strides = array<i32>} : memref<32x64xbf16, #tpu.memory_space<vmem>>, vector<32x64xbf16>,
    return
  }
  func.func @transform_0(%arg0: i32) -> (i32, i32) {
    %c0_i32 = arith.constant 0 : i32
    %c0_i32_0 = arith.constant 0 : i32
    return %arg0, %c0_i32 : i32, i32
  }
  func.func @transform_1(%arg0: i32) -> (i32, i32) {
    %c0_i32 = arith.constant 0 : i32
    %c0_i32_0 = arith.constant 0 : i32
    %c0_i32_1 = arith.constant 0 : i32
    return %c0_i32, %c0_i32_0 : i32, i32
  }
  func.func @transform_2(%arg0: i32) -> (i32, i32) {
    %c0_i32 = arith.constant 0 : i32
    %c0_i32_0 = arith.constant 0 : i32
    %c0_i32_1 = arith.constant 0 : i32
    return %c0_i32, %c0_i32_0 : i32, i32
  }
  func.func @transform_3(%arg0: i32) -> (i32, i32) {
    %c0_i32 = arith.constant 0 : i32
    %c0_i32_0 = arith.constant 0 : i32
    return %arg0, %c0_i32 : i32, i32
  }
}

module attributes {stable_mosaic.version = 11 : i64} {
  func.func @_matmul_shift_relu_kernel(%arg0: i32, %arg1: memref<8x192xbf16, #tpu.memory_space<vmem>>, %arg2: memref<192x256xbf16, #tpu.memory_space<vmem>>, %arg3: memref<1x256xf32, #tpu.memory_space<vmem>>, %arg4: memref<8x256xbf16, #tpu.memory_space<vmem>>) attributes {dimension_semantics = [#tpu.dimension_semantics<parallel>], iteration_bounds = array<i64: 1>, scalar_prefetch = 0 : i64, scratch_operands = 0 : i64, tpu.core_type = #tpu.core_type<tc>, window_params = [{transform_indices = @transform_0, window_bounds = array<i64: 8, 192>}, {pipeline_mode = #tpu.pipeline_mode<synchronous>, transform_indices = @transform_1, window_bounds = array<i64: 192, 256>}, {pipeline_mode = #tpu.pipeline_mode<synchronous>, transform_indices = @transform_2, window_bounds = array<i64: 1, 256>}, {transform_indices = @transform_3, window_bounds = array<i64: 8, 256>}]} {
    %c0 = arith.constant 0 : index
    %c0_0 = arith.constant 0 : index
    %0 = vector.load %arg1[%c0, %c0_0] : memref<8x192xbf16, #tpu.memory_space<vmem>>, vector<8x192xbf16>
    %c0_1 = arith.constant 0 : index
    %c0_2 = arith.constant 0 : index
    %1 = vector.load %arg2[%c0_1, %c0_2] : memref<192x256xbf16, #tpu.memory_space<vmem>>, vector<192x256xbf16>
    %cst = arith.constant dense<0.000000e+00> : vector<8x256xf32>
    %2 = tpu.matmul %0, %1, %cst {dimension_numbers = #tpu.dot_dimension_numbers<[1], [0], [0], [1], [0, 0, 1, 1], [], []>} : vector<8x192xbf16>, vector<192x256xbf16>, vector<8x256xf32> -> vector<8x256xf32>
    %c0_3 = arith.constant 0 : index
    %c0_4 = arith.constant 0 : index
    %3 = vector.load %arg3[%c0_3, %c0_4] : memref<1x256xf32, #tpu.memory_space<vmem>>, vector<1x256xf32>
    %4 = vector.broadcast %3 : vector<1x256xf32> to vector<8x256xf32>
    %5 = arith.addf %2, %4 : vector<8x256xf32>
    %cst_5 = arith.constant 0.000000e+00 : f32
    %6 = vector.broadcast %cst_5 : f32 to vector<8x256xf32>
    %7 = arith.maximumf %5, %6 : vector<8x256xf32>
    %8 = arith.truncf %7 : vector<8x256xf32> to vector<8x256xbf16>
    %c0_6 = arith.constant 0 : index
    %c0_7 = arith.constant 0 : index
    %9 = vector.load %arg4[%c0_6, %c0_7] : memref<8x256xbf16, #tpu.memory_space<vmem>>, vector<8x256xbf16>
    tpu.vector_store %arg4[%c0_6, %c0_7], %8 {strides = array<i32>} : memref<8x256xbf16, #tpu.memory_space<vmem>>, vector<8x256xbf16>,
    return
  }
  func.func @transform_0(%arg0: i32) -> (i32, i32) {
    %c0_i32 = arith.constant 0 : i32
    %c0_i32_0 = arith.constant 0 : i32
    return %arg0, %c0_i32 : i32, i32
  }
  func.func @transform_1(%arg0: i32) -> (i32, i32) {
    %c0_i32 = arith.constant 0 : i32
    %c0_i32_0 = arith.constant 0 : i32
    %c0_i32_1 = arith.constant 0 : i32
    return %c0_i32, %c0_i32_0 : i32, i32
  }
  func.func @transform_2(%arg0: i32) -> (i32, i32) {
    %c0_i32 = arith.constant 0 : i32
    %c0_i32_0 = arith.constant 0 : i32
    %c0_i32_1 = arith.constant 0 : i32
    return %c0_i32, %c0_i32_0 : i32, i32
  }
  func.func @transform_3(%arg0: i32) -> (i32, i32) {
    %c0_i32 = arith.constant 0 : i32
    %c0_i32_0 = arith.constant 0 : i32
    return %arg0, %c0_i32 : i32, i32
  }
}

module attributes {stable_mosaic.version = 11 : i64} {
  func.func @_matmul_shift_relu_kernel(%arg0: i32, %arg1: memref<32x32xbf16, #tpu.memory_space<vmem>>, %arg2: memref<32x64xbf16, #tpu.memory_space<vmem>>, %arg3: memref<1x64xf32, #tpu.memory_space<vmem>>, %arg4: memref<32x64xbf16, #tpu.memory_space<vmem>>) attributes {dimension_semantics = [#tpu.dimension_semantics<parallel>], iteration_bounds = array<i64: 1>, scalar_prefetch = 0 : i64, scratch_operands = 0 : i64, tpu.core_type = #tpu.core_type<tc>, window_params = [{transform_indices = @transform_0, window_bounds = array<i64: 32, 32>}, {pipeline_mode = #tpu.pipeline_mode<synchronous>, transform_indices = @transform_1, window_bounds = array<i64: 32, 64>}, {pipeline_mode = #tpu.pipeline_mode<synchronous>, transform_indices = @transform_2, window_bounds = array<i64: 1, 64>}, {transform_indices = @transform_3, window_bounds = array<i64: 32, 64>}]} {
    %c0 = arith.constant 0 : index
    %c0_0 = arith.constant 0 : index
    %0 = vector.load %arg1[%c0, %c0_0] : memref<32x32xbf16, #tpu.memory_space<vmem>>, vector<32x32xbf16>
    %c0_1 = arith.constant 0 : index
    %c0_2 = arith.constant 0 : index
    %1 = vector.load %arg2[%c0_1, %c0_2] : memref<32x64xbf16, #tpu.memory_space<vmem>>, vector<32x64xbf16>
    %cst = arith.constant dense<0.000000e+00> : vector<32x64xf32>
    %2 = tpu.matmul %0, %1, %cst {dimension_numbers = #tpu.dot_dimension_numbers<[1], [0], [0], [1], [0, 0, 1, 1], [], []>} : vector<32x32xbf16>, vector<32x64xbf16>, vector<32x64xf32> -> vector<32x64xf32>
    %c0_3 = arith.constant 0 : index
    %c0_4 = arith.constant 0 : index
    %3 = vector.load %arg3[%c0_3, %c0_4] : memref<1x64xf32, #tpu.memory_space<vmem>>, vector<1x64xf32>
    %4 = vector.broadcast %3 : vector<1x64xf32> to vector<32x64xf32>
    %5 = arith.addf %2, %4 : vector<32x64xf32>
    %cst_5 = arith.constant 0.000000e+00 : f32
    %6 = vector.broadcast %cst_5 : f32 to vector<32x64xf32>
    %7 = arith.maximumf %5, %6 : vector<32x64xf32>
    %8 = arith.truncf %7 : vector<32x64xf32> to vector<32x64xbf16>
    %c0_6 = arith.constant 0 : index
    %c0_7 = arith.constant 0 : index
    %9 = vector.load %arg4[%c0_6, %c0_7] : memref<32x64xbf16, #tpu.memory_space<vmem>>, vector<32x64xbf16>
    tpu.vector_store %arg4[%c0_6, %c0_7], %8 {strides = array<i32>} : memref<32x64xbf16, #tpu.memory_space<vmem>>, vector<32x64xbf16>,
    return
  }
  func.func @transform_0(%arg0: i32) -> (i32, i32) {
    %c0_i32 = arith.constant 0 : i32
    %c0_i32_0 = arith.constant 0 : i32
    return %arg0, %c0_i32 : i32, i32
  }
  func.func @transform_1(%arg0: i32) -> (i32, i32) {
    %c0_i32 = arith.constant 0 : i32
    %c0_i32_0 = arith.constant 0 : i32
    %c0_i32_1 = arith.constant 0 : i32
    return %c0_i32, %c0_i32_0 : i32, i32
  }
  func.func @transform_2(%arg0: i32) -> (i32, i32) {
    %c0_i32 = arith.constant 0 : i32
    %c0_i32_0 = arith.constant 0 : i32
    %c0_i32_1 = arith.constant 0 : i32
    return %c0_i32, %c0_i32_0 : i32, i32
  }
  func.func @transform_3(%arg0: i32) -> (i32, i32) {
    %c0_i32 = arith.constant 0 : i32
    %c0_i32_0 = arith.constant 0 : i32
    return %arg0, %c0_i32 : i32, i32
  }
}

</mosaic_0001>

<bundles_post_ra>
// kernel: slowfast_forward.14
= control target key start
LH: loop header
LB: loop body
LE: loop exit
PB: predicated region body
PF: predicated region fallthrough
CT: control target
= control target key end

     0   :  { %s2894_s12 = smov 0   ;;  %s3447_s0 = inlined_call_operand.vmem [shape: bf16[2048,2], index: 0, kind: input, shape index: {}]   ;;  %s3448_s1 = inlined_call_operand.vmem [shape: bf16[2,8], index: 1, kind: input, shape index: {}]   ;;  %s3449_s2 = inlined_call_operand.vmem [shape: f32[1,8], index: 2, kind: input, shape index: {}]   ;;  %s3450_s3 = inlined_call_operand.vmem [shape: bf16[2048,8], index: 3, kind: output, shape index: {}]  }
   0x1 LB: > { %s2198_s13 = sadd.s32 4294967295, %s2872_s12   ;;  %p2202_p0 = scmp.ge.s32.totalorder %s2872_s12, 1  ;;  %s2872_s12 = sphi %s2894_s12, %s13_s12  }
   0x2   : > { %p138_p1 = scmp.lt.s32.totalorder %s2872_s12, 3 }
   0x4   : > { %p139_p2 = pnand %p2202_p0, %p138_p1 }
   0x5   : > { %v303_v0 = vld [vmem:[%s3448_s1] sm:$0x1] (!%p139_p2)  ;;  %vm824_vm0 = vcmask (!%p139_p2), 1040384   ;;  %s2203_s16 = sshll.u32 (!%p139_p2), %s2198_s13, 7  ;;  %vm631_vm1 = vcmask (!%p139_p2), 15360   ;;  %vm2013_vm2 = vcmask (!%p139_p2), 60416  }
   0x6   : > { %142 = sbr.rel (%p139_p2) target bundleno = 361 (0x169), region = 32  ;;  %2791 = vmatprep.subr.msk.bf16.mxu0 (!%p139_p2), %vm824_vm0, %v303_v0  ;;  %2792 = vmatprep.subr.msk.bf16.mxu1 (!%p139_p2), %vm824_vm0, %v303_v0  ;;  %v826_v1 = vsel (!%p139_p2), %vm824_vm0, %v303_v0, 0  ;;  %p163_p3 = scmp.lt.s32.totalorder (!%p139_p2), %s2203_s16, 255 }
   0x7   : > { %2660 = vmatpush3.bf16.msra.mxu0 (!%p139_p2), %v826_v1  ;;  %2790 = vmatpush3.bf16.msra.mxu1 (!%p139_p2), %v826_v1 }
   0xd   : > { %s3452_s16 = smov (!%p163_p3, %s2203_s16), 255 }
   0xe   : > { %s2204_s17 = sshll.u32 %s3452_s16, 2 }
   0xf   : > { %s2913_s20 = scalar_lea.vmem %s3447_s0, %s2204_s17  ;;  %s3058_s25 = scalar_lea.vmem %s3450_s3, %s2204_s17 }
  0x10   : > { %v2801_v2 = vld [vmem:[%s2913_s20] sm:$0xff]   ;;  %v2803_v4 = vld [vmem:[%s2913_s20 + $0x8] sm:$0xff]   ;;  %v2805_v6 = vld [vmem:[%s2913_s20 + $0x10] sm:$0xff]  }
  0x11   : > { %v2802_v3 = vld [vmem:[%s2913_s20 + $0x100] sm:$0xff]   ;;  %2661 = vmatprep.mubr.msk.bf16.mxu0 %vm631_vm1, %v2801_v2  ;;  %v2804_v5 = vld [vmem:[%s2913_s20 + $0x108] sm:$0xff]   ;;  %v2806_v7 = vld [vmem:[%s2913_s20 + $0x110] sm:$0xff]  }
  0x12   : > { %2725 = vmatprep.mubr.msk.bf16.mxu1 %vm631_vm1, %v2802_v3  ;;  %2662 = vmatmul.mubr.msk.bf16.vlgmr.msra.gmra.mrb[0].mxu0 %vm631_vm1, %v2803_v4  ;;  %v2807_v8 = vld [vmem:[%s2913_s20 + $0x18] sm:$0xff]   ;;  %v2809_v10 = vld [vmem:[%s2913_s20 + $0x20] sm:$0xff]   ;;  %v2811_v12 = vld [vmem:[%s2913_s20 + $0x28] sm:$0xff]  }
  0x13   : > { %2726 = vmatmul.mubr.msk.bf16.vlgmr.msra.gmra.mrb[0].mxu1 %vm631_vm1, %v2804_v5  ;;  %2665 = vmatprep.mubr.msk.bf16.mxu0 %vm631_vm1, %v2805_v6  ;;  %v2808_v9 = vld [vmem:[%s2913_s20 + $0x118] sm:$0xff]   ;;  %v2810_v11 = vld [vmem:[%s2913_s20 + $0x120] sm:$0xff]   ;;  %v2812_v13 = vld [vmem:[%s2913_s20 + $0x128] sm:$0xff]  }
  0x14   : > { %2729 = vmatprep.mubr.msk.bf16.mxu1 %vm631_vm1, %v2806_v7  ;;  %v2813_v14 = vld [vmem:[%s2913_s20 + $0x30] sm:$0xff]   ;;  %v2815_v16 = vld [vmem:[%s2913_s20 + $0x38] sm:$0xff]   ;;  %v2817_v18 = vld [vmem:[%s2913_s20 + $0x40] sm:$0xff]  }
  0x15   : > { %v2814_v15 = vld [vmem:[%s2913_s20 + $0x130] sm:$0xff]   ;;  %v2816_v17 = vld [vmem:[%s2913_s20 + $0x138] sm:$0xff]   ;;  %v2818_v19 = vld [vmem:[%s2913_s20 + $0x140] sm:$0xff]  }
  0x16   : > { %v2819_v20 = vld [vmem:[%s2913_s20 + $0x48] sm:$0xff]   ;;  %v2821_v22 = vld [vmem:[%s2913_s20 + $0x50] sm:$0xff]   ;;  %v2823_v24 = vld [vmem:[%s2913_s20 + $0x58] sm:$0xff]  }
  0x17   : > { %v2820_v21 = vld [vmem:[%s2913_s20 + $0x148] sm:$0xff]   ;;  %v2822_v23 = vld [vmem:[%s2913_s20 + $0x150] sm:$0xff]   ;;  %v2824_v25 = vld [vmem:[%s2913_s20 + $0x158] sm:$0xff]  }
  0x18   : > { %v2825_v26 = vld [vmem:[%s2913_s20 + $0x60] sm:$0xff]   ;;  %v2827_v28 = vld [vmem:[%s2913_s20 + $0x68] sm:$0xff]   ;;  %v2829_v30 = vld [vmem:[%s2913_s20 + $0x70] sm:$0xff]  }
  0x19   : > { %v2826_v27 = vld [vmem:[%s2913_s20 + $0x160] sm:$0xff]   ;;  %v2828_v29 = vld [vmem:[%s2913_s20 + $0x168] sm:$0xff]   ;;  %v2830_v31 = vld [vmem:[%s2913_s20 + $0x170] sm:$0xff]  }
  0x1a   : > { %2666 = vmatmul.mubr.msk.bf16.gmra.mrb[4].mxu0 %vm631_vm1, %v2807_v8  ;;  %v2831_v32 = vld [vmem:[%s2913_s20 + $0x78] sm:$0xff]   ;;  %v2833_v34 = vld [vmem:[%s2913_s20 + $0x80] sm:$0xff]   ;;  %v2835_v36 = vld [vmem:[%s2913_s20 + $0x88] sm:$0xff]  }
  0x1b   : > { %2730 = vmatmul.mubr.msk.bf16.gmra.mrb[4].mxu1 %vm631_vm1, %v2808_v9  ;;  %2669 = vmatprep.mubr.msk.bf16.mxu0 %vm631_vm1, %v2809_v10  ;;  %v2832_v33 = vld [vmem:[%s2913_s20 + $0x178] sm:$0xff]   ;;  %v2834_v35 = vld [vmem:[%s2913_s20 + $0x180] sm:$0xff]   ;;  %v2836_v37 = vld [vmem:[%s2913_s20 + $0x188] sm:$0xff]  }
  0x1c   : > { %2733 = vmatprep.mubr.msk.bf16.mxu1 %vm631_vm1, %v2810_v11  ;;  %v2837_v38 = vld [vmem:[%s2913_s20 + $0x90] sm:$0xff]   ;;  %v2839_v40 = vld [vmem:[%s2913_s20 + $0x98] sm:$0xff]   ;;  %v2841_v42 = vld [vmem:[%s2913_s20 + $0xa0] sm:$0xff]  }
  0x1d   : > { %v2838_v39 = vld [vmem:[%s2913_s20 + $0x190] sm:$0xff]   ;;  %v2840_v41 = vld [vmem:[%s2913_s20 + $0x198] sm:$0xff]   ;;  %v2842_v43 = vld [vmem:[%s2913_s20 + $0x1a0] sm:$0xff]  }
  0x1e   : > { %v2843_v44 = vld [vmem:[%s2913_s20 + $0xa8] sm:$0xff]   ;;  %v2845_v46 = vld [vmem:[%s2913_s20 + $0xb0] sm:$0xff]   ;;  %v2847_v48 = vld [vmem:[%s2913_s20 + $0xb8] sm:$0xff]  }
  0x1f   : > { %v2844_v45 = vld [vmem:[%s2913_s20 + $0x1a8] sm:$0xff]   ;;  %v2846_v47 = vld [vmem:[%s2913_s20 + $0x1b0] sm:$0xff]   ;;  %v2848_v49 = vld [vmem:[%s2913_s20 + $0x1b8] sm:$0xff]  }
  0x20   : > { %v2849_v50 = vld [vmem:[%s2913_s20 + $0xc0] sm:$0xff]   ;;  %v2851_v52 = vld [vmem:[%s2913_s20 + $0xc8] sm:$0xff]   ;;  %v2853_v54 = vld [vmem:[%s2913_s20 + $0xd0] sm:$0xff]  }
  0x21   : > { %v2850_v51 = vld [vmem:[%s2913_s20 + $0x1c0] sm:$0xff]   ;;  %v2852_v53 = vld [vmem:[%s2913_s20 + $0x1c8] sm:$0xff]   ;;  %v2854_v55 = vld [vmem:[%s2913_s20 + $0x1d0] sm:$0xff]  }
  0x22   : > { %2670 = vmatmul.mubr.msk.bf16.gmra.mrb[8].mxu0 %vm631_vm1, %v2811_v12  ;;  %v2855_v56 = vld [vmem:[%s2913_s20 + $0xd8] sm:$0xff]   ;;  %v2857_v58 = vld [vmem:[%s2913_s20 + $0xe0] sm:$0xff]   ;;  %v2859_v60 = vld [vmem:[%s2913_s20 + $0xe8] sm:$0xff]  }
  0x23   : > { %2734 = vmatmul.mubr.msk.bf16.gmra.mrb[8].mxu1 %vm631_vm1, %v2812_v13  ;;  %2673 = vmatprep.mubr.msk.bf16.mxu0 %vm631_vm1, %v2813_v14  ;;  %v2856_v57 = vld [vmem:[%s2913_s20 + $0x1d8] sm:$0xff]   ;;  %v2858_v59 = vld [vmem:[%s2913_s20 + $0x1e0] sm:$0xff]   ;;  %v2860_v61 = vld [vmem:[%s2913_s20 + $0x1e8] sm:$0xff]  }
  0x24   : > { %2737 = vmatprep.mubr.msk.bf16.mxu1 %vm631_vm1, %v2814_v15  ;;  %v2861_v62 = vld [vmem:[%s2913_s20 + $0xf0] sm:$0xff]   ;;  %v2863_v0 = vld [vmem:[%s2913_s20 + $0xf8] sm:$0xff]   ;;  %v3046_v2 = vld [vmem:[%s3449_s2] ss:$0 sm:$0xff] }
  0x25   : > { %v2862_v63 = vld [vmem:[%s2913_s20 + $0x1f0] sm:$0xff]   ;;  %v2864_v1 = vld [vmem:[%s2913_s20 + $0x1f8] sm:$0xff]  }
  0x2a   : > { %2674 = vmatmul.mubr.msk.bf16.gmra.mrb[12].mxu0 %vm631_vm1, %v2815_v16 }
  0x2b   : > { %2738 = vmatmul.mubr.msk.bf16.gmra.mrb[12].mxu1 %vm631_vm1, %v2816_v17  ;;  %2677 = vmatprep.mubr.msk.bf16.mxu0 %vm631_vm1, %v2817_v18 }
  0x2c   : > { %2741 = vmatprep.mubr.msk.bf16.mxu1 %vm631_vm1, %v2818_v19 }
  0x32   : > { %2678 = vmatmul.mubr.msk.bf16.gmra.mrb[16].mxu0 %vm631_vm1, %v2819_v20 }
  0x33   : > { %2742 = vmatmul.mubr.msk.bf16.gmra.mrb[16].mxu1 %vm631_vm1, %v2820_v21  ;;  %2681 = vmatprep.mubr.msk.bf16.mxu0 %vm631_vm1, %v2821_v22 }
  0x34   : > { %2745 = vmatprep.mubr.msk.bf16.mxu1 %vm631_vm1, %v2822_v23 }
  0x3a   : > { %2682 = vmatmul.mubr.msk.bf16.gmra.mrb[20].mxu0 %vm631_vm1, %v2823_v24 }
  0x3b   : > { %2746 = vmatmul.mubr.msk.bf16.gmra.mrb[20].mxu1 %vm631_vm1, %v2824_v25  ;;  %2685 = vmatprep.mubr.msk.bf16.mxu0 %vm631_vm1, %v2825_v26 }
  0x3c   : > { %2749 = vmatprep.mubr.msk.bf16.mxu1 %vm631_vm1, %v2826_v27 }
  0x42   : > { %2686 = vmatmul.mubr.msk.bf16.gmra.mrb[24].mxu0 %vm631_vm1, %v2827_v28 }
  0x43   : > { %2750 = vmatmul.mubr.msk.bf16.gmra.mrb[24].mxu1 %vm631_vm1, %v2828_v29  ;;  %2689 = vmatprep.mubr.msk.bf16.mxu0 %vm631_vm1, %v2829_v30 }
  0x44   : > { %2753 = vmatprep.mubr.msk.bf16.mxu1 %vm631_vm1, %v2830_v31 }
  0x4a   : > { %2690 = vmatmul.mubr.msk.bf16.gmra.mrb[28].mxu0 %vm631_vm1, %v2831_v32 }
  0x4b   : > { %2754 = vmatmul.mubr.msk.bf16.gmra.mrb[28].mxu1 %vm631_vm1, %v2832_v33  ;;  %2693 = vmatprep.mubr.msk.bf16.mxu0 %vm631_vm1, %v2833_v34 }
  0x4c   : > { %2757 = vmatprep.mubr.msk.bf16.mxu1 %vm631_vm1, %v2834_v35 }
  0x52   : > { %2694 = vmatmul.mubr.msk.bf16.gmra.mrb[32].mxu0 %vm631_vm1, %v2835_v36 }
  0x53   : > { %2758 = vmatmul.mubr.msk.bf16.gmra.mrb[32].mxu1 %vm631_vm1, %v2836_v37  ;;  %2697 = vmatprep.mubr.msk.bf16.mxu0 %vm631_vm1, %v2837_v38 }
  0x54   : > { %2761 = vmatprep.mubr.msk.bf16.mxu1 %vm631_vm1, %v2838_v39 }
  0x5a   : > { %2698 = vmatmul.mubr.msk.bf16.gmra.mrb[36].mxu0 %vm631_vm1, %v2839_v40 }
  0x5b   : > { %2762 = vmatmul.mubr.msk.bf16.gmra.mrb[36].mxu1 %vm631_vm1, %v2840_v41  ;;  %2701 = vmatprep.mubr.msk.bf16.mxu0 %vm631_vm1, %v2841_v42 }
  0x5c   : > { %2765 = vmatprep.mubr.msk.bf16.mxu1 %vm631_vm1, %v2842_v43 }
  0x62   : > { %2702 = vmatmul.mubr.msk.bf16.gmra.mrb[40].mxu0 %vm631_vm1, %v2843_v44 }
  0x63   : > { %2766 = vmatmul.mubr.msk.bf16.gmra.mrb[40].mxu1 %vm631_vm1, %v2844_v45  ;;  %2705 = vmatprep.mubr.msk.bf16.mxu0 %vm631_vm1, %v2845_v46 }
  0x64   : > { %2769 = vmatprep.mubr.msk.bf16.mxu1 %vm631_vm1, %v2846_v47 }
  0x6a   : > { %2706 = vmatmul.mubr.msk.bf16.gmra.mrb[44].mxu0 %vm631_vm1, %v2847_v48 }
  0x6b   : > { %2770 = vmatmul.mubr.msk.bf16.gmra.mrb[44].mxu1 %vm631_vm1, %v2848_v49  ;;  %2709 = vmatprep.mubr.msk.bf16.mxu0 %vm631_vm1, %v2849_v50 }
  0x6c   : > { %2773 = vmatprep.mubr.msk.bf16.mxu1 %vm631_vm1, %v2850_v51 }
  0x72   : > { %2710 = vmatmul.mubr.msk.bf16.gmra.mrb[48].mxu0 %vm631_vm1, %v2851_v52 }
  0x73   : > { %2774 = vmatmul.mubr.msk.bf16.gmra.mrb[48].mxu1 %vm631_vm1, %v2852_v53  ;;  %2713 = vmatprep.mubr.msk.bf16.mxu0 %vm631_vm1, %v2853_v54 }
  0x74   : > { %2777 = vmatprep.mubr.msk.bf16.mxu1 %vm631_vm1, %v2854_v55 }
  0x7a   : > { %2714 = vmatmul.mubr.msk.bf16.gmra.mrb[52].mxu0 %vm631_vm1, %v2855_v56 }
  0x7b   : > { %2778 = vmatmul.mubr.msk.bf16.gmra.mrb[52].mxu1 %vm631_vm1, %v2856_v57  ;;  %2717 = vmatprep.mubr.msk.bf16.mxu0 %vm631_vm1, %v2857_v58 }
  0x7c   : > { %2781 = vmatprep.mubr.msk.bf16.mxu1 %vm631_vm1, %v2858_v59 }
  0x82   : > { %2718 = vmatmul.mubr.msk.bf16.gmra.mrb[56].mxu0 %vm631_vm1, %v2859_v60 }
  0x83   : > { %2782 = vmatmul.mubr.msk.bf16.gmra.mrb[56].mxu1 %vm631_vm1, %v2860_v61  ;;  %2721 = vmatprep.mubr.msk.bf16.mxu0 %vm631_vm1, %v2861_v62 }
  0x84   : > { %2785 = vmatprep.mubr.msk.bf16.mxu1 %vm631_vm1, %v2862_v63 }
  0x8a   : > { %2722 = vmatmul.mubr.msk.bf16.gmra.mrb[60].mxu0 %vm631_vm1, %v2863_v0 }
  0x8b   : > { %2786 = vmatmul.mubr.msk.bf16.gmra.mrb[60].mxu1 %vm631_vm1, %v2864_v1 }
  0xe5   : > { %v2663_v3 = vpop.f32.mrb[0].mxu0 }
  0xe6   : > { %v871_v4 = vadd.f32 %v2663_v3, %v3046_v2  ;;  %v2727_v5 = vpop.f32.mrb[0].mxu1  ;;  %v862_v6 = vpop.f32.mrb[1].mxu0 }
  0xe7   : > { %v1127_v7 = vadd.f32 %v2727_v5, %v3046_v2  ;;  %v863_v8 = vadd.f32 %v3046_v2, %v862_v6  ;;  %v1118_v9 = vpop.f32.mrb[1].mxu1  ;;  %v2664_v10 = vpop.f32.mrb[2].mxu0 }
  0xe8   : > { %v1375_v11 = vmax.f32 %v871_v4, 0.0  ;;  %v1119_v12 = vadd.f32 %v3046_v2, %v1118_v9  ;;  %v874_v13 = vadd.f32 %v2664_v10, %v3046_v2  ;;  %v2728_v14 = vpop.f32.mrb[2].mxu1  ;;  %v865_v15 = vpop.f32.mrb[3].mxu0 }
  0xe9   : > { %v1439_v16 = vmax.f32 %v1127_v7, 0.0  ;;  %v1373_v17 = vmax.f32 %v863_v8, 0.0  ;;  %v1130_v18 = vadd.f32 %v2728_v14, %v3046_v2  ;;  %v866_v19 = vadd.f32 %v3046_v2, %v865_v15  ;;  %v1121_v20 = vpop.f32.mrb[3].mxu1 }
  0xea   : > { %v2468_v21 = vpack.c.bf16 %v1375_v11, %v1375_v11  ;;  %v1437_v22 = vmax.f32 %v1119_v12, 0.0  ;;  %v1376_v23 = vmax.f32 %v874_v13, 0.0  ;;  %v1122_v24 = vadd.f32 %v3046_v2, %v1121_v20 }
  0xeb   : > { %v2532_v25 = vpack.c.bf16 %v1439_v16, %v1439_v16  ;;  %v2466_v26 = vpack.c.bf16 %v1373_v17, %v1373_v17  ;;  %v1440_v27 = vmax.f32 %v1130_v18, 0.0  ;;  %v1374_v28 = vmax.f32 %v866_v19, 0.0 }
  0xec   : > { %2016 = vst.msk [vmem:[%s3058_s25 + $0x8] sm:$0xf] %vm2013_vm2, %v2468_v21  ;;  %v2530_v29 = vpack.c.bf16 %v1437_v22, %v1437_v22  ;;  %v2469_v30 = vpack.c.bf16 %v1376_v23, %v1376_v23  ;;  %v1438_v31 = vmax.f32 %v1122_v24, 0.0 }
  0xed   : > { %2080 = vst.msk [vmem:[%s3058_s25 + $0x108] sm:$0xf] %vm2013_vm2, %v2532_v25  ;;  %2014 = vst.msk [vmem:[%s3058_s25] sm:$0xf] %vm2013_vm2, %v2466_v26  ;;  %v2533_v32 = vpack.c.bf16 %v1440_v27, %v1440_v27  ;;  %v2467_v33 = vpack.c.bf16 %v1374_v28, %v1374_v28  ;;  %v2667_v34 = vpop.f32.mrb[4].mxu0 }
  0xee   : > { %2078 = vst.msk [vmem:[%s3058_s25 + $0x100] sm:$0xf] %vm2013_vm2, %v2530_v29  ;;  %2017 = vst.msk [vmem:[%s3058_s25 + $0xc] sm:$0xf] %vm2013_vm2, %v2469_v30  ;;  %v2531_v35 = vpack.c.bf16 %v1438_v31, %v1438_v31  ;;  %v887_v36 = vadd.f32 %v2667_v34, %v3046_v2  ;;  %v2731_v37 = vpop.f32.mrb[4].mxu1  ;;  %v878_v38 = vpop.f32.mrb[5].mxu0 }
  0xef   : > { %2081 = vst.msk [vmem:[%s3058_s25 + $0x10c] sm:$0xf] %vm2013_vm2, %v2533_v32  ;;  %2015 = vst.msk [vmem:[%s3058_s25 + $0x4] sm:$0xf] %vm2013_vm2, %v2467_v33  ;;  %v1143_v39 = vadd.f32 %v2731_v37, %v3046_v2  ;;  %v879_v40 = vadd.f32 %v3046_v2, %v878_v38  ;;  %v1134_v41 = vpop.f32.mrb[5].mxu1  ;;  %v2668_v42 = vpop.f32.mrb[6].mxu0 }
  0xf0   : > { %2079 = vst.msk [vmem:[%s3058_s25 + $0x104] sm:$0xf] %vm2013_vm2, %v2531_v35  ;;  %v1379_v43 = vmax.f32 %v887_v36, 0.0  ;;  %v1135_v44 = vadd.f32 %v3046_v2, %v1134_v41  ;;  %v890_v45 = vadd.f32 %v2668_v42, %v3046_v2  ;;  %v2732_v46 = vpop.f32.mrb[6].mxu1  ;;  %v881_v47 = vpop.f32.mrb[7].mxu0 }
  0xf1   : > { %v1443_v48 = vmax.f32 %v1143_v39, 0.0  ;;  %v1377_v49 = vmax.f32 %v879_v40, 0.0  ;;  %v1146_v50 = vadd.f32 %v2732_v46, %v3046_v2  ;;  %v882_v51 = vadd.f32 %v3046_v2, %v881_v47  ;;  %v1137_v52 = vpop.f32.mrb[7].mxu1 }
  0xf2   : > { %v2472_v53 = vpack.c.bf16 %v1379_v43, %v1379_v43  ;;  %v1441_v54 = vmax.f32 %v1135_v44, 0.0  ;;  %v1380_v55 = vmax.f32 %v890_v45, 0.0  ;;  %v1138_v56 = vadd.f32 %v3046_v2, %v1137_v52 }
  0xf3   : > { %v2536_v57 = vpack.c.bf16 %v1443_v48, %v1443_v48  ;;  %v2470_v58 = vpack.c.bf16 %v1377_v49, %v1377_v49  ;;  %v1444_v59 = vmax.f32 %v1146_v50, 0.0  ;;  %v1378_v60 = vmax.f32 %v882_v51, 0.0 }
  0xf4   : > { %2020 = vst.msk [vmem:[%s3058_s25 + $0x18] sm:$0xf] %vm2013_vm2, %v2472_v53  ;;  %v2534_v61 = vpack.c.bf16 %v1441_v54, %v1441_v54  ;;  %v2473_v62 = vpack.c.bf16 %v1380_v55, %v1380_v55  ;;  %v1442_v63 = vmax.f32 %v1138_v56, 0.0 }
  0xf5   : > { %2084 = vst.msk [vmem:[%s3058_s25 + $0x118] sm:$0xf] %vm2013_vm2, %v2536_v57  ;;  %2018 = vst.msk [vmem:[%s3058_s25 + $0x10] sm:$0xf] %vm2013_vm2, %v2470_v58  ;;  %v2537_v0 = vpack.c.bf16 %v1444_v59, %v1444_v59  ;;  %v2471_v1 = vpack.c.bf16 %v1378_v60, %v1378_v60  ;;  %v2671_v3 = vpop.f32.mrb[8].mxu0 }
  0xf6   : > { %2082 = vst.msk [vmem:[%s3058_s25 + $0x110] sm:$0xf] %vm2013_vm2, %v2534_v61  ;;  %2021 = vst.msk [vmem:[%s3058_s25 + $0x1c] sm:$0xf] %vm2013_vm2, %v2473_v62  ;;  %v2535_v4 = vpack.c.bf16 %v1442_v63, %v1442_v63  ;;  %v903_v5 = vadd.f32 %v2671_v3, %v3046_v2  ;;  %v2735_v6 = vpop.f32.mrb[8].mxu1  ;;  %v894_v7 = vpop.f32.mrb[9].mxu0 }
  0xf7   : > { %2085 = vst.msk [vmem:[%s3058_s25 + $0x11c] sm:$0xf] %vm2013_vm2, %v2537_v0  ;;  %2019 = vst.msk [vmem:[%s3058_s25 + $0x14] sm:$0xf] %vm2013_vm2, %v2471_v1  ;;  %v1159_v8 = vadd.f32 %v2735_v6, %v3046_v2  ;;  %v895_v9 = vadd.f32 %v3046_v2, %v894_v7  ;;  %v1150_v10 = vpop.f32.mrb[9].mxu1  ;;  %v2672_v11 = vpop.f32.mrb[10].mxu0 }
  0xf8   : > { %2083 = vst.msk [vmem:[%s3058_s25 + $0x114] sm:$0xf] %vm2013_vm2, %v2535_v4  ;;  %v1383_v12 = vmax.f32 %v903_v5, 0.0  ;;  %v1151_v13 = vadd.f32 %v3046_v2, %v1150_v10  ;;  %v906_v14 = vadd.f32 %v2672_v11, %v3046_v2  ;;  %v2736_v15 = vpop.f32.mrb[10].mxu1  ;;  %v897_v16 = vpop.f32.mrb[11].mxu0 }
  0xf9   : > { %v1447_v17 = vmax.f32 %v1159_v8, 0.0  ;;  %v1381_v18 = vmax.f32 %v895_v9, 0.0  ;;  %v1162_v19 = vadd.f32 %v2736_v15, %v3046_v2  ;;  %v898_v20 = vadd.f32 %v3046_v2, %v897_v16  ;;  %v1153_v21 = vpop.f32.mrb[11].mxu1 }
  0xfa   : > { %v2476_v22 = vpack.c.bf16 %v1383_v12, %v1383_v12  ;;  %v1445_v23 = vmax.f32 %v1151_v13, 0.0  ;;  %v1384_v24 = vmax.f32 %v906_v14, 0.0  ;;  %v1154_v25 = vadd.f32 %v3046_v2, %v1153_v21 }
  0xfb   : > { %v2540_v26 = vpack.c.bf16 %v1447_v17, %v1447_v17  ;;  %v2474_v27 = vpack.c.bf16 %v1381_v18, %v1381_v18  ;;  %v1448_v28 = vmax.f32 %v1162_v19, 0.0  ;;  %v1382_v29 = vmax.f32 %v898_v20, 0.0 }
  0xfc   : > { %2024 = vst.msk [vmem:[%s3058_s25 + $0x28] sm:$0xf] %vm2013_vm2, %v2476_v22  ;;  %v2538_v30 = vpack.c.bf16 %v1445_v23, %v1445_v23  ;;  %v2477_v31 = vpack.c.bf16 %v1384_v24, %v1384_v24  ;;  %v1446_v32 = vmax.f32 %v1154_v25, 0.0 }
  0xfd   : > { %2088 = vst.msk [vmem:[%s3058_s25 + $0x128] sm:$0xf] %vm2013_vm2, %v2540_v26  ;;  %2022 = vst.msk [vmem:[%s3058_s25 + $0x20] sm:$0xf] %vm2013_vm2, %v2474_v27  ;;  %v2541_v33 = vpack.c.bf16 %v1448_v28, %v1448_v28  ;;  %v2475_v34 = vpack.c.bf16 %v1382_v29, %v1382_v29  ;;  %v2675_v35 = vpop.f32.mrb[12].mxu0 }
  0xfe   : > { %2086 = vst.msk [vmem:[%s3058_s25 + $0x120] sm:$0xf] %vm2013_vm2, %v2538_v30  ;;  %2025 = vst.msk [vmem:[%s3058_s25 + $0x2c] sm:$0xf] %vm2013_vm2, %v2477_v31  ;;  %v2539_v36 = vpack.c.bf16 %v1446_v32, %v1446_v32  ;;  %v919_v37 = vadd.f32 %v2675_v35, %v3046_v2  ;;  %v2739_v38 = vpop.f32.mrb[12].mxu1  ;;  %v910_v39 = vpop.f32.mrb[13].mxu0 }
  0xff   : > { %2089 = vst.msk [vmem:[%s3058_s25 + $0x12c] sm:$0xf] %vm2013_vm2, %v2541_v33  ;;  %2023 = vst.msk [vmem:[%s3058_s25 + $0x24] sm:$0xf] %vm2013_vm2, %v2475_v34  ;;  %v1175_v40 = vadd.f32 %v2739_v38, %v3046_v2  ;;  %v911_v41 = vadd.f32 %v3046_v2, %v910_v39  ;;  %v1166_v42 = vpop.f32.mrb[13].mxu1  ;;  %v2676_v43 = vpop.f32.mrb[14].mxu0 }
 0x100   : > { %2087 = vst.msk [vmem:[%s3058_s25 + $0x124] sm:$0xf] %vm2013_vm2, %v2539_v36  ;;  %v1387_v44 = vmax.f32 %v919_v37, 0.0  ;;  %v1167_v45 = vadd.f32 %v3046_v2, %v1166_v42  ;;  %v922_v46 = vadd.f32 %v2676_v43, %v3046_v2  ;;  %v2740_v47 = vpop.f32.mrb[14].mxu1  ;;  %v913_v48 = vpop.f32.mrb[15].mxu0 }
 0x101   : > { %v1451_v49 = vmax.f32 %v1175_v40, 0.0  ;;  %v1385_v50 = vmax.f32 %v911_v41, 0.0  ;;  %v1178_v51 = vadd.f32 %v2740_v47, %v3046_v2  ;;  %v914_v52 = vadd.f32 %v3046_v2, %v913_v48  ;;  %v1169_v53 = vpop.f32.mrb[15].mxu1 }
 0x102   : > { %v2480_v54 = vpack.c.bf16 %v1387_v44, %v1387_v44  ;;  %v1449_v55 = vmax.f32 %v1167_v45, 0.0  ;;  %v1388_v56 = vmax.f32 %v922_v46, 0.0  ;;  %v1170_v57 = vadd.f32 %v3046_v2, %v1169_v53 }
 0x103   : > { %v2544_v58 = vpack.c.bf16 %v1451_v49, %v1451_v49  ;;  %v2478_v59 = vpack.c.bf16 %v1385_v50, %v1385_v50  ;;  %v1452_v60 = vmax.f32 %v1178_v51, 0.0  ;;  %v1386_v61 = vmax.f32 %v914_v52, 0.0 }
 0x104   : > { %2028 = vst.msk [vmem:[%s3058_s25 + $0x38] sm:$0xf] %vm2013_vm2, %v2480_v54  ;;  %v2542_v62 = vpack.c.bf16 %v1449_v55, %v1449_v55  ;;  %v2481_v63 = vpack.c.bf16 %v1388_v56, %v1388_v56  ;;  %v1450_v0 = vmax.f32 %v1170_v57, 0.0 }
 0x105   : > { %2092 = vst.msk [vmem:[%s3058_s25 + $0x138] sm:$0xf] %vm2013_vm2, %v2544_v58  ;;  %2026 = vst.msk [vmem:[%s3058_s25 + $0x30] sm:$0xf] %vm2013_vm2, %v2478_v59  ;;  %v2545_v1 = vpack.c.bf16 %v1452_v60, %v1452_v60  ;;  %v2479_v3 = vpack.c.bf16 %v1386_v61, %v1386_v61  ;;  %v2679_v4 = vpop.f32.mrb[16].mxu0 }
 0x106   : > { %2090 = vst.msk [vmem:[%s3058_s25 + $0x130] sm:$0xf] %vm2013_vm2, %v2542_v62  ;;  %2029 = vst.msk [vmem:[%s3058_s25 + $0x3c] sm:$0xf] %vm2013_vm2, %v2481_v63  ;;  %v2543_v5 = vpack.c.bf16 %v1450_v0, %v1450_v0  ;;  %v935_v6 = vadd.f32 %v2679_v4, %v3046_v2  ;;  %v2743_v7 = vpop.f32.mrb[16].mxu1  ;;  %v926_v8 = vpop.f32.mrb[17].mxu0 }
 0x107   : > { %2093 = vst.msk [vmem:[%s3058_s25 + $0x13c] sm:$0xf] %vm2013_vm2, %v2545_v1  ;;  %2027 = vst.msk [vmem:[%s3058_s25 + $0x34] sm:$0xf] %vm2013_vm2, %v2479_v3  ;;  %v1191_v9 = vadd.f32 %v2743_v7, %v3046_v2  ;;  %v927_v10 = vadd.f32 %v3046_v2, %v926_v8  ;;  %v1182_v11 = vpop.f32.mrb[17].mxu1  ;;  %v2680_v12 = vpop.f32.mrb[18].mxu0 }
 0x108   : > { %2091 = vst.msk [vmem:[%s3058_s25 + $0x134] sm:$0xf] %vm2013_vm2, %v2543_v5  ;;  %v1391_v13 = vmax.f32 %v935_v6, 0.0  ;;  %v1183_v14 = vadd.f32 %v3046_v2, %v1182_v11  ;;  %v938_v15 = vadd.f32 %v2680_v12, %v3046_v2  ;;  %v2744_v16 = vpop.f32.mrb[18].mxu1  ;;  %v929_v17 = vpop.f32.mrb[19].mxu0 }
 0x109   : > { %v1455_v18 = vmax.f32 %v1191_v9, 0.0  ;;  %v1389_v19 = vmax.f32 %v927_v10, 0.0  ;;  %v1194_v20 = vadd.f32 %v2744_v16, %v3046_v2  ;;  %v930_v21 = vadd.f32 %v3046_v2, %v929_v17  ;;  %v1185_v22 = vpop.f32.mrb[19].mxu1 }
 0x10a   : > { %v2484_v23 = vpack.c.bf16 %v1391_v13, %v1391_v13  ;;  %v1453_v24 = vmax.f32 %v1183_v14, 0.0  ;;  %v1392_v25 = vmax.f32 %v938_v15, 0.0  ;;  %v1186_v26 = vadd.f32 %v3046_v2, %v1185_v22 }
 0x10b   : > { %v2548_v27 = vpack.c.bf16 %v1455_v18, %v1455_v18  ;;  %v2482_v28 = vpack.c.bf16 %v1389_v19, %v1389_v19  ;;  %v1456_v29 = vmax.f32 %v1194_v20, 0.0  ;;  %v1390_v30 = vmax.f32 %v930_v21, 0.0 }
 0x10c   : > { %2032 = vst.msk [vmem:[%s3058_s25 + $0x48] sm:$0xf] %vm2013_vm2, %v2484_v23  ;;  %v2546_v31 = vpack.c.bf16 %v1453_v24, %v1453_v24  ;;  %v2485_v32 = vpack.c.bf16 %v1392_v25, %v1392_v25  ;;  %v1454_v33 = vmax.f32 %v1186_v26, 0.0 }
 0x10d   : > { %2096 = vst.msk [vmem:[%s3058_s25 + $0x148] sm:$0xf] %vm2013_vm2, %v2548_v27  ;;  %2030 = vst.msk [vmem:[%s3058_s25 + $0x40] sm:$0xf] %vm2013_vm2, %v2482_v28  ;;  %v2549_v34 = vpack.c.bf16 %v1456_v29, %v1456_v29  ;;  %v2483_v35 = vpack.c.bf16 %v1390_v30, %v1390_v30  ;;  %v2683_v36 = vpop.f32.mrb[20].mxu0 }
 0x10e   : > { %2094 = vst.msk [vmem:[%s3058_s25 + $0x140] sm:$0xf] %vm2013_vm2, %v2546_v31  ;;  %2033 = vst.msk [vmem:[%s3058_s25 + $0x4c] sm:$0xf] %vm2013_vm2, %v2485_v32  ;;  %v2547_v37 = vpack.c.bf16 %v1454_v33, %v1454_v33  ;;  %v951_v38 = vadd.f32 %v2683_v36, %v3046_v2  ;;  %v2747_v39 = vpop.f32.mrb[20].mxu1  ;;  %v942_v40 = vpop.f32.mrb[21].mxu0 }
 0x10f   : > { %2097 = vst.msk [vmem:[%s3058_s25 + $0x14c] sm:$0xf] %vm2013_vm2, %v2549_v34  ;;  %2031 = vst.msk [vmem:[%s3058_s25 + $0x44] sm:$0xf] %vm2013_vm2, %v2483_v35  ;;  %v1207_v41 = vadd.f32 %v2747_v39, %v3046_v2  ;;  %v943_v42 = vadd.f32 %v3046_v2, %v942_v40  ;;  %v1198_v43 = vpop.f32.mrb[21].mxu1  ;;  %v2684_v44 = vpop.f32.mrb[22].mxu0 }
 0x110   : > { %2095 = vst.msk [vmem:[%s3058_s25 + $0x144] sm:$0xf] %vm2013_vm2, %v2547_v37  ;;  %v1395_v45 = vmax.f32 %v951_v38, 0.0  ;;  %v1199_v46 = vadd.f32 %v3046_v2, %v1198_v43  ;;  %v954_v47 = vadd.f32 %v2684_v44, %v3046_v2  ;;  %v2748_v48 = vpop.f32.mrb[22].mxu1  ;;  %v945_v49 = vpop.f32.mrb[23].mxu0 }
 0x111   : > { %v1459_v50 = vmax.f32 %v1207_v41, 0.0  ;;  %v1393_v51 = vmax.f32 %v943_v42, 0.0  ;;  %v1210_v52 = vadd.f32 %v2748_v48, %v3046_v2  ;;  %v946_v53 = vadd.f32 %v3046_v2, %v945_v49  ;;  %v1201_v54 = vpop.f32.mrb[23].mxu1 }
 0x112   : > { %v2488_v55 = vpack.c.bf16 %v1395_v45, %v1395_v45  ;;  %v1457_v56 = vmax.f32 %v1199_v46, 0.0  ;;  %v1396_v57 = vmax.f32 %v954_v47, 0.0  ;;  %v1202_v58 = vadd.f32 %v3046_v2, %v1201_v54 }
 0x113   : > { %v2552_v59 = vpack.c.bf16 %v1459_v50, %v1459_v50  ;;  %v2486_v60 = vpack.c.bf16 %v1393_v51, %v1393_v51  ;;  %v1460_v61 = vmax.f32 %v1210_v52, 0.0  ;;  %v1394_v62 = vmax.f32 %v946_v53, 0.0 }
 0x114   : > { %2036 = vst.msk [vmem:[%s3058_s25 + $0x58] sm:$0xf] %vm2013_vm2, %v2488_v55  ;;  %v2550_v63 = vpack.c.bf16 %v1457_v56, %v1457_v56  ;;  %v2489_v0 = vpack.c.bf16 %v1396_v57, %v1396_v57  ;;  %v1458_v1 = vmax.f32 %v1202_v58, 0.0 }
 0x115   : > { %2100 = vst.msk [vmem:[%s3058_s25 + $0x158] sm:$0xf] %vm2013_vm2, %v2552_v59  ;;  %2034 = vst.msk [vmem:[%s3058_s25 + $0x50] sm:$0xf] %vm2013_vm2, %v2486_v60  ;;  %v2553_v3 = vpack.c.bf16 %v1460_v61, %v1460_v61  ;;  %v2487_v4 = vpack.c.bf16 %v1394_v62, %v1394_v62  ;;  %v2687_v5 = vpop.f32.mrb[24].mxu0 }
 0x116   : > { %2098 = vst.msk [vmem:[%s3058_s25 + $0x150] sm:$0xf] %vm2013_vm2, %v2550_v63  ;;  %2037 = vst.msk [vmem:[%s3058_s25 + $0x5c] sm:$0xf] %vm2013_vm2, %v2489_v0  ;;  %v2551_v6 = vpack.c.bf16 %v1458_v1, %v1458_v1  ;;  %v967_v7 = vadd.f32 %v2687_v5, %v3046_v2  ;;  %v2751_v8 = vpop.f32.mrb[24].mxu1  ;;  %v958_v9 = vpop.f32.mrb[25].mxu0 }
 0x117   : > { %2101 = vst.msk [vmem:[%s3058_s25 + $0x15c] sm:$0xf] %vm2013_vm2, %v2553_v3  ;;  %2035 = vst.msk [vmem:[%s3058_s25 + $0x54] sm:$0xf] %vm2013_vm2, %v2487_v4  ;;  %v1223_v10 = vadd.f32 %v2751_v8, %v3046_v2  ;;  %v959_v11 = vadd.f32 %v3046_v2, %v958_v9  ;;  %v1214_v12 = vpop.f32.mrb[25].mxu1  ;;  %v2688_v13 = vpop.f32.mrb[26].mxu0 }
 0x118   : > { %2099 = vst.msk [vmem:[%s3058_s25 + $0x154] sm:$0xf] %vm2013_vm2, %v2551_v6  ;;  %v1399_v14 = vmax.f32 %v967_v7, 0.0  ;;  %v1215_v15 = vadd.f32 %v3046_v2, %v1214_v12  ;;  %v970_v16 = vadd.f32 %v2688_v13, %v3046_v2  ;;  %v2752_v17 = vpop.f32.mrb[26].mxu1  ;;  %v961_v18 = vpop.f32.mrb[27].mxu0 }
 0x119   : > { %v1463_v19 = vmax.f32 %v1223_v10, 0.0  ;;  %v1397_v20 = vmax.f32 %v959_v11, 0.0  ;;  %v1226_v21 = vadd.f32 %v2752_v17, %v3046_v2  ;;  %v962_v22 = vadd.f32 %v3046_v2, %v961_v18  ;;  %v1217_v23 = vpop.f32.mrb[27].mxu1 }
 0x11a   : > { %v2492_v24 = vpack.c.bf16 %v1399_v14, %v1399_v14  ;;  %v1461_v25 = vmax.f32 %v1215_v15, 0.0  ;;  %v1400_v26 = vmax.f32 %v970_v16, 0.0  ;;  %v1218_v27 = vadd.f32 %v3046_v2, %v1217_v23 }
 0x11b   : > { %v2556_v28 = vpack.c.bf16 %v1463_v19, %v1463_v19  ;;  %v2490_v29 = vpack.c.bf16 %v1397_v20, %v1397_v20  ;;  %v1464_v30 = vmax.f32 %v1226_v21, 0.0  ;;  %v1398_v31 = vmax.f32 %v962_v22, 0.0 }
 0x11c   : > { %2040 = vst.msk [vmem:[%s3058_s25 + $0x68] sm:$0xf] %vm2013_vm2, %v2492_v24  ;;  %v2554_v32 = vpack.c.bf16 %v1461_v25, %v1461_v25  ;;  %v2493_v33 = vpack.c.bf16 %v1400_v26, %v1400_v26  ;;  %v1462_v34 = vmax.f32 %v1218_v27, 0.0 }
 0x11d   : > { %2104 = vst.msk [vmem:[%s3058_s25 + $0x168] sm:$0xf] %vm2013_vm2, %v2556_v28  ;;  %2038 = vst.msk [vmem:[%s3058_s25 + $0x60] sm:$0xf] %vm2013_vm2, %v2490_v29  ;;  %v2557_v35 = vpack.c.bf16 %v1464_v30, %v1464_v30  ;;  %v2491_v36 = vpack.c.bf16 %v1398_v31, %v1398_v31  ;;  %v2691_v37 = vpop.f32.mrb[28].mxu0 }
 0x11e   : > { %2102 = vst.msk [vmem:[%s3058_s25 + $0x160] sm:$0xf] %vm2013_vm2, %v2554_v32  ;;  %2041 = vst.msk [vmem:[%s3058_s25 + $0x6c] sm:$0xf] %vm2013_vm2, %v2493_v33  ;;  %v2555_v38 = vpack.c.bf16 %v1462_v34, %v1462_v34  ;;  %v983_v39 = vadd.f32 %v2691_v37, %v3046_v2  ;;  %v2755_v40 = vpop.f32.mrb[28].mxu1  ;;  %v974_v41 = vpop.f32.mrb[29].mxu0 }
 0x11f   : > { %2105 = vst.msk [vmem:[%s3058_s25 + $0x16c] sm:$0xf] %vm2013_vm2, %v2557_v35  ;;  %2039 = vst.msk [vmem:[%s3058_s25 + $0x64] sm:$0xf] %vm2013_vm2, %v2491_v36  ;;  %v1239_v42 = vadd.f32 %v2755_v40, %v3046_v2  ;;  %v975_v43 = vadd.f32 %v3046_v2, %v974_v41  ;;  %v1230_v44 = vpop.f32.mrb[29].mxu1  ;;  %v2692_v45 = vpop.f32.mrb[30].mxu0 }
 0x120   : > { %2103 = vst.msk [vmem:[%s3058_s25 + $0x164] sm:$0xf] %vm2013_vm2, %v2555_v38  ;;  %v1403_v46 = vmax.f32 %v983_v39, 0.0  ;;  %v1231_v47 = vadd.f32 %v3046_v2, %v1230_v44  ;;  %v986_v48 = vadd.f32 %v2692_v45, %v3046_v2  ;;  %v2756_v49 = vpop.f32.mrb[30].mxu1  ;;  %v977_v50 = vpop.f32.mrb[31].mxu0 }
 0x121   : > { %v1467_v51 = vmax.f32 %v1239_v42, 0.0  ;;  %v1401_v52 = vmax.f32 %v975_v43, 0.0  ;;  %v1242_v53 = vadd.f32 %v2756_v49, %v3046_v2  ;;  %v978_v54 = vadd.f32 %v3046_v2, %v977_v50  ;;  %v1233_v55 = vpop.f32.mrb[31].mxu1 }
 0x122   : > { %v2496_v56 = vpack.c.bf16 %v1403_v46, %v1403_v46  ;;  %v1465_v57 = vmax.f32 %v1231_v47, 0.0  ;;  %v1404_v58 = vmax.f32 %v986_v48, 0.0  ;;  %v1234_v59 = vadd.f32 %v3046_v2, %v1233_v55 }
 0x123   : > { %v2560_v60 = vpack.c.bf16 %v1467_v51, %v1467_v51  ;;  %v2494_v61 = vpack.c.bf16 %v1401_v52, %v1401_v52  ;;  %v1468_v62 = vmax.f32 %v1242_v53, 0.0  ;;  %v1402_v63 = vmax.f32 %v978_v54, 0.0 }
 0x124   : > { %2044 = vst.msk [vmem:[%s3058_s25 + $0x78] sm:$0xf] %vm2013_vm2, %v2496_v56  ;;  %v2558_v0 = vpack.c.bf16 %v1465_v57, %v1465_v57  ;;  %v2497_v1 = vpack.c.bf16 %v1404_v58, %v1404_v58  ;;  %v1466_v3 = vmax.f32 %v1234_v59, 0.0 }
 0x125   : > { %2108 = vst.msk [vmem:[%s3058_s25 + $0x178] sm:$0xf] %vm2013_vm2, %v2560_v60  ;;  %2042 = vst.msk [vmem:[%s3058_s25 + $0x70] sm:$0xf] %vm2013_vm2, %v2494_v61  ;;  %v2561_v4 = vpack.c.bf16 %v1468_v62, %v1468_v62  ;;  %v2495_v5 = vpack.c.bf16 %v1402_v63, %v1402_v63  ;;  %v2695_v6 = vpop.f32.mrb[32].mxu0 }
 0x126   : > { %2106 = vst.msk [vmem:[%s3058_s25 + $0x170] sm:$0xf] %vm2013_vm2, %v2558_v0  ;;  %2045 = vst.msk [vmem:[%s3058_s25 + $0x7c] sm:$0xf] %vm2013_vm2, %v2497_v1  ;;  %v2559_v7 = vpack.c.bf16 %v1466_v3, %v1466_v3  ;;  %v999_v8 = vadd.f32 %v2695_v6, %v3046_v2  ;;  %v2759_v9 = vpop.f32.mrb[32].mxu1  ;;  %v990_v10 = vpop.f32.mrb[33].mxu0 }
 0x127   : > { %2109 = vst.msk [vmem:[%s3058_s25 + $0x17c] sm:$0xf] %vm2013_vm2, %v2561_v4  ;;  %2043 = vst.msk [vmem:[%s3058_s25 + $0x74] sm:$0xf] %vm2013_vm2, %v2495_v5  ;;  %v1255_v11 = vadd.f32 %v2759_v9, %v3046_v2  ;;  %v991_v12 = vadd.f32 %v3046_v2, %v990_v10  ;;  %v1246_v13 = vpop.f32.mrb[33].mxu1  ;;  %v2696_v14 = vpop.f32.mrb[34].mxu0 }
 0x128   : > { %2107 = vst.msk [vmem:[%s3058_s25 + $0x174] sm:$0xf] %vm2013_vm2, %v2559_v7  ;;  %v1407_v15 = vmax.f32 %v999_v8, 0.0  ;;  %v1247_v16 = vadd.f32 %v3046_v2, %v1246_v13  ;;  %v1002_v17 = vadd.f32 %v2696_v14, %v3046_v2  ;;  %v2760_v18 = vpop.f32.mrb[34].mxu1  ;;  %v993_v19 = vpop.f32.mrb[35].mxu0 }
 0x129   : > { %v1471_v20 = vmax.f32 %v1255_v11, 0.0  ;;  %v1405_v21 = vmax.f32 %v991_v12, 0.0  ;;  %v1258_v22 = vadd.f32 %v2760_v18, %v3046_v2  ;;  %v994_v23 = vadd.f32 %v3046_v2, %v993_v19  ;;  %v1249_v24 = vpop.f32.mrb[35].mxu1 }
 0x12a   : > { %v2500_v25 = vpack.c.bf16 %v1407_v15, %v1407_v15  ;;  %v1469_v26 = vmax.f32 %v1247_v16, 0.0  ;;  %v1408_v27 = vmax.f32 %v1002_v17, 0.0  ;;  %v1250_v28 = vadd.f32 %v3046_v2, %v1249_v24 }
 0x12b   : > { %v2564_v29 = vpack.c.bf16 %v1471_v20, %v1471_v20  ;;  %v2498_v30 = vpack.c.bf16 %v1405_v21, %v1405_v21  ;;  %v1472_v31 = vmax.f32 %v1258_v22, 0.0  ;;  %v1406_v32 = vmax.f32 %v994_v23, 0.0 }
 0x12c   : > { %2048 = vst.msk [vmem:[%s3058_s25 + $0x88] sm:$0xf] %vm2013_vm2, %v2500_v25  ;;  %v2562_v33 = vpack.c.bf16 %v1469_v26, %v1469_v26  ;;  %v2501_v34 = vpack.c.bf16 %v1408_v27, %v1408_v27  ;;  %v1470_v35 = vmax.f32 %v1250_v28, 0.0 }
 0x12d   : > { %2112 = vst.msk [vmem:[%s3058_s25 + $0x188] sm:$0xf] %vm2013_vm2, %v2564_v29  ;;  %2046 = vst.msk [vmem:[%s3058_s25 + $0x80] sm:$0xf] %vm2013_vm2, %v2498_v30  ;;  %v2565_v36 = vpack.c.bf16 %v1472_v31, %v1472_v31  ;;  %v2499_v37 = vpack.c.bf16 %v1406_v32, %v1406_v32  ;;  %v2699_v38 = vpop.f32.mrb[36].mxu0 }
 0x12e   : > { %2110 = vst.msk [vmem:[%s3058_s25 + $0x180] sm:$0xf] %vm2013_vm2, %v2562_v33  ;;  %2049 = vst.msk [vmem:[%s3058_s25 + $0x8c] sm:$0xf] %vm2013_vm2, %v2501_v34  ;;  %v2563_v39 = vpack.c.bf16 %v1470_v35, %v1470_v35  ;;  %v1015_v40 = vadd.f32 %v2699_v38, %v3046_v2  ;;  %v2763_v41 = vpop.f32.mrb[36].mxu1  ;;  %v1006_v42 = vpop.f32.mrb[37].mxu0 }
 0x12f   : > { %2113 = vst.msk [vmem:[%s3058_s25 + $0x18c] sm:$0xf] %vm2013_vm2, %v2565_v36  ;;  %2047 = vst.msk [vmem:[%s3058_s25 + $0x84] sm:$0xf] %vm2013_vm2, %v2499_v37  ;;  %v1271_v43 = vadd.f32 %v2763_v41, %v3046_v2  ;;  %v1007_v44 = vadd.f32 %v3046_v2, %v1006_v42  ;;  %v1262_v45 = vpop.f32.mrb[37].mxu1  ;;  %v2700_v46 = vpop.f32.mrb[38].mxu0 }
 0x130   : > { %2111 = vst.msk [vmem:[%s3058_s25 + $0x184] sm:$0xf] %vm2013_vm2, %v2563_v39  ;;  %v1411_v47 = vmax.f32 %v1015_v40, 0.0  ;;  %v1263_v48 = vadd.f32 %v3046_v2, %v1262_v45  ;;  %v1018_v49 = vadd.f32 %v2700_v46, %v3046_v2  ;;  %v2764_v50 = vpop.f32.mrb[38].mxu1  ;;  %v1009_v51 = vpop.f32.mrb[39].mxu0 }
 0x131   : > { %v1475_v52 = vmax.f32 %v1271_v43, 0.0  ;;  %v1409_v53 = vmax.f32 %v1007_v44, 0.0  ;;  %v1274_v54 = vadd.f32 %v2764_v50, %v3046_v2  ;;  %v1010_v55 = vadd.f32 %v3046_v2, %v1009_v51  ;;  %v1265_v56 = vpop.f32.mrb[39].mxu1 }
 0x132   : > { %v2504_v57 = vpack.c.bf16 %v1411_v47, %v1411_v47  ;;  %v1473_v58 = vmax.f32 %v1263_v48, 0.0  ;;  %v1412_v59 = vmax.f32 %v1018_v49, 0.0  ;;  %v1266_v60 = vadd.f32 %v3046_v2, %v1265_v56 }
 0x133   : > { %v2568_v61 = vpack.c.bf16 %v1475_v52, %v1475_v52  ;;  %v2502_v62 = vpack.c.bf16 %v1409_v53, %v1409_v53  ;;  %v1476_v63 = vmax.f32 %v1274_v54, 0.0  ;;  %v1410_v0 = vmax.f32 %v1010_v55, 0.0 }
 0x134   : > { %2052 = vst.msk [vmem:[%s3058_s25 + $0x98] sm:$0xf] %vm2013_vm2, %v2504_v57  ;;  %v2566_v1 = vpack.c.bf16 %v1473_v58, %v1473_v58  ;;  %v2505_v3 = vpack.c.bf16 %v1412_v59, %v1412_v59  ;;  %v1474_v4 = vmax.f32 %v1266_v60, 0.0 }
 0x135   : > { %2116 = vst.msk [vmem:[%s3058_s25 + $0x198] sm:$0xf] %vm2013_vm2, %v2568_v61  ;;  %2050 = vst.msk [vmem:[%s3058_s25 + $0x90] sm:$0xf] %vm2013_vm2, %v2502_v62  ;;  %v2569_v5 = vpack.c.bf16 %v1476_v63, %v1476_v63  ;;  %v2503_v6 = vpack.c.bf16 %v1410_v0, %v1410_v0  ;;  %v2703_v7 = vpop.f32.mrb[40].mxu0 }
 0x136   : > { %2114 = vst.msk [vmem:[%s3058_s25 + $0x190] sm:$0xf] %vm2013_vm2, %v2566_v1  ;;  %2053 = vst.msk [vmem:[%s3058_s25 + $0x9c] sm:$0xf] %vm2013_vm2, %v2505_v3  ;;  %v2567_v8 = vpack.c.bf16 %v1474_v4, %v1474_v4  ;;  %v1031_v9 = vadd.f32 %v2703_v7, %v3046_v2  ;;  %v2767_v10 = vpop.f32.mrb[40].mxu1  ;;  %v1022_v11 = vpop.f32.mrb[41].mxu0 }
 0x137   : > { %2117 = vst.msk [vmem:[%s3058_s25 + $0x19c] sm:$0xf] %vm2013_vm2, %v2569_v5  ;;  %2051 = vst.msk [vmem:[%s3058_s25 + $0x94] sm:$0xf] %vm2013_vm2, %v2503_v6  ;;  %v1287_v12 = vadd.f32 %v2767_v10, %v3046_v2  ;;  %v1023_v13 = vadd.f32 %v3046_v2, %v1022_v11  ;;  %v1278_v14 = vpop.f32.mrb[41].mxu1  ;;  %v2704_v15 = vpop.f32.mrb[42].mxu0 }
 0x138   : > { %2115 = vst.msk [vmem:[%s3058_s25 + $0x194] sm:$0xf] %vm2013_vm2, %v2567_v8  ;;  %v1415_v16 = vmax.f32 %v1031_v9, 0.0  ;;  %v1279_v17 = vadd.f32 %v3046_v2, %v1278_v14  ;;  %v1034_v18 = vadd.f32 %v2704_v15, %v3046_v2  ;;  %v2768_v19 = vpop.f32.mrb[42].mxu1  ;;  %v1025_v20 = vpop.f32.mrb[43].mxu0 }
 0x139   : > { %v1479_v21 = vmax.f32 %v1287_v12, 0.0  ;;  %v1413_v22 = vmax.f32 %v1023_v13, 0.0  ;;  %v1290_v23 = vadd.f32 %v2768_v19, %v3046_v2  ;;  %v1026_v24 = vadd.f32 %v3046_v2, %v1025_v20  ;;  %v1281_v25 = vpop.f32.mrb[43].mxu1 }
 0x13a   : > { %v2508_v26 = vpack.c.bf16 %v1415_v16, %v1415_v16  ;;  %v1477_v27 = vmax.f32 %v1279_v17, 0.0  ;;  %v1416_v28 = vmax.f32 %v1034_v18, 0.0  ;;  %v1282_v29 = vadd.f32 %v3046_v2, %v1281_v25 }
 0x13b   : > { %v2572_v30 = vpack.c.bf16 %v1479_v21, %v1479_v21  ;;  %v2506_v31 = vpack.c.bf16 %v1413_v22, %v1413_v22  ;;  %v1480_v32 = vmax.f32 %v1290_v23, 0.0  ;;  %v1414_v33 = vmax.f32 %v1026_v24, 0.0 }
 0x13c   : > { %2056 = vst.msk [vmem:[%s3058_s25 + $0xa8] sm:$0xf] %vm2013_vm2, %v2508_v26  ;;  %v2570_v34 = vpack.c.bf16 %v1477_v27, %v1477_v27  ;;  %v2509_v35 = vpack.c.bf16 %v1416_v28, %v1416_v28  ;;  %v1478_v36 = vmax.f32 %v1282_v29, 0.0 }
 0x13d   : > { %2120 = vst.msk [vmem:[%s3058_s25 + $0x1a8] sm:$0xf] %vm2013_vm2, %v2572_v30  ;;  %2054 = vst.msk [vmem:[%s3058_s25 + $0xa0] sm:$0xf] %vm2013_vm2, %v2506_v31  ;;  %v2573_v37 = vpack.c.bf16 %v1480_v32, %v1480_v32  ;;  %v2507_v38 = vpack.c.bf16 %v1414_v33, %v1414_v33  ;;  %v2707_v39 = vpop.f32.mrb[44].mxu0 }
 0x13e   : > { %2118 = vst.msk [vmem:[%s3058_s25 + $0x1a0] sm:$0xf] %vm2013_vm2, %v2570_v34  ;;  %2057 = vst.msk [vmem:[%s3058_s25 + $0xac] sm:$0xf] %vm2013_vm2, %v2509_v35  ;;  %v2571_v40 = vpack.c.bf16 %v1478_v36, %v1478_v36  ;;  %v1047_v41 = vadd.f32 %v2707_v39, %v3046_v2  ;;  %v2771_v42 = vpop.f32.mrb[44].mxu1  ;;  %v1038_v43 = vpop.f32.mrb[45].mxu0 }
 0x13f   : > { %2121 = vst.msk [vmem:[%s3058_s25 + $0x1ac] sm:$0xf] %vm2013_vm2, %v2573_v37  ;;  %2055 = vst.msk [vmem:[%s3058_s25 + $0xa4] sm:$0xf] %vm2013_vm2, %v2507_v38  ;;  %v1303_v44 = vadd.f32 %v2771_v42, %v3046_v2  ;;  %v1039_v45 = vadd.f32 %v3046_v2, %v1038_v43  ;;  %v1294_v46 = vpop.f32.mrb[45].mxu1  ;;  %v2708_v47 = vpop.f32.mrb[46].mxu0 }
 0x140   : > { %2119 = vst.msk [vmem:[%s3058_s25 + $0x1a4] sm:$0xf] %vm2013_vm2, %v2571_v40  ;;  %v1419_v48 = vmax.f32 %v1047_v41, 0.0  ;;  %v1295_v49 = vadd.f32 %v3046_v2, %v1294_v46  ;;  %v1050_v50 = vadd.f32 %v2708_v47, %v3046_v2  ;;  %v2772_v51 = vpop.f32.mrb[46].mxu1  ;;  %v1041_v52 = vpop.f32.mrb[47].mxu0 }
 0x141   : > { %v1483_v53 = vmax.f32 %v1303_v44, 0.0  ;;  %v1417_v54 = vmax.f32 %v1039_v45, 0.0  ;;  %v1306_v55 = vadd.f32 %v2772_v51, %v3046_v2  ;;  %v1042_v56 = vadd.f32 %v3046_v2, %v1041_v52  ;;  %v1297_v57 = vpop.f32.mrb[47].mxu1  ;;  %v3364_v41 = vld [vmem:[%s3449_s2] ss:$0 sm:$0xff] }
 0x142   : > { %v2512_v58 = vpack.c.bf16 %v1419_v48, %v1419_v48  ;;  %v1481_v59 = vmax.f32 %v1295_v49, 0.0  ;;  %v1420_v60 = vmax.f32 %v1050_v50, 0.0  ;;  %v1298_v61 = vadd.f32 %v3046_v2, %v1297_v57 }
 0x143   : > { %v2576_v62 = vpack.c.bf16 %v1483_v53, %v1483_v53  ;;  %v2510_v63 = vpack.c.bf16 %v1417_v54, %v1417_v54  ;;  %v1484_v0 = vmax.f32 %v1306_v55, 0.0  ;;  %v1418_v1 = vmax.f32 %v1042_v56, 0.0 }
 0x144   : > { %2060 = vst.msk [vmem:[%s3058_s25 + $0xb8] sm:$0xf] %vm2013_vm2, %v2512_v58  ;;  %v2574_v3 = vpack.c.bf16 %v1481_v59, %v1481_v59  ;;  %v2513_v4 = vpack.c.bf16 %v1420_v60, %v1420_v60  ;;  %v1482_v5 = vmax.f32 %v1298_v61, 0.0 }
 0x145   : > { %2124 = vst.msk [vmem:[%s3058_s25 + $0x1b8] sm:$0xf] %vm2013_vm2, %v2576_v62  ;;  %2058 = vst.msk [vmem:[%s3058_s25 + $0xb0] sm:$0xf] %vm2013_vm2, %v2510_v63  ;;  %v2577_v6 = vpack.c.bf16 %v1484_v0, %v1484_v0  ;;  %v2511_v7 = vpack.c.bf16 %v1418_v1, %v1418_v1  ;;  %v2711_v8 = vpop.f32.mrb[48].mxu0 }
 0x146   : > { %2122 = vst.msk [vmem:[%s3058_s25 + $0x1b0] sm:$0xf] %vm2013_vm2, %v2574_v3  ;;  %2061 = vst.msk [vmem:[%s3058_s25 + $0xbc] sm:$0xf] %vm2013_vm2, %v2513_v4  ;;  %v2575_v9 = vpack.c.bf16 %v1482_v5, %v1482_v5  ;;  %v1063_v10 = vadd.f32 %v2711_v8, %v3046_v2  ;;  %v2775_v11 = vpop.f32.mrb[48].mxu1  ;;  %v1054_v12 = vpop.f32.mrb[49].mxu0 }
 0x147   : > { %2125 = vst.msk [vmem:[%s3058_s25 + $0x1bc] sm:$0xf] %vm2013_vm2, %v2577_v6  ;;  %2059 = vst.msk [vmem:[%s3058_s25 + $0xb4] sm:$0xf] %vm2013_vm2, %v2511_v7  ;;  %v1319_v13 = vadd.f32 %v2775_v11, %v3046_v2  ;;  %v1055_v14 = vadd.f32 %v3046_v2, %v1054_v12  ;;  %v1310_v15 = vpop.f32.mrb[49].mxu1  ;;  %v2712_v16 = vpop.f32.mrb[50].mxu0 }
 0x148   : > { %2123 = vst.msk [vmem:[%s3058_s25 + $0x1b4] sm:$0xf] %vm2013_vm2, %v2575_v9  ;;  %v1423_v17 = vmax.f32 %v1063_v10, 0.0  ;;  %v1311_v18 = vadd.f32 %v3046_v2, %v1310_v15  ;;  %v1066_v19 = vadd.f32 %v2712_v16, %v3046_v2  ;;  %v2776_v20 = vpop.f32.mrb[50].mxu1  ;;  %v1057_v21 = vpop.f32.mrb[51].mxu0 }
 0x149   : > { %v1487_v22 = vmax.f32 %v1319_v13, 0.0  ;;  %v1421_v23 = vmax.f32 %v1055_v14, 0.0  ;;  %v1322_v24 = vadd.f32 %v2776_v20, %v3046_v2  ;;  %v1058_v25 = vadd.f32 %v3046_v2, %v1057_v21  ;;  %v1313_v26 = vpop.f32.mrb[51].mxu1 }
 0x14a   : > { %v2516_v27 = vpack.c.bf16 %v1423_v17, %v1423_v17  ;;  %v1485_v28 = vmax.f32 %v1311_v18, 0.0  ;;  %v1424_v29 = vmax.f32 %v1066_v19, 0.0  ;;  %v1314_v30 = vadd.f32 %v3046_v2, %v1313_v26 }
 0x14b   : > { %v2580_v31 = vpack.c.bf16 %v1487_v22, %v1487_v22  ;;  %v2514_v32 = vpack.c.bf16 %v1421_v23, %v1421_v23  ;;  %v1488_v33 = vmax.f32 %v1322_v24, 0.0  ;;  %v1422_v34 = vmax.f32 %v1058_v25, 0.0 }
 0x14c   : > { %2064 = vst.msk [vmem:[%s3058_s25 + $0xc8] sm:$0xf] %vm2013_vm2, %v2516_v27  ;;  %v2578_v35 = vpack.c.bf16 %v1485_v28, %v1485_v28  ;;  %v2517_v36 = vpack.c.bf16 %v1424_v29, %v1424_v29  ;;  %v1486_v37 = vmax.f32 %v1314_v30, 0.0 }
 0x14d   : > { %2128 = vst.msk [vmem:[%s3058_s25 + $0x1c8] sm:$0xf] %vm2013_vm2, %v2580_v31  ;;  %2062 = vst.msk [vmem:[%s3058_s25 + $0xc0] sm:$0xf] %vm2013_vm2, %v2514_v32  ;;  %v2581_v38 = vpack.c.bf16 %v1488_v33, %v1488_v33  ;;  %v2515_v39 = vpack.c.bf16 %v1422_v34, %v1422_v34  ;;  %v2715_v40 = vpop.f32.mrb[52].mxu0 }
 0x14e   : > { %2126 = vst.msk [vmem:[%s3058_s25 + $0x1c0] sm:$0xf] %vm2013_vm2, %v2578_v35  ;;  %2065 = vst.msk [vmem:[%s3058_s25 + $0xcc] sm:$0xf] %vm2013_vm2, %v2517_v36  ;;  %v2579_v2 = vpack.c.bf16 %v1486_v37, %v1486_v37  ;;  %v1079_v42 = vadd.f32 %v3364_v41, %v2715_v40  ;;  %v2779_v43 = vpop.f32.mrb[52].mxu1  ;;  %v1070_v44 = vpop.f32.mrb[53].mxu0 }
 0x14f   : > { %2129 = vst.msk [vmem:[%s3058_s25 + $0x1cc] sm:$0xf] %vm2013_vm2, %v2581_v38  ;;  %2063 = vst.msk [vmem:[%s3058_s25 + $0xc4] sm:$0xf] %vm2013_vm2, %v2515_v39  ;;  %v1335_v45 = vadd.f32 %v3364_v41, %v2779_v43  ;;  %v1071_v46 = vadd.f32 %v3364_v41, %v1070_v44  ;;  %v1326_v47 = vpop.f32.mrb[53].mxu1  ;;  %v2716_v48 = vpop.f32.mrb[54].mxu0 }
 0x150   : > { %2127 = vst.msk [vmem:[%s3058_s25 + $0x1c4] sm:$0xf] %vm2013_vm2, %v2579_v2  ;;  %v1427_v49 = vmax.f32 %v1079_v42, 0.0  ;;  %v1327_v50 = vadd.f32 %v3364_v41, %v1326_v47  ;;  %v1082_v51 = vadd.f32 %v3364_v41, %v2716_v48  ;;  %v2780_v52 = vpop.f32.mrb[54].mxu1  ;;  %v1073_v53 = vpop.f32.mrb[55].mxu0 }
 0x151   : > { %v1491_v54 = vmax.f32 %v1335_v45, 0.0  ;;  %v1425_v55 = vmax.f32 %v1071_v46, 0.0  ;;  %v1338_v56 = vadd.f32 %v3364_v41, %v2780_v52  ;;  %v1074_v57 = vadd.f32 %v3364_v41, %v1073_v53  ;;  %v1329_v58 = vpop.f32.mrb[55].mxu1 }
 0x152   : > { %v2520_v59 = vpack.c.bf16 %v1427_v49, %v1427_v49  ;;  %v1489_v60 = vmax.f32 %v1327_v50, 0.0  ;;  %v1428_v61 = vmax.f32 %v1082_v51, 0.0  ;;  %v1330_v62 = vadd.f32 %v3364_v41, %v1329_v58 }
 0x153   : > { %v2584_v63 = vpack.c.bf16 %v1491_v54, %v1491_v54  ;;  %v2518_v0 = vpack.c.bf16 %v1425_v55, %v1425_v55  ;;  %v1492_v1 = vmax.f32 %v1338_v56, 0.0  ;;  %v1426_v3 = vmax.f32 %v1074_v57, 0.0 }
 0x154   : > { %2068 = vst.msk [vmem:[%s3058_s25 + $0xd8] sm:$0xf] %vm2013_vm2, %v2520_v59  ;;  %v2582_v4 = vpack.c.bf16 %v1489_v60, %v1489_v60  ;;  %v2521_v5 = vpack.c.bf16 %v1428_v61, %v1428_v61  ;;  %v1490_v6 = vmax.f32 %v1330_v62, 0.0 }
 0x155   : > { %2132 = vst.msk [vmem:[%s3058_s25 + $0x1d8] sm:$0xf] %vm2013_vm2, %v2584_v63  ;;  %2066 = vst.msk [vmem:[%s3058_s25 + $0xd0] sm:$0xf] %vm2013_vm2, %v2518_v0  ;;  %v2585_v7 = vpack.c.bf16 %v1492_v1, %v1492_v1  ;;  %v2519_v8 = vpack.c.bf16 %v1426_v3, %v1426_v3  ;;  %v2719_v9 = vpop.f32.mrb[56].mxu0 }
 0x156   : > { %2130 = vst.msk [vmem:[%s3058_s25 + $0x1d0] sm:$0xf] %vm2013_vm2, %v2582_v4  ;;  %2069 = vst.msk [vmem:[%s3058_s25 + $0xdc] sm:$0xf] %vm2013_vm2, %v2521_v5  ;;  %v2583_v10 = vpack.c.bf16 %v1490_v6, %v1490_v6  ;;  %v1095_v11 = vadd.f32 %v3364_v41, %v2719_v9  ;;  %v2783_v12 = vpop.f32.mrb[56].mxu1  ;;  %v1086_v13 = vpop.f32.mrb[57].mxu0 }
 0x157   : > { %2133 = vst.msk [vmem:[%s3058_s25 + $0x1dc] sm:$0xf] %vm2013_vm2, %v2585_v7  ;;  %2067 = vst.msk [vmem:[%s3058_s25 + $0xd4] sm:$0xf] %vm2013_vm2, %v2519_v8  ;;  %v1351_v14 = vadd.f32 %v3364_v41, %v2783_v12  ;;  %v1087_v15 = vadd.f32 %v3364_v41, %v1086_v13  ;;  %v1342_v16 = vpop.f32.mrb[57].mxu1  ;;  %v2720_v17 = vpop.f32.mrb[58].mxu0 }
 0x158   : > { %2131 = vst.msk [vmem:[%s3058_s25 + $0x1d4] sm:$0xf] %vm2013_vm2, %v2583_v10  ;;  %v1431_v18 = vmax.f32 %v1095_v11, 0.0  ;;  %v1343_v19 = vadd.f32 %v3364_v41, %v1342_v16  ;;  %v1098_v20 = vadd.f32 %v3364_v41, %v2720_v17  ;;  %v2784_v21 = vpop.f32.mrb[58].mxu1  ;;  %v1089_v22 = vpop.f32.mrb[59].mxu0 }
 0x159   : > { %v1495_v23 = vmax.f32 %v1351_v14, 0.0  ;;  %v1429_v24 = vmax.f32 %v1087_v15, 0.0  ;;  %v1354_v25 = vadd.f32 %v3364_v41, %v2784_v21  ;;  %v1090_v26 = vadd.f32 %v3364_v41, %v1089_v22  ;;  %v1345_v27 = vpop.f32.mrb[59].mxu1 }
 0x15a   : > { %v2524_v28 = vpack.c.bf16 %v1431_v18, %v1431_v18  ;;  %v1493_v29 = vmax.f32 %v1343_v19, 0.0  ;;  %v1432_v30 = vmax.f32 %v1098_v20, 0.0  ;;  %v1346_v31 = vadd.f32 %v3364_v41, %v1345_v27 }
 0x15b   : > { %v2588_v32 = vpack.c.bf16 %v1495_v23, %v1495_v23  ;;  %v2522_v33 = vpack.c.bf16 %v1429_v24, %v1429_v24  ;;  %v1496_v34 = vmax.f32 %v1354_v25, 0.0  ;;  %v1430_v35 = vmax.f32 %v1090_v26, 0.0 }
 0x15c   : > { %2072 = vst.msk [vmem:[%s3058_s25 + $0xe8] sm:$0xf] %vm2013_vm2, %v2524_v28  ;;  %v2586_v36 = vpack.c.bf16 %v1493_v29, %v1493_v29  ;;  %v2525_v37 = vpack.c.bf16 %v1432_v30, %v1432_v30  ;;  %v1494_v38 = vmax.f32 %v1346_v31, 0.0 }
 0x15d   : > { %2136 = vst.msk [vmem:[%s3058_s25 + $0x1e8] sm:$0xf] %vm2013_vm2, %v2588_v32  ;;  %2070 = vst.msk [vmem:[%s3058_s25 + $0xe0] sm:$0xf] %vm2013_vm2, %v2522_v33  ;;  %v2589_v39 = vpack.c.bf16 %v1496_v34, %v1496_v34  ;;  %v2523_v40 = vpack.c.bf16 %v1430_v35, %v1430_v35  ;;  %v2723_v2 = vpop.f32.mrb[60].mxu0 }
 0x15e   : > { %2134 = vst.msk [vmem:[%s3058_s25 + $0x1e0] sm:$0xf] %vm2013_vm2, %v2586_v36  ;;  %2073 = vst.msk [vmem:[%s3058_s25 + $0xec] sm:$0xf] %vm2013_vm2, %v2525_v37  ;;  %v2587_v42 = vpack.c.bf16 %v1494_v38, %v1494_v38  ;;  %v1111_v43 = vadd.f32 %v3364_v41, %v2723_v2  ;;  %v2787_v44 = vpop.f32.mrb[60].mxu1  ;;  %v1102_v45 = vpop.f32.mrb[61].mxu0 }
 0x15f   : > { %2137 = vst.msk [vmem:[%s3058_s25 + $0x1ec] sm:$0xf] %vm2013_vm2, %v2589_v39  ;;  %2071 = vst.msk [vmem:[%s3058_s25 + $0xe4] sm:$0xf] %vm2013_vm2, %v2523_v40  ;;  %v1367_v46 = vadd.f32 %v3364_v41, %v2787_v44  ;;  %v1103_v47 = vadd.f32 %v3364_v41, %v1102_v45  ;;  %v1358_v48 = vpop.f32.mrb[61].mxu1  ;;  %v2724_v49 = vpop.f32.mrb[62].mxu0 }
 0x160   : > { %2135 = vst.msk [vmem:[%s3058_s25 + $0x1e4] sm:$0xf] %vm2013_vm2, %v2587_v42  ;;  %v1435_v50 = vmax.f32 %v1111_v43, 0.0  ;;  %v1359_v51 = vadd.f32 %v3364_v41, %v1358_v48  ;;  %v1114_v52 = vadd.f32 %v3364_v41, %v2724_v49  ;;  %v2788_v53 = vpop.f32.mrb[62].mxu1  ;;  %v1105_v54 = vpop.f32.mrb[63].mxu0 }
 0x161   : > { %v1499_v55 = vmax.f32 %v1367_v46, 0.0  ;;  %v1433_v56 = vmax.f32 %v1103_v47, 0.0  ;;  %v1370_v57 = vadd.f32 %v3364_v41, %v2788_v53  ;;  %v1106_v58 = vadd.f32 %v3364_v41, %v1105_v54  ;;  %v1361_v59 = vpop.f32.mrb[63].mxu1 }
 0x162   : > { %v2528_v60 = vpack.c.bf16 %v1435_v50, %v1435_v50  ;;  %v1497_v61 = vmax.f32 %v1359_v51, 0.0  ;;  %v1436_v62 = vmax.f32 %v1114_v52, 0.0  ;;  %v1362_v63 = vadd.f32 %v3364_v41, %v1361_v59 }
 0x163   : > { %v2592_v0 = vpack.c.bf16 %v1499_v55, %v1499_v55  ;;  %v2526_v1 = vpack.c.bf16 %v1433_v56, %v1433_v56  ;;  %v1500_v3 = vmax.f32 %v1370_v57, 0.0  ;;  %v1434_v4 = vmax.f32 %v1106_v58, 0.0 }
 0x164   : > { %2076 = vst.msk [vmem:[%s3058_s25 + $0xf8] sm:$0xf] %vm2013_vm2, %v2528_v60  ;;  %v2590_v5 = vpack.c.bf16 %v1497_v61, %v1497_v61  ;;  %v2529_v6 = vpack.c.bf16 %v1436_v62, %v1436_v62  ;;  %v1498_v7 = vmax.f32 %v1362_v63, 0.0 }
 0x165   : > { %2140 = vst.msk [vmem:[%s3058_s25 + $0x1f8] sm:$0xf] %vm2013_vm2, %v2592_v0  ;;  %2074 = vst.msk [vmem:[%s3058_s25 + $0xf0] sm:$0xf] %vm2013_vm2, %v2526_v1  ;;  %v2593_v8 = vpack.c.bf16 %v1500_v3, %v1500_v3  ;;  %v2527_v9 = vpack.c.bf16 %v1434_v4, %v1434_v4 }
 0x166   : > { %2138 = vst.msk [vmem:[%s3058_s25 + $0x1f0] sm:$0xf] %vm2013_vm2, %v2590_v5  ;;  %2077 = vst.msk [vmem:[%s3058_s25 + $0xfc] sm:$0xf] %vm2013_vm2, %v2529_v6  ;;  %v2591_v41 = vpack.c.bf16 %v1498_v7, %v1498_v7 }
 0x167   : > { %2141 = vst.msk [vmem:[%s3058_s25 + $0x1fc] sm:$0xf] %vm2013_vm2, %v2593_v8  ;;  %2075 = vst.msk [vmem:[%s3058_s25 + $0xf4] sm:$0xf] %vm2013_vm2, %v2527_v9 }
 0x168   : > { %2139 = vst.msk [vmem:[%s3058_s25 + $0x1f4] sm:$0xf] %vm2013_vm2, %v2591_v41 }
 0x169 PF: > { %s13_s12 = sadd.s32 1, %s2872_s12  }
 0x16a   : > { %p10_p4 = scmp.ge.s32.totalorder %s13_s12, 4  }
 0x16c   :  { %12 = sbr.rel (!%p10_p4) target bundleno = 1 (0x1), region = 62 }

// kernel: slowfast_forward.15
= control target key start
LH: loop header
LB: loop body
LE: loop exit
PB: predicated region body
PF: predicated region fallthrough
CT: control target
= control target key end

     0   :  { %vm266_vm0 = vcmask 326656   ;;  %vm363_vm1 = vcmask 1043456   ;;  %vm976_vm2 = vcmask 125952   ;;  %s1871_s1 = inlined_call_operand.vmem [shape: bf16[40,16], index: 1, kind: input, shape index: {}]   ;;  %s1872_s0 = inlined_call_operand.vmem [shape: bf16[512,40], index: 0, kind: input, shape index: {}]   ;;  %s1873_s2 = inlined_call_operand.vmem [shape: f32[1,16], index: 2, kind: input, shape index: {}]   ;;  %s1874_s3 = inlined_call_operand.vmem [shape: bf16[512,16], index: 3, kind: output, shape index: {}]  }
   0x1   :  { %v1354_v0 = vld [vmem:[%s1871_s1] sm:$0xff]   ;;  %v1355_v1 = vld [vmem:[%s1871_s1 + $0x8] sm:$0xff]   ;;  %v1356_v2 = vld [vmem:[%s1871_s1 + $0x10] ss:$0 sps:$4 sm:$0xff]  }
   0x2   :  { %1276 = vmatprep.subr.bf16.mxu0 %v1354_v0  ;;  %1346 = vmatprep.subr.bf16.mxu1 %v1354_v0  ;;  %v1357_v3 = vld [vmem:[%s1872_s0] sm:$0xff]   ;;  %v365_v5 = vsel %vm363_vm1, %v1356_v2, 0  ;;  %v1359_v6 = vld [vmem:[%s1872_s0 + $0x8] sm:$0xff]   ;;  %v1361_v8 = vld [vmem:[%s1872_s0 + $0x10] sm:$0xff]  }
   0x3   :  { %1277 = vmatpush3.bf16.msra.mxu0 %v1354_v0  ;;  %1349 = vmatpush3.bf16.msra.mxu1 %v1354_v0  ;;  %v1358_v4 = vld [vmem:[%s1872_s0 + $0x80] sm:$0xff]   ;;  %v1360_v7 = vld [vmem:[%s1872_s0 + $0x88] sm:$0xff]   ;;  %v1362_v9 = vld [vmem:[%s1872_s0 + $0x90] sm:$0xff]  }
   0x4   :  { %1278 = vmatprep.subr.bf16.mxu0 %v1355_v1  ;;  %1347 = vmatprep.subr.bf16.mxu1 %v1355_v1  ;;  %v1363_v10 = vld [vmem:[%s1872_s0 + $0x18] sm:$0xff]   ;;  %v1365_v12 = vld [vmem:[%s1872_s0 + $0x20] sm:$0xff]   ;;  %v1367_v14 = vld [vmem:[%s1872_s0 + $0x28] sm:$0xff]  }
   0x5   :  { %1282 = vmatprep.mubr.msk.bf16.mxu0 %vm266_vm0, %v1357_v3  ;;  %1314 = vmatprep.mubr.msk.bf16.mxu1 %vm266_vm0, %v1358_v4  ;;  %v1364_v11 = vld [vmem:[%s1872_s0 + $0x98] sm:$0xff]   ;;  %v1366_v13 = vld [vmem:[%s1872_s0 + $0xa0] sm:$0xff]   ;;  %v1368_v15 = vld [vmem:[%s1872_s0 + $0xa8] sm:$0xff]  }
   0x6   :  { %v1369_v16 = vld [vmem:[%s1872_s0 + $0x30] sm:$0xff]   ;;  %v1371_v18 = vld [vmem:[%s1872_s0 + $0x38] sm:$0xff]   ;;  %v1373_v20 = vld [vmem:[%s1872_s0 + $0x40] sm:$0xff]  }
   0x7   :  { %1279 = vmatpush3.bf16.msra.mxu0 %v1355_v1  ;;  %1350 = vmatpush3.bf16.msra.mxu1 %v1355_v1  ;;  %v1370_v17 = vld [vmem:[%s1872_s0 + $0xb0] sm:$0xff]   ;;  %v1372_v19 = vld [vmem:[%s1872_s0 + $0xb8] sm:$0xff]   ;;  %v1374_v21 = vld [vmem:[%s1872_s0 + $0xc0] sm:$0xff]  }
   0x8   :  { %1352 = vmatprep.subr.msk.bf16.mxu0 %vm363_vm1, %v1356_v2  ;;  %1353 = vmatprep.subr.msk.bf16.mxu1 %vm363_vm1, %v1356_v2  ;;  %v1375_v22 = vld [vmem:[%s1872_s0 + $0x48] sm:$0xff]   ;;  %v1377_v24 = vld [vmem:[%s1872_s0 + $0x50] sm:$0xff]   ;;  %v1379_v26 = vld [vmem:[%s1872_s0 + $0x58] sm:$0xff]  }
   0x9   :  { %v1376_v23 = vld [vmem:[%s1872_s0 + $0xc8] sm:$0xff]   ;;  %v1378_v25 = vld [vmem:[%s1872_s0 + $0xd0] sm:$0xff]   ;;  %v1380_v27 = vld [vmem:[%s1872_s0 + $0xd8] sm:$0xff]  }
   0xa   :  { %v1381_v28 = vld [vmem:[%s1872_s0 + $0x60] sm:$0xff]   ;;  %v1383_v30 = vld [vmem:[%s1872_s0 + $0x68] sm:$0xff]   ;;  %v1385_v32 = vld [vmem:[%s1872_s0 + $0x70] sm:$0xff]  }
   0xb   :  { %1281 = vmatpush3.bf16.msra.mxu0 %v365_v5  ;;  %1351 = vmatpush3.bf16.msra.mxu1 %v365_v5  ;;  %v1382_v29 = vld [vmem:[%s1872_s0 + $0xe0] sm:$0xff]   ;;  %v1384_v31 = vld [vmem:[%s1872_s0 + $0xe8] sm:$0xff]   ;;  %v1386_v33 = vld [vmem:[%s1872_s0 + $0xf0] sm:$0xff]  }
   0xc   :  { %v1387_v34 = vld [vmem:[%s1872_s0 + $0x78] sm:$0xff]   ;;  %v1549_v36 = vld [vmem:[%s1873_s2] ss:$0 sm:$0xff] }
   0xd   :  { %v1388_v35 = vld [vmem:[%s1872_s0 + $0xf8] sm:$0xff]  }
   0xe   :  { %1283 = vmatmul.mubr.msk.bf16.vlgmr.msra.gmra.mrb[0].mxu0 %vm266_vm0, %v1359_v6  ;;  %1315 = vmatmul.mubr.msk.bf16.vlgmr.msra.gmra.mrb[0].mxu1 %vm266_vm0, %v1360_v7 }
   0xf   :  { %1286 = vmatprep.mubr.msk.bf16.mxu0 %vm266_vm0, %v1361_v8  ;;  %1318 = vmatprep.mubr.msk.bf16.mxu1 %vm266_vm0, %v1362_v9 }
  0x16   :  { %1287 = vmatmul.mubr.msk.bf16.gmra.mrb[4].mxu0 %vm266_vm0, %v1363_v10  ;;  %1319 = vmatmul.mubr.msk.bf16.gmra.mrb[4].mxu1 %vm266_vm0, %v1364_v11 }
  0x17   :  { %1290 = vmatprep.mubr.msk.bf16.mxu0 %vm266_vm0, %v1365_v12  ;;  %1322 = vmatprep.mubr.msk.bf16.mxu1 %vm266_vm0, %v1366_v13 }
  0x1e   :  { %1291 = vmatmul.mubr.msk.bf16.gmra.mrb[8].mxu0 %vm266_vm0, %v1367_v14  ;;  %1323 = vmatmul.mubr.msk.bf16.gmra.mrb[8].mxu1 %vm266_vm0, %v1368_v15 }
  0x1f   :  { %1294 = vmatprep.mubr.msk.bf16.mxu0 %vm266_vm0, %v1369_v16  ;;  %1326 = vmatprep.mubr.msk.bf16.mxu1 %vm266_vm0, %v1370_v17 }
  0x26   :  { %1295 = vmatmul.mubr.msk.bf16.gmra.mrb[12].mxu0 %vm266_vm0, %v1371_v18  ;;  %1327 = vmatmul.mubr.msk.bf16.gmra.mrb[12].mxu1 %vm266_vm0, %v1372_v19 }
  0x27   :  { %1298 = vmatprep.mubr.msk.bf16.mxu0 %vm266_vm0, %v1373_v20  ;;  %1330 = vmatprep.mubr.msk.bf16.mxu1 %vm266_vm0, %v1374_v21 }
  0x2e   :  { %1299 = vmatmul.mubr.msk.bf16.gmra.mrb[16].mxu0 %vm266_vm0, %v1375_v22  ;;  %1331 = vmatmul.mubr.msk.bf16.gmra.mrb[16].mxu1 %vm266_vm0, %v1376_v23 }
  0x2f   :  { %1302 = vmatprep.mubr.msk.bf16.mxu0 %vm266_vm0, %v1377_v24  ;;  %1334 = vmatprep.mubr.msk.bf16.mxu1 %vm266_vm0, %v1378_v25 }
  0x36   :  { %1303 = vmatmul.mubr.msk.bf16.gmra.mrb[20].mxu0 %vm266_vm0, %v1379_v26  ;;  %1335 = vmatmul.mubr.msk.bf16.gmra.mrb[20].mxu1 %vm266_vm0, %v1380_v27 }
  0x37   :  { %1306 = vmatprep.mubr.msk.bf16.mxu0 %vm266_vm0, %v1381_v28  ;;  %1338 = vmatprep.mubr.msk.bf16.mxu1 %vm266_vm0, %v1382_v29 }
  0x3e   :  { %1307 = vmatmul.mubr.msk.bf16.gmra.mrb[24].mxu0 %vm266_vm0, %v1383_v30  ;;  %1339 = vmatmul.mubr.msk.bf16.gmra.mrb[24].mxu1 %vm266_vm0, %v1384_v31 }
  0x3f   :  { %1310 = vmatprep.mubr.msk.bf16.mxu0 %vm266_vm0, %v1385_v32  ;;  %1342 = vmatprep.mubr.msk.bf16.mxu1 %vm266_vm0, %v1386_v33 }
  0x46   :  { %1311 = vmatmul.mubr.msk.bf16.gmra.mrb[28].mxu0 %vm266_vm0, %v1387_v34  ;;  %1343 = vmatmul.mubr.msk.bf16.gmra.mrb[28].mxu1 %vm266_vm0, %v1388_v35 }
  0xe1   :  { %v1284_v37 = vpop.f32.mrb[0].mxu0  ;;  %v1316_v38 = vpop.f32.mrb[0].mxu1 }
  0xe2   :  { %v410_v39 = vadd.f32 %v1284_v37, %v1549_v36  ;;  %v538_v40 = vadd.f32 %v1316_v38, %v1549_v36  ;;  %v401_v41 = vpop.f32.mrb[1].mxu0  ;;  %v529_v42 = vpop.f32.mrb[1].mxu1 }
  0xe3   :  { %v402_v43 = vadd.f32 %v1549_v36, %v401_v41  ;;  %v530_v44 = vadd.f32 %v1549_v36, %v529_v42  ;;  %v1285_v45 = vpop.f32.mrb[2].mxu0  ;;  %v1317_v46 = vpop.f32.mrb[2].mxu1 }
  0xe4   :  { %v658_v47 = vmax.f32 %v410_v39, 0.0  ;;  %v690_v48 = vmax.f32 %v538_v40, 0.0  ;;  %v413_v49 = vadd.f32 %v1285_v45, %v1549_v36  ;;  %v541_v50 = vadd.f32 %v1317_v46, %v1549_v36  ;;  %v404_v51 = vpop.f32.mrb[3].mxu0  ;;  %v532_v52 = vpop.f32.mrb[3].mxu1 }
  0xe5   :  { %v656_v53 = vmax.f32 %v402_v43, 0.0  ;;  %v688_v54 = vmax.f32 %v530_v44, 0.0  ;;  %v405_v55 = vadd.f32 %v1549_v36, %v404_v51  ;;  %v533_v56 = vadd.f32 %v1549_v36, %v532_v52 }
  0xe6   :  { %v1179_v57 = vpack.c.bf16 %v658_v47, %v658_v47  ;;  %v1211_v58 = vpack.c.bf16 %v690_v48, %v690_v48  ;;  %v659_v59 = vmax.f32 %v413_v49, 0.0  ;;  %v691_v60 = vmax.f32 %v541_v50, 0.0 }
  0xe7   :  { %v1177_v61 = vpack.c.bf16 %v656_v53, %v656_v53  ;;  %v1209_v62 = vpack.c.bf16 %v688_v54, %v688_v54  ;;  %v657_v63 = vmax.f32 %v405_v55, 0.0  ;;  %v689_v0 = vmax.f32 %v533_v56, 0.0 }
  0xe8   :  { %979 = vst.msk [vmem:[%s1874_s3 + $0x8] sm:$0xf] %vm976_vm2, %v1179_v57  ;;  %1011 = vst.msk [vmem:[%s1874_s3 + $0x88] sm:$0xf] %vm976_vm2, %v1211_v58  ;;  %v1180_v1 = vpack.c.bf16 %v659_v59, %v659_v59  ;;  %v1212_v2 = vpack.c.bf16 %v691_v60, %v691_v60 }
  0xe9   :  { %977 = vst.msk [vmem:[%s1874_s3] sm:$0xf] %vm976_vm2, %v1177_v61  ;;  %1009 = vst.msk [vmem:[%s1874_s3 + $0x80] sm:$0xf] %vm976_vm2, %v1209_v62  ;;  %v1178_v3 = vpack.c.bf16 %v657_v63, %v657_v63  ;;  %v1210_v4 = vpack.c.bf16 %v689_v0, %v689_v0  ;;  %v1288_v5 = vpop.f32.mrb[4].mxu0  ;;  %v1320_v6 = vpop.f32.mrb[4].mxu1 }
  0xea   :  { %980 = vst.msk [vmem:[%s1874_s3 + $0xc] sm:$0xf] %vm976_vm2, %v1180_v1  ;;  %1012 = vst.msk [vmem:[%s1874_s3 + $0x8c] sm:$0xf] %vm976_vm2, %v1212_v2  ;;  %v426_v7 = vadd.f32 %v1288_v5, %v1549_v36  ;;  %v554_v8 = vadd.f32 %v1320_v6, %v1549_v36  ;;  %v417_v9 = vpop.f32.mrb[5].mxu0  ;;  %v545_v10 = vpop.f32.mrb[5].mxu1 }
  0xeb   :  { %978 = vst.msk [vmem:[%s1874_s3 + $0x4] sm:$0xf] %vm976_vm2, %v1178_v3  ;;  %1010 = vst.msk [vmem:[%s1874_s3 + $0x84] sm:$0xf] %vm976_vm2, %v1210_v4  ;;  %v418_v11 = vadd.f32 %v1549_v36, %v417_v9  ;;  %v546_v12 = vadd.f32 %v1549_v36, %v545_v10  ;;  %v1289_v13 = vpop.f32.mrb[6].mxu0  ;;  %v1321_v14 = vpop.f32.mrb[6].mxu1 }
  0xec   :  { %v662_v15 = vmax.f32 %v426_v7, 0.0  ;;  %v694_v16 = vmax.f32 %v554_v8, 0.0  ;;  %v429_v17 = vadd.f32 %v1289_v13, %v1549_v36  ;;  %v557_v18 = vadd.f32 %v1321_v14, %v1549_v36  ;;  %v420_v19 = vpop.f32.mrb[7].mxu0  ;;  %v548_v20 = vpop.f32.mrb[7].mxu1 }
  0xed   :  { %v660_v21 = vmax.f32 %v418_v11, 0.0  ;;  %v692_v22 = vmax.f32 %v546_v12, 0.0  ;;  %v421_v23 = vadd.f32 %v1549_v36, %v420_v19  ;;  %v549_v24 = vadd.f32 %v1549_v36, %v548_v20 }
  0xee   :  { %v1183_v25 = vpack.c.bf16 %v662_v15, %v662_v15  ;;  %v1215_v26 = vpack.c.bf16 %v694_v16, %v694_v16  ;;  %v663_v27 = vmax.f32 %v429_v17, 0.0  ;;  %v695_v28 = vmax.f32 %v557_v18, 0.0 }
  0xef   :  { %v1181_v29 = vpack.c.bf16 %v660_v21, %v660_v21  ;;  %v1213_v30 = vpack.c.bf16 %v692_v22, %v692_v22  ;;  %v661_v31 = vmax.f32 %v421_v23, 0.0  ;;  %v693_v32 = vmax.f32 %v549_v24, 0.0 }
  0xf0   :  { %983 = vst.msk [vmem:[%s1874_s3 + $0x18] sm:$0xf] %vm976_vm2, %v1183_v25  ;;  %1015 = vst.msk [vmem:[%s1874_s3 + $0x98] sm:$0xf] %vm976_vm2, %v1215_v26  ;;  %v1184_v33 = vpack.c.bf16 %v663_v27, %v663_v27  ;;  %v1216_v34 = vpack.c.bf16 %v695_v28, %v695_v28 }
  0xf1   :  { %981 = vst.msk [vmem:[%s1874_s3 + $0x10] sm:$0xf] %vm976_vm2, %v1181_v29  ;;  %1013 = vst.msk [vmem:[%s1874_s3 + $0x90] sm:$0xf] %vm976_vm2, %v1213_v30  ;;  %v1182_v35 = vpack.c.bf16 %v661_v31, %v661_v31  ;;  %v1214_v37 = vpack.c.bf16 %v693_v32, %v693_v32  ;;  %v1292_v38 = vpop.f32.mrb[8].mxu0  ;;  %v1324_v39 = vpop.f32.mrb[8].mxu1 }
  0xf2   :  { %984 = vst.msk [vmem:[%s1874_s3 + $0x1c] sm:$0xf] %vm976_vm2, %v1184_v33  ;;  %1016 = vst.msk [vmem:[%s1874_s3 + $0x9c] sm:$0xf] %vm976_vm2, %v1216_v34  ;;  %v442_v40 = vadd.f32 %v1292_v38, %v1549_v36  ;;  %v570_v41 = vadd.f32 %v1324_v39, %v1549_v36  ;;  %v433_v42 = vpop.f32.mrb[9].mxu0  ;;  %v561_v43 = vpop.f32.mrb[9].mxu1 }
  0xf3   :  { %982 = vst.msk [vmem:[%s1874_s3 + $0x14] sm:$0xf] %vm976_vm2, %v1182_v35  ;;  %1014 = vst.msk [vmem:[%s1874_s3 + $0x94] sm:$0xf] %vm976_vm2, %v1214_v37  ;;  %v434_v44 = vadd.f32 %v1549_v36, %v433_v42  ;;  %v562_v45 = vadd.f32 %v1549_v36, %v561_v43  ;;  %v1293_v46 = vpop.f32.mrb[10].mxu0  ;;  %v1325_v47 = vpop.f32.mrb[10].mxu1 }
  0xf4   :  { %v666_v48 = vmax.f32 %v442_v40, 0.0  ;;  %v698_v49 = vmax.f32 %v570_v41, 0.0  ;;  %v445_v50 = vadd.f32 %v1293_v46, %v1549_v36  ;;  %v573_v51 = vadd.f32 %v1325_v47, %v1549_v36  ;;  %v436_v52 = vpop.f32.mrb[11].mxu0  ;;  %v564_v53 = vpop.f32.mrb[11].mxu1 }
  0xf5   :  { %v664_v54 = vmax.f32 %v434_v44, 0.0  ;;  %v696_v55 = vmax.f32 %v562_v45, 0.0  ;;  %v437_v56 = vadd.f32 %v1549_v36, %v436_v52  ;;  %v565_v57 = vadd.f32 %v1549_v36, %v564_v53 }
  0xf6   :  { %v1187_v58 = vpack.c.bf16 %v666_v48, %v666_v48  ;;  %v1219_v59 = vpack.c.bf16 %v698_v49, %v698_v49  ;;  %v667_v60 = vmax.f32 %v445_v50, 0.0  ;;  %v699_v61 = vmax.f32 %v573_v51, 0.0 }
  0xf7   :  { %v1185_v62 = vpack.c.bf16 %v664_v54, %v664_v54  ;;  %v1217_v63 = vpack.c.bf16 %v696_v55, %v696_v55  ;;  %v665_v0 = vmax.f32 %v437_v56, 0.0  ;;  %v697_v1 = vmax.f32 %v565_v57, 0.0 }
  0xf8   :  { %987 = vst.msk [vmem:[%s1874_s3 + $0x28] sm:$0xf] %vm976_vm2, %v1187_v58  ;;  %1019 = vst.msk [vmem:[%s1874_s3 + $0xa8] sm:$0xf] %vm976_vm2, %v1219_v59  ;;  %v1188_v2 = vpack.c.bf16 %v667_v60, %v667_v60  ;;  %v1220_v3 = vpack.c.bf16 %v699_v61, %v699_v61 }
  0xf9   :  { %985 = vst.msk [vmem:[%s1874_s3 + $0x20] sm:$0xf] %vm976_vm2, %v1185_v62  ;;  %1017 = vst.msk [vmem:[%s1874_s3 + $0xa0] sm:$0xf] %vm976_vm2, %v1217_v63  ;;  %v1186_v4 = vpack.c.bf16 %v665_v0, %v665_v0  ;;  %v1218_v5 = vpack.c.bf16 %v697_v1, %v697_v1  ;;  %v1296_v6 = vpop.f32.mrb[12].mxu0  ;;  %v1328_v7 = vpop.f32.mrb[12].mxu1 }
  0xfa   :  { %988 = vst.msk [vmem:[%s1874_s3 + $0x2c] sm:$0xf] %vm976_vm2, %v1188_v2  ;;  %1020 = vst.msk [vmem:[%s1874_s3 + $0xac] sm:$0xf] %vm976_vm2, %v1220_v3  ;;  %v458_v8 = vadd.f32 %v1296_v6, %v1549_v36  ;;  %v586_v9 = vadd.f32 %v1328_v7, %v1549_v36  ;;  %v449_v10 = vpop.f32.mrb[13].mxu0  ;;  %v577_v11 = vpop.f32.mrb[13].mxu1 }
  0xfb   :  { %986 = vst.msk [vmem:[%s1874_s3 + $0x24] sm:$0xf] %vm976_vm2, %v1186_v4  ;;  %1018 = vst.msk [vmem:[%s1874_s3 + $0xa4] sm:$0xf] %vm976_vm2, %v1218_v5  ;;  %v450_v12 = vadd.f32 %v1549_v36, %v449_v10  ;;  %v578_v13 = vadd.f32 %v1549_v36, %v577_v11  ;;  %v1297_v14 = vpop.f32.mrb[14].mxu0  ;;  %v1329_v15 = vpop.f32.mrb[14].mxu1 }
  0xfc   :  { %v670_v16 = vmax.f32 %v458_v8, 0.0  ;;  %v702_v17 = vmax.f32 %v586_v9, 0.0  ;;  %v461_v18 = vadd.f32 %v1297_v14, %v1549_v36  ;;  %v589_v19 = vadd.f32 %v1329_v15, %v1549_v36  ;;  %v452_v20 = vpop.f32.mrb[15].mxu0  ;;  %v580_v21 = vpop.f32.mrb[15].mxu1 }
  0xfd   :  { %v668_v22 = vmax.f32 %v450_v12, 0.0  ;;  %v700_v23 = vmax.f32 %v578_v13, 0.0  ;;  %v453_v24 = vadd.f32 %v1549_v36, %v452_v20  ;;  %v581_v25 = vadd.f32 %v1549_v36, %v580_v21 }
  0xfe   :  { %v1191_v26 = vpack.c.bf16 %v670_v16, %v670_v16  ;;  %v1223_v27 = vpack.c.bf16 %v702_v17, %v702_v17  ;;  %v671_v28 = vmax.f32 %v461_v18, 0.0  ;;  %v703_v29 = vmax.f32 %v589_v19, 0.0 }
  0xff   :  { %v1189_v30 = vpack.c.bf16 %v668_v22, %v668_v22  ;;  %v1221_v31 = vpack.c.bf16 %v700_v23, %v700_v23  ;;  %v669_v32 = vmax.f32 %v453_v24, 0.0  ;;  %v701_v33 = vmax.f32 %v581_v25, 0.0 }
 0x100   :  { %991 = vst.msk [vmem:[%s1874_s3 + $0x38] sm:$0xf] %vm976_vm2, %v1191_v26  ;;  %1023 = vst.msk [vmem:[%s1874_s3 + $0xb8] sm:$0xf] %vm976_vm2, %v1223_v27  ;;  %v1192_v34 = vpack.c.bf16 %v671_v28, %v671_v28  ;;  %v1224_v35 = vpack.c.bf16 %v703_v29, %v703_v29 }
 0x101   :  { %989 = vst.msk [vmem:[%s1874_s3 + $0x30] sm:$0xf] %vm976_vm2, %v1189_v30  ;;  %1021 = vst.msk [vmem:[%s1874_s3 + $0xb0] sm:$0xf] %vm976_vm2, %v1221_v31  ;;  %v1190_v37 = vpack.c.bf16 %v669_v32, %v669_v32  ;;  %v1222_v38 = vpack.c.bf16 %v701_v33, %v701_v33  ;;  %v1300_v39 = vpop.f32.mrb[16].mxu0  ;;  %v1332_v40 = vpop.f32.mrb[16].mxu1 }
 0x102   :  { %992 = vst.msk [vmem:[%s1874_s3 + $0x3c] sm:$0xf] %vm976_vm2, %v1192_v34  ;;  %1024 = vst.msk [vmem:[%s1874_s3 + $0xbc] sm:$0xf] %vm976_vm2, %v1224_v35  ;;  %v474_v41 = vadd.f32 %v1300_v39, %v1549_v36  ;;  %v602_v42 = vadd.f32 %v1332_v40, %v1549_v36  ;;  %v465_v43 = vpop.f32.mrb[17].mxu0  ;;  %v593_v44 = vpop.f32.mrb[17].mxu1 }
 0x103   :  { %990 = vst.msk [vmem:[%s1874_s3 + $0x34] sm:$0xf] %vm976_vm2, %v1190_v37  ;;  %1022 = vst.msk [vmem:[%s1874_s3 + $0xb4] sm:$0xf] %vm976_vm2, %v1222_v38  ;;  %v466_v45 = vadd.f32 %v1549_v36, %v465_v43  ;;  %v594_v46 = vadd.f32 %v1549_v36, %v593_v44  ;;  %v1301_v47 = vpop.f32.mrb[18].mxu0  ;;  %v1333_v48 = vpop.f32.mrb[18].mxu1 }
 0x104   :  { %v674_v49 = vmax.f32 %v474_v41, 0.0  ;;  %v706_v50 = vmax.f32 %v602_v42, 0.0  ;;  %v477_v51 = vadd.f32 %v1301_v47, %v1549_v36  ;;  %v605_v52 = vadd.f32 %v1333_v48, %v1549_v36  ;;  %v468_v53 = vpop.f32.mrb[19].mxu0  ;;  %v596_v54 = vpop.f32.mrb[19].mxu1 }
 0x105   :  { %v672_v55 = vmax.f32 %v466_v45, 0.0  ;;  %v704_v56 = vmax.f32 %v594_v46, 0.0  ;;  %v469_v57 = vadd.f32 %v1549_v36, %v468_v53  ;;  %v597_v58 = vadd.f32 %v1549_v36, %v596_v54 }
 0x106   :  { %v1195_v59 = vpack.c.bf16 %v674_v49, %v674_v49  ;;  %v1227_v60 = vpack.c.bf16 %v706_v50, %v706_v50  ;;  %v675_v61 = vmax.f32 %v477_v51, 0.0  ;;  %v707_v62 = vmax.f32 %v605_v52, 0.0 }
 0x107   :  { %v1193_v63 = vpack.c.bf16 %v672_v55, %v672_v55  ;;  %v1225_v0 = vpack.c.bf16 %v704_v56, %v704_v56  ;;  %v673_v1 = vmax.f32 %v469_v57, 0.0  ;;  %v705_v2 = vmax.f32 %v597_v58, 0.0 }
 0x108   :  { %995 = vst.msk [vmem:[%s1874_s3 + $0x48] sm:$0xf] %vm976_vm2, %v1195_v59  ;;  %1027 = vst.msk [vmem:[%s1874_s3 + $0xc8] sm:$0xf] %vm976_vm2, %v1227_v60  ;;  %v1196_v3 = vpack.c.bf16 %v675_v61, %v675_v61  ;;  %v1228_v4 = vpack.c.bf16 %v707_v62, %v707_v62 }
 0x109   :  { %993 = vst.msk [vmem:[%s1874_s3 + $0x40] sm:$0xf] %vm976_vm2, %v1193_v63  ;;  %1025 = vst.msk [vmem:[%s1874_s3 + $0xc0] sm:$0xf] %vm976_vm2, %v1225_v0  ;;  %v1194_v5 = vpack.c.bf16 %v673_v1, %v673_v1  ;;  %v1226_v6 = vpack.c.bf16 %v705_v2, %v705_v2  ;;  %v1304_v7 = vpop.f32.mrb[20].mxu0  ;;  %v1336_v8 = vpop.f32.mrb[20].mxu1 }
 0x10a   :  { %996 = vst.msk [vmem:[%s1874_s3 + $0x4c] sm:$0xf] %vm976_vm2, %v1196_v3  ;;  %1028 = vst.msk [vmem:[%s1874_s3 + $0xcc] sm:$0xf] %vm976_vm2, %v1228_v4  ;;  %v490_v9 = vadd.f32 %v1304_v7, %v1549_v36  ;;  %v618_v10 = vadd.f32 %v1336_v8, %v1549_v36  ;;  %v481_v11 = vpop.f32.mrb[21].mxu0  ;;  %v609_v12 = vpop.f32.mrb[21].mxu1 }
 0x10b   :  { %994 = vst.msk [vmem:[%s1874_s3 + $0x44] sm:$0xf] %vm976_vm2, %v1194_v5  ;;  %1026 = vst.msk [vmem:[%s1874_s3 + $0xc4] sm:$0xf] %vm976_vm2, %v1226_v6  ;;  %v482_v13 = vadd.f32 %v1549_v36, %v481_v11  ;;  %v610_v14 = vadd.f32 %v1549_v36, %v609_v12  ;;  %v1305_v15 = vpop.f32.mrb[22].mxu0  ;;  %v1337_v16 = vpop.f32.mrb[22].mxu1 }
 0x10c   :  { %v678_v17 = vmax.f32 %v490_v9, 0.0  ;;  %v710_v18 = vmax.f32 %v618_v10, 0.0  ;;  %v493_v19 = vadd.f32 %v1305_v15, %v1549_v36  ;;  %v621_v20 = vadd.f32 %v1337_v16, %v1549_v36  ;;  %v484_v21 = vpop.f32.mrb[23].mxu0  ;;  %v612_v22 = vpop.f32.mrb[23].mxu1 }
 0x10d   :  { %v676_v23 = vmax.f32 %v482_v13, 0.0  ;;  %v708_v24 = vmax.f32 %v610_v14, 0.0  ;;  %v485_v25 = vadd.f32 %v1549_v36, %v484_v21  ;;  %v613_v26 = vadd.f32 %v1549_v36, %v612_v22 }
 0x10e   :  { %v1199_v27 = vpack.c.bf16 %v678_v17, %v678_v17  ;;  %v1231_v28 = vpack.c.bf16 %v710_v18, %v710_v18  ;;  %v679_v29 = vmax.f32 %v493_v19, 0.0  ;;  %v711_v30 = vmax.f32 %v621_v20, 0.0 }
 0x10f   :  { %v1197_v31 = vpack.c.bf16 %v676_v23, %v676_v23  ;;  %v1229_v32 = vpack.c.bf16 %v708_v24, %v708_v24  ;;  %v677_v33 = vmax.f32 %v485_v25, 0.0  ;;  %v709_v34 = vmax.f32 %v613_v26, 0.0 }
 0x110   :  { %999 = vst.msk [vmem:[%s1874_s3 + $0x58] sm:$0xf] %vm976_vm2, %v1199_v27  ;;  %1031 = vst.msk [vmem:[%s1874_s3 + $0xd8] sm:$0xf] %vm976_vm2, %v1231_v28  ;;  %v1200_v35 = vpack.c.bf16 %v679_v29, %v679_v29  ;;  %v1232_v37 = vpack.c.bf16 %v711_v30, %v711_v30 }
 0x111   :  { %997 = vst.msk [vmem:[%s1874_s3 + $0x50] sm:$0xf] %vm976_vm2, %v1197_v31  ;;  %1029 = vst.msk [vmem:[%s1874_s3 + $0xd0] sm:$0xf] %vm976_vm2, %v1229_v32  ;;  %v1198_v38 = vpack.c.bf16 %v677_v33, %v677_v33  ;;  %v1230_v39 = vpack.c.bf16 %v709_v34, %v709_v34  ;;  %v1308_v40 = vpop.f32.mrb[24].mxu0  ;;  %v1340_v41 = vpop.f32.mrb[24].mxu1 }
 0x112   :  { %1000 = vst.msk [vmem:[%s1874_s3 + $0x5c] sm:$0xf] %vm976_vm2, %v1200_v35  ;;  %1032 = vst.msk [vmem:[%s1874_s3 + $0xdc] sm:$0xf] %vm976_vm2, %v1232_v37  ;;  %v506_v42 = vadd.f32 %v1308_v40, %v1549_v36  ;;  %v634_v43 = vadd.f32 %v1340_v41, %v1549_v36  ;;  %v497_v44 = vpop.f32.mrb[25].mxu0  ;;  %v625_v45 = vpop.f32.mrb[25].mxu1 }
 0x113   :  { %998 = vst.msk [vmem:[%s1874_s3 + $0x54] sm:$0xf] %vm976_vm2, %v1198_v38  ;;  %1030 = vst.msk [vmem:[%s1874_s3 + $0xd4] sm:$0xf] %vm976_vm2, %v1230_v39  ;;  %v498_v46 = vadd.f32 %v1549_v36, %v497_v44  ;;  %v626_v47 = vadd.f32 %v1549_v36, %v625_v45  ;;  %v1309_v48 = vpop.f32.mrb[26].mxu0  ;;  %v1341_v49 = vpop.f32.mrb[26].mxu1 }
 0x114   :  { %v682_v50 = vmax.f32 %v506_v42, 0.0  ;;  %v714_v51 = vmax.f32 %v634_v43, 0.0  ;;  %v509_v52 = vadd.f32 %v1309_v48, %v1549_v36  ;;  %v637_v53 = vadd.f32 %v1341_v49, %v1549_v36  ;;  %v500_v54 = vpop.f32.mrb[27].mxu0  ;;  %v628_v55 = vpop.f32.mrb[27].mxu1 }
 0x115   :  { %v680_v56 = vmax.f32 %v498_v46, 0.0  ;;  %v712_v57 = vmax.f32 %v626_v47, 0.0  ;;  %v501_v58 = vadd.f32 %v1549_v36, %v500_v54  ;;  %v629_v59 = vadd.f32 %v1549_v36, %v628_v55 }
 0x116   :  { %v1203_v60 = vpack.c.bf16 %v682_v50, %v682_v50  ;;  %v1235_v61 = vpack.c.bf16 %v714_v51, %v714_v51  ;;  %v683_v62 = vmax.f32 %v509_v52, 0.0  ;;  %v715_v63 = vmax.f32 %v637_v53, 0.0 }
 0x117   :  { %v1201_v0 = vpack.c.bf16 %v680_v56, %v680_v56  ;;  %v1233_v1 = vpack.c.bf16 %v712_v57, %v712_v57  ;;  %v681_v2 = vmax.f32 %v501_v58, 0.0  ;;  %v713_v3 = vmax.f32 %v629_v59, 0.0 }
 0x118   :  { %1003 = vst.msk [vmem:[%s1874_s3 + $0x68] sm:$0xf] %vm976_vm2, %v1203_v60  ;;  %1035 = vst.msk [vmem:[%s1874_s3 + $0xe8] sm:$0xf] %vm976_vm2, %v1235_v61  ;;  %v1204_v4 = vpack.c.bf16 %v683_v62, %v683_v62  ;;  %v1236_v5 = vpack.c.bf16 %v715_v63, %v715_v63 }
 0x119   :  { %1001 = vst.msk [vmem:[%s1874_s3 + $0x60] sm:$0xf] %vm976_vm2, %v1201_v0  ;;  %1033 = vst.msk [vmem:[%s1874_s3 + $0xe0] sm:$0xf] %vm976_vm2, %v1233_v1  ;;  %v1202_v6 = vpack.c.bf16 %v681_v2, %v681_v2  ;;  %v1234_v7 = vpack.c.bf16 %v713_v3, %v713_v3  ;;  %v1312_v8 = vpop.f32.mrb[28].mxu0  ;;  %v1344_v9 = vpop.f32.mrb[28].mxu1 }
 0x11a   :  { %1004 = vst.msk [vmem:[%s1874_s3 + $0x6c] sm:$0xf] %vm976_vm2, %v1204_v4  ;;  %1036 = vst.msk [vmem:[%s1874_s3 + $0xec] sm:$0xf] %vm976_vm2, %v1236_v5  ;;  %v522_v10 = vadd.f32 %v1312_v8, %v1549_v36  ;;  %v650_v11 = vadd.f32 %v1344_v9, %v1549_v36  ;;  %v513_v12 = vpop.f32.mrb[29].mxu0  ;;  %v641_v13 = vpop.f32.mrb[29].mxu1 }
 0x11b   :  { %1002 = vst.msk [vmem:[%s1874_s3 + $0x64] sm:$0xf] %vm976_vm2, %v1202_v6  ;;  %1034 = vst.msk [vmem:[%s1874_s3 + $0xe4] sm:$0xf] %vm976_vm2, %v1234_v7  ;;  %v514_v14 = vadd.f32 %v1549_v36, %v513_v12  ;;  %v642_v15 = vadd.f32 %v1549_v36, %v641_v13  ;;  %v1313_v16 = vpop.f32.mrb[30].mxu0  ;;  %v1345_v17 = vpop.f32.mrb[30].mxu1 }
 0x11c   :  { %v686_v18 = vmax.f32 %v522_v10, 0.0  ;;  %v718_v19 = vmax.f32 %v650_v11, 0.0  ;;  %v525_v20 = vadd.f32 %v1313_v16, %v1549_v36  ;;  %v653_v21 = vadd.f32 %v1345_v17, %v1549_v36  ;;  %v516_v22 = vpop.f32.mrb[31].mxu0  ;;  %v644_v23 = vpop.f32.mrb[31].mxu1 }
 0x11d   :  { %v684_v24 = vmax.f32 %v514_v14, 0.0  ;;  %v716_v25 = vmax.f32 %v642_v15, 0.0  ;;  %v517_v26 = vadd.f32 %v1549_v36, %v516_v22  ;;  %v645_v27 = vadd.f32 %v1549_v36, %v644_v23 }
 0x11e   :  { %v1207_v28 = vpack.c.bf16 %v686_v18, %v686_v18  ;;  %v1239_v29 = vpack.c.bf16 %v718_v19, %v718_v19  ;;  %v687_v30 = vmax.f32 %v525_v20, 0.0  ;;  %v719_v31 = vmax.f32 %v653_v21, 0.0 }
 0x11f   :  { %v1205_v32 = vpack.c.bf16 %v684_v24, %v684_v24  ;;  %v1237_v33 = vpack.c.bf16 %v716_v25, %v716_v25  ;;  %v685_v34 = vmax.f32 %v517_v26, 0.0  ;;  %v717_v35 = vmax.f32 %v645_v27, 0.0 }
 0x120   :  { %1007 = vst.msk [vmem:[%s1874_s3 + $0x78] sm:$0xf] %vm976_vm2, %v1207_v28  ;;  %1039 = vst.msk [vmem:[%s1874_s3 + $0xf8] sm:$0xf] %vm976_vm2, %v1239_v29  ;;  %v1208_v37 = vpack.c.bf16 %v687_v30, %v687_v30  ;;  %v1240_v36 = vpack.c.bf16 %v719_v31, %v719_v31 }
 0x121   :  { %1005 = vst.msk [vmem:[%s1874_s3 + $0x70] sm:$0xf] %vm976_vm2, %v1205_v32  ;;  %1037 = vst.msk [vmem:[%s1874_s3 + $0xf0] sm:$0xf] %vm976_vm2, %v1237_v33  ;;  %v1206_v38 = vpack.c.bf16 %v685_v34, %v685_v34  ;;  %v1238_v39 = vpack.c.bf16 %v717_v35, %v717_v35 }
 0x122   :  { %1008 = vst.msk [vmem:[%s1874_s3 + $0x7c] sm:$0xf] %vm976_vm2, %v1208_v37  ;;  %1040 = vst.msk [vmem:[%s1874_s3 + $0xfc] sm:$0xf] %vm976_vm2, %v1240_v36 }
 0x123   :  { %1006 = vst.msk [vmem:[%s1874_s3 + $0x74] sm:$0xf] %vm976_vm2, %v1206_v38  ;;  %1038 = vst.msk [vmem:[%s1874_s3 + $0xf4] sm:$0xf] %vm976_vm2, %v1238_v39 }

// kernel: slowfast_forward.12
= control target key start
LH: loop header
LB: loop body
LE: loop exit
PB: predicated region body
PF: predicated region fallthrough
CT: control target
= control target key end

     0   :  { %vm350_vm0 = vcmask 1044480   ;;  %vm253_vm1 = vcmask 80896   ;;  %vm963_vm2 = vcmask 27648   ;;  %s1838_s1 = inlined_call_operand.vmem [shape: bf16[10,4], index: 1, kind: input, shape index: {}]   ;;  %s1839_s0 = inlined_call_operand.vmem [shape: bf16[512,10], index: 0, kind: input, shape index: {}]   ;;  %s1840_s2 = inlined_call_operand.vmem [shape: f32[1,4], index: 2, kind: input, shape index: {}]   ;;  %s1841_s3 = inlined_call_operand.vmem [shape: bf16[512,4], index: 3, kind: output, shape index: {}]  }
   0x1   :  { %v1329_v0 = vld [vmem:[%s1838_s1] sm:$0x1f]   ;;  %v1332_v4 = vld [vmem:[%s1839_s0 + $0x8] sm:$0xff]   ;;  %v1334_v6 = vld [vmem:[%s1839_s0 + $0x10] sm:$0xff]  }
   0x2   :  { %v1330_v1 = vld [vmem:[%s1839_s0] sm:$0xff]   ;;  %1327 = vmatprep.subr.msk.bf16.mxu0 %vm350_vm0, %v1329_v0  ;;  %1328 = vmatprep.subr.msk.bf16.mxu1 %vm350_vm0, %v1329_v0  ;;  %v352_v2 = vsel %vm350_vm0, %v1329_v0, 0  ;;  %v1333_v5 = vld [vmem:[%s1839_s0 + $0x88] sm:$0xff]   ;;  %v1335_v7 = vld [vmem:[%s1839_s0 + $0x90] sm:$0xff]  }
   0x3   :  { %v1331_v3 = vld [vmem:[%s1839_s0 + $0x80] sm:$0xff]   ;;  %1260 = vmatpush3.bf16.msra.mxu0 %v352_v2  ;;  %1326 = vmatpush3.bf16.msra.mxu1 %v352_v2  ;;  %v1336_v8 = vld [vmem:[%s1839_s0 + $0x18] sm:$0xff]   ;;  %v1340_v12 = vld [vmem:[%s1839_s0 + $0x28] sm:$0xff]  }
   0x4   :  { %1261 = vmatprep.mubr.msk.bf16.mxu0 %vm253_vm1, %v1330_v1  ;;  %1293 = vmatprep.mubr.msk.bf16.mxu1 %vm253_vm1, %v1331_v3  ;;  %v1337_v9 = vld [vmem:[%s1839_s0 + $0x98] sm:$0xff]   ;;  %v1338_v10 = vld [vmem:[%s1839_s0 + $0x20] sm:$0xff]   ;;  %v1341_v13 = vld [vmem:[%s1839_s0 + $0xa8] sm:$0xff]  }
   0x5   :  { %v1339_v11 = vld [vmem:[%s1839_s0 + $0xa0] sm:$0xff]   ;;  %v1342_v14 = vld [vmem:[%s1839_s0 + $0x30] sm:$0xff]   ;;  %v1344_v16 = vld [vmem:[%s1839_s0 + $0x38] sm:$0xff]  }
   0x6   :  { %1262 = vmatmul.mubr.msk.bf16.vlgmr.msra.gmra.mrb[0].mxu0 %vm253_vm1, %v1332_v4  ;;  %1294 = vmatmul.mubr.msk.bf16.vlgmr.msra.gmra.mrb[0].mxu1 %vm253_vm1, %v1333_v5  ;;  %v1343_v15 = vld [vmem:[%s1839_s0 + $0xb0] sm:$0xff]   ;;  %v1345_v17 = vld [vmem:[%s1839_s0 + $0xb8] sm:$0xff]   ;;  %v1346_v18 = vld [vmem:[%s1839_s0 + $0x40] sm:$0xff]  }
   0x7   :  { %1265 = vmatprep.mubr.msk.bf16.mxu0 %vm253_vm1, %v1334_v6  ;;  %1297 = vmatprep.mubr.msk.bf16.mxu1 %vm253_vm1, %v1335_v7  ;;  %v1347_v19 = vld [vmem:[%s1839_s0 + $0xc0] sm:$0xff]   ;;  %v1348_v20 = vld [vmem:[%s1839_s0 + $0x48] sm:$0xff]   ;;  %v1350_v22 = vld [vmem:[%s1839_s0 + $0x50] sm:$0xff]  }
   0x8   :  { %v1349_v21 = vld [vmem:[%s1839_s0 + $0xc8] sm:$0xff]   ;;  %v1351_v23 = vld [vmem:[%s1839_s0 + $0xd0] sm:$0xff]   ;;  %v1352_v24 = vld [vmem:[%s1839_s0 + $0x58] sm:$0xff]  }
   0x9   :  { %v1353_v25 = vld [vmem:[%s1839_s0 + $0xd8] sm:$0xff]   ;;  %v1354_v26 = vld [vmem:[%s1839_s0 + $0x60] sm:$0xff]   ;;  %v1356_v28 = vld [vmem:[%s1839_s0 + $0x68] sm:$0xff]  }
   0xa   :  { %v1355_v27 = vld [vmem:[%s1839_s0 + $0xe0] sm:$0xff]   ;;  %v1357_v29 = vld [vmem:[%s1839_s0 + $0xe8] sm:$0xff]   ;;  %v1358_v30 = vld [vmem:[%s1839_s0 + $0x70] sm:$0xff]  }
   0xb   :  { %v1359_v31 = vld [vmem:[%s1839_s0 + $0xf0] sm:$0xff]   ;;  %v1360_v32 = vld [vmem:[%s1839_s0 + $0x78] sm:$0xff]   ;;  %v1516_v34 = vld [vmem:[%s1840_s2] ss:$0 sm:$0xff] }
   0xc   :  { %v1361_v33 = vld [vmem:[%s1839_s0 + $0xf8] sm:$0xff]  }
   0xe   :  { %1266 = vmatmul.mubr.msk.bf16.gmra.mrb[4].mxu0 %vm253_vm1, %v1336_v8  ;;  %1298 = vmatmul.mubr.msk.bf16.gmra.mrb[4].mxu1 %vm253_vm1, %v1337_v9 }
   0xf   :  { %1269 = vmatprep.mubr.msk.bf16.mxu0 %vm253_vm1, %v1338_v10  ;;  %1301 = vmatprep.mubr.msk.bf16.mxu1 %vm253_vm1, %v1339_v11 }
  0x16   :  { %1270 = vmatmul.mubr.msk.bf16.gmra.mrb[8].mxu0 %vm253_vm1, %v1340_v12  ;;  %1302 = vmatmul.mubr.msk.bf16.gmra.mrb[8].mxu1 %vm253_vm1, %v1341_v13 }
  0x17   :  { %1273 = vmatprep.mubr.msk.bf16.mxu0 %vm253_vm1, %v1342_v14  ;;  %1305 = vmatprep.mubr.msk.bf16.mxu1 %vm253_vm1, %v1343_v15 }
  0x1e   :  { %1274 = vmatmul.mubr.msk.bf16.gmra.mrb[12].mxu0 %vm253_vm1, %v1344_v16  ;;  %1306 = vmatmul.mubr.msk.bf16.gmra.mrb[12].mxu1 %vm253_vm1, %v1345_v17 }
  0x1f   :  { %1277 = vmatprep.mubr.msk.bf16.mxu0 %vm253_vm1, %v1346_v18  ;;  %1309 = vmatprep.mubr.msk.bf16.mxu1 %vm253_vm1, %v1347_v19 }
  0x26   :  { %1278 = vmatmul.mubr.msk.bf16.gmra.mrb[16].mxu0 %vm253_vm1, %v1348_v20  ;;  %1310 = vmatmul.mubr.msk.bf16.gmra.mrb[16].mxu1 %vm253_vm1, %v1349_v21 }
  0x27   :  { %1281 = vmatprep.mubr.msk.bf16.mxu0 %vm253_vm1, %v1350_v22  ;;  %1313 = vmatprep.mubr.msk.bf16.mxu1 %vm253_vm1, %v1351_v23 }
  0x2e   :  { %1282 = vmatmul.mubr.msk.bf16.gmra.mrb[20].mxu0 %vm253_vm1, %v1352_v24  ;;  %1314 = vmatmul.mubr.msk.bf16.gmra.mrb[20].mxu1 %vm253_vm1, %v1353_v25 }
  0x2f   :  { %1285 = vmatprep.mubr.msk.bf16.mxu0 %vm253_vm1, %v1354_v26  ;;  %1317 = vmatprep.mubr.msk.bf16.mxu1 %vm253_vm1, %v1355_v27 }
  0x36   :  { %1286 = vmatmul.mubr.msk.bf16.gmra.mrb[24].mxu0 %vm253_vm1, %v1356_v28  ;;  %1318 = vmatmul.mubr.msk.bf16.gmra.mrb[24].mxu1 %vm253_vm1, %v1357_v29 }
  0x37   :  { %1289 = vmatprep.mubr.msk.bf16.mxu0 %vm253_vm1, %v1358_v30  ;;  %1321 = vmatprep.mubr.msk.bf16.mxu1 %vm253_vm1, %v1359_v31 }
  0x3e   :  { %1290 = vmatmul.mubr.msk.bf16.gmra.mrb[28].mxu0 %vm253_vm1, %v1360_v32  ;;  %1322 = vmatmul.mubr.msk.bf16.gmra.mrb[28].mxu1 %vm253_vm1, %v1361_v33 }
  0xd9   :  { %v1263_v35 = vpop.f32.mrb[0].mxu0  ;;  %v1295_v36 = vpop.f32.mrb[0].mxu1 }
  0xda   :  { %v397_v37 = vadd.f32 %v1263_v35, %v1516_v34  ;;  %v525_v38 = vadd.f32 %v1295_v36, %v1516_v34  ;;  %v388_v39 = vpop.f32.mrb[1].mxu0  ;;  %v516_v40 = vpop.f32.mrb[1].mxu1 }
  0xdb   :  { %v389_v41 = vadd.f32 %v1516_v34, %v388_v39  ;;  %v517_v42 = vadd.f32 %v1516_v34, %v516_v40  ;;  %v1264_v43 = vpop.f32.mrb[2].mxu0  ;;  %v1296_v44 = vpop.f32.mrb[2].mxu1 }
  0xdc   :  { %v645_v45 = vmax.f32 %v397_v37, 0.0  ;;  %v677_v46 = vmax.f32 %v525_v38, 0.0  ;;  %v400_v47 = vadd.f32 %v1264_v43, %v1516_v34  ;;  %v528_v48 = vadd.f32 %v1296_v44, %v1516_v34  ;;  %v391_v49 = vpop.f32.mrb[3].mxu0  ;;  %v519_v50 = vpop.f32.mrb[3].mxu1 }
  0xdd   :  { %v643_v51 = vmax.f32 %v389_v41, 0.0  ;;  %v675_v52 = vmax.f32 %v517_v42, 0.0  ;;  %v392_v53 = vadd.f32 %v1516_v34, %v391_v49  ;;  %v520_v54 = vadd.f32 %v1516_v34, %v519_v50 }
  0xde   :  { %v1164_v55 = vpack.c.bf16 %v645_v45, %v645_v45  ;;  %v1196_v56 = vpack.c.bf16 %v677_v46, %v677_v46  ;;  %v646_v57 = vmax.f32 %v400_v47, 0.0  ;;  %v678_v58 = vmax.f32 %v528_v48, 0.0 }
  0xdf   :  { %v1162_v59 = vpack.c.bf16 %v643_v51, %v643_v51  ;;  %v1194_v60 = vpack.c.bf16 %v675_v52, %v675_v52  ;;  %v644_v61 = vmax.f32 %v392_v53, 0.0  ;;  %v676_v62 = vmax.f32 %v520_v54, 0.0 }
  0xe0   :  { %966 = vst.msk [vmem:[%s1841_s3 + $0x8] sm:$0xf] %vm963_vm2, %v1164_v55  ;;  %998 = vst.msk [vmem:[%s1841_s3 + $0x88] sm:$0xf] %vm963_vm2, %v1196_v56  ;;  %v1165_v63 = vpack.c.bf16 %v646_v57, %v646_v57  ;;  %v1197_v0 = vpack.c.bf16 %v678_v58, %v678_v58 }
  0xe1   :  { %964 = vst.msk [vmem:[%s1841_s3] sm:$0xf] %vm963_vm2, %v1162_v59  ;;  %996 = vst.msk [vmem:[%s1841_s3 + $0x80] sm:$0xf] %vm963_vm2, %v1194_v60  ;;  %v1163_v1 = vpack.c.bf16 %v644_v61, %v644_v61  ;;  %v1195_v2 = vpack.c.bf16 %v676_v62, %v676_v62  ;;  %v1267_v3 = vpop.f32.mrb[4].mxu0  ;;  %v1299_v4 = vpop.f32.mrb[4].mxu1 }
  0xe2   :  { %967 = vst.msk [vmem:[%s1841_s3 + $0xc] sm:$0xf] %vm963_vm2, %v1165_v63  ;;  %999 = vst.msk [vmem:[%s1841_s3 + $0x8c] sm:$0xf] %vm963_vm2, %v1197_v0  ;;  %v413_v5 = vadd.f32 %v1267_v3, %v1516_v34  ;;  %v541_v6 = vadd.f32 %v1299_v4, %v1516_v34  ;;  %v404_v7 = vpop.f32.mrb[5].mxu0  ;;  %v532_v8 = vpop.f32.mrb[5].mxu1 }
  0xe3   :  { %965 = vst.msk [vmem:[%s1841_s3 + $0x4] sm:$0xf] %vm963_vm2, %v1163_v1  ;;  %997 = vst.msk [vmem:[%s1841_s3 + $0x84] sm:$0xf] %vm963_vm2, %v1195_v2  ;;  %v405_v9 = vadd.f32 %v1516_v34, %v404_v7  ;;  %v533_v10 = vadd.f32 %v1516_v34, %v532_v8  ;;  %v1268_v11 = vpop.f32.mrb[6].mxu0  ;;  %v1300_v12 = vpop.f32.mrb[6].mxu1 }
  0xe4   :  { %v649_v13 = vmax.f32 %v413_v5, 0.0  ;;  %v681_v14 = vmax.f32 %v541_v6, 0.0  ;;  %v416_v15 = vadd.f32 %v1268_v11, %v1516_v34  ;;  %v544_v16 = vadd.f32 %v1300_v12, %v1516_v34  ;;  %v407_v17 = vpop.f32.mrb[7].mxu0  ;;  %v535_v18 = vpop.f32.mrb[7].mxu1 }
  0xe5   :  { %v647_v19 = vmax.f32 %v405_v9, 0.0  ;;  %v679_v20 = vmax.f32 %v533_v10, 0.0  ;;  %v408_v21 = vadd.f32 %v1516_v34, %v407_v17  ;;  %v536_v22 = vadd.f32 %v1516_v34, %v535_v18 }
  0xe6   :  { %v1168_v23 = vpack.c.bf16 %v649_v13, %v649_v13  ;;  %v1200_v24 = vpack.c.bf16 %v681_v14, %v681_v14  ;;  %v650_v25 = vmax.f32 %v416_v15, 0.0  ;;  %v682_v26 = vmax.f32 %v544_v16, 0.0 }
  0xe7   :  { %v1166_v27 = vpack.c.bf16 %v647_v19, %v647_v19  ;;  %v1198_v28 = vpack.c.bf16 %v679_v20, %v679_v20  ;;  %v648_v29 = vmax.f32 %v408_v21, 0.0  ;;  %v680_v30 = vmax.f32 %v536_v22, 0.0 }
  0xe8   :  { %970 = vst.msk [vmem:[%s1841_s3 + $0x18] sm:$0xf] %vm963_vm2, %v1168_v23  ;;  %1002 = vst.msk [vmem:[%s1841_s3 + $0x98] sm:$0xf] %vm963_vm2, %v1200_v24  ;;  %v1169_v31 = vpack.c.bf16 %v650_v25, %v650_v25  ;;  %v1201_v32 = vpack.c.bf16 %v682_v26, %v682_v26 }
  0xe9   :  { %968 = vst.msk [vmem:[%s1841_s3 + $0x10] sm:$0xf] %vm963_vm2, %v1166_v27  ;;  %1000 = vst.msk [vmem:[%s1841_s3 + $0x90] sm:$0xf] %vm963_vm2, %v1198_v28  ;;  %v1167_v33 = vpack.c.bf16 %v648_v29, %v648_v29  ;;  %v1199_v35 = vpack.c.bf16 %v680_v30, %v680_v30  ;;  %v1271_v36 = vpop.f32.mrb[8].mxu0  ;;  %v1303_v37 = vpop.f32.mrb[8].mxu1 }
  0xea   :  { %971 = vst.msk [vmem:[%s1841_s3 + $0x1c] sm:$0xf] %vm963_vm2, %v1169_v31  ;;  %1003 = vst.msk [vmem:[%s1841_s3 + $0x9c] sm:$0xf] %vm963_vm2, %v1201_v32  ;;  %v429_v38 = vadd.f32 %v1271_v36, %v1516_v34  ;;  %v557_v39 = vadd.f32 %v1303_v37, %v1516_v34  ;;  %v420_v40 = vpop.f32.mrb[9].mxu0  ;;  %v548_v41 = vpop.f32.mrb[9].mxu1 }
  0xeb   :  { %969 = vst.msk [vmem:[%s1841_s3 + $0x14] sm:$0xf] %vm963_vm2, %v1167_v33  ;;  %1001 = vst.msk [vmem:[%s1841_s3 + $0x94] sm:$0xf] %vm963_vm2, %v1199_v35  ;;  %v421_v42 = vadd.f32 %v1516_v34, %v420_v40  ;;  %v549_v43 = vadd.f32 %v1516_v34, %v548_v41  ;;  %v1272_v44 = vpop.f32.mrb[10].mxu0  ;;  %v1304_v45 = vpop.f32.mrb[10].mxu1 }
  0xec   :  { %v653_v46 = vmax.f32 %v429_v38, 0.0  ;;  %v685_v47 = vmax.f32 %v557_v39, 0.0  ;;  %v432_v48 = vadd.f32 %v1272_v44, %v1516_v34  ;;  %v560_v49 = vadd.f32 %v1304_v45, %v1516_v34  ;;  %v423_v50 = vpop.f32.mrb[11].mxu0  ;;  %v551_v51 = vpop.f32.mrb[11].mxu1 }
  0xed   :  { %v651_v52 = vmax.f32 %v421_v42, 0.0  ;;  %v683_v53 = vmax.f32 %v549_v43, 0.0  ;;  %v424_v54 = vadd.f32 %v1516_v34, %v423_v50  ;;  %v552_v55 = vadd.f32 %v1516_v34, %v551_v51 }
  0xee   :  { %v1172_v56 = vpack.c.bf16 %v653_v46, %v653_v46  ;;  %v1204_v57 = vpack.c.bf16 %v685_v47, %v685_v47  ;;  %v654_v58 = vmax.f32 %v432_v48, 0.0  ;;  %v686_v59 = vmax.f32 %v560_v49, 0.0 }
  0xef   :  { %v1170_v60 = vpack.c.bf16 %v651_v52, %v651_v52  ;;  %v1202_v61 = vpack.c.bf16 %v683_v53, %v683_v53  ;;  %v652_v62 = vmax.f32 %v424_v54, 0.0  ;;  %v684_v63 = vmax.f32 %v552_v55, 0.0 }
  0xf0   :  { %974 = vst.msk [vmem:[%s1841_s3 + $0x28] sm:$0xf] %vm963_vm2, %v1172_v56  ;;  %1006 = vst.msk [vmem:[%s1841_s3 + $0xa8] sm:$0xf] %vm963_vm2, %v1204_v57  ;;  %v1173_v0 = vpack.c.bf16 %v654_v58, %v654_v58  ;;  %v1205_v1 = vpack.c.bf16 %v686_v59, %v686_v59 }
  0xf1   :  { %972 = vst.msk [vmem:[%s1841_s3 + $0x20] sm:$0xf] %vm963_vm2, %v1170_v60  ;;  %1004 = vst.msk [vmem:[%s1841_s3 + $0xa0] sm:$0xf] %vm963_vm2, %v1202_v61  ;;  %v1171_v2 = vpack.c.bf16 %v652_v62, %v652_v62  ;;  %v1203_v3 = vpack.c.bf16 %v684_v63, %v684_v63  ;;  %v1275_v4 = vpop.f32.mrb[12].mxu0  ;;  %v1307_v5 = vpop.f32.mrb[12].mxu1 }
  0xf2   :  { %975 = vst.msk [vmem:[%s1841_s3 + $0x2c] sm:$0xf] %vm963_vm2, %v1173_v0  ;;  %1007 = vst.msk [vmem:[%s1841_s3 + $0xac] sm:$0xf] %vm963_vm2, %v1205_v1  ;;  %v445_v6 = vadd.f32 %v1275_v4, %v1516_v34  ;;  %v573_v7 = vadd.f32 %v1307_v5, %v1516_v34  ;;  %v436_v8 = vpop.f32.mrb[13].mxu0  ;;  %v564_v9 = vpop.f32.mrb[13].mxu1 }
  0xf3   :  { %973 = vst.msk [vmem:[%s1841_s3 + $0x24] sm:$0xf] %vm963_vm2, %v1171_v2  ;;  %1005 = vst.msk [vmem:[%s1841_s3 + $0xa4] sm:$0xf] %vm963_vm2, %v1203_v3  ;;  %v437_v10 = vadd.f32 %v1516_v34, %v436_v8  ;;  %v565_v11 = vadd.f32 %v1516_v34, %v564_v9  ;;  %v1276_v12 = vpop.f32.mrb[14].mxu0  ;;  %v1308_v13 = vpop.f32.mrb[14].mxu1 }
  0xf4   :  { %v657_v14 = vmax.f32 %v445_v6, 0.0  ;;  %v689_v15 = vmax.f32 %v573_v7, 0.0  ;;  %v448_v16 = vadd.f32 %v1276_v12, %v1516_v34  ;;  %v576_v17 = vadd.f32 %v1308_v13, %v1516_v34  ;;  %v439_v18 = vpop.f32.mrb[15].mxu0  ;;  %v567_v19 = vpop.f32.mrb[15].mxu1 }
  0xf5   :  { %v655_v20 = vmax.f32 %v437_v10, 0.0  ;;  %v687_v21 = vmax.f32 %v565_v11, 0.0  ;;  %v440_v22 = vadd.f32 %v1516_v34, %v439_v18  ;;  %v568_v23 = vadd.f32 %v1516_v34, %v567_v19 }
  0xf6   :  { %v1176_v24 = vpack.c.bf16 %v657_v14, %v657_v14  ;;  %v1208_v25 = vpack.c.bf16 %v689_v15, %v689_v15  ;;  %v658_v26 = vmax.f32 %v448_v16, 0.0  ;;  %v690_v27 = vmax.f32 %v576_v17, 0.0 }
  0xf7   :  { %v1174_v28 = vpack.c.bf16 %v655_v20, %v655_v20  ;;  %v1206_v29 = vpack.c.bf16 %v687_v21, %v687_v21  ;;  %v656_v30 = vmax.f32 %v440_v22, 0.0  ;;  %v688_v31 = vmax.f32 %v568_v23, 0.0 }
  0xf8   :  { %978 = vst.msk [vmem:[%s1841_s3 + $0x38] sm:$0xf] %vm963_vm2, %v1176_v24  ;;  %1010 = vst.msk [vmem:[%s1841_s3 + $0xb8] sm:$0xf] %vm963_vm2, %v1208_v25  ;;  %v1177_v32 = vpack.c.bf16 %v658_v26, %v658_v26  ;;  %v1209_v33 = vpack.c.bf16 %v690_v27, %v690_v27 }
  0xf9   :  { %976 = vst.msk [vmem:[%s1841_s3 + $0x30] sm:$0xf] %vm963_vm2, %v1174_v28  ;;  %1008 = vst.msk [vmem:[%s1841_s3 + $0xb0] sm:$0xf] %vm963_vm2, %v1206_v29  ;;  %v1175_v35 = vpack.c.bf16 %v656_v30, %v656_v30  ;;  %v1207_v36 = vpack.c.bf16 %v688_v31, %v688_v31  ;;  %v1279_v37 = vpop.f32.mrb[16].mxu0  ;;  %v1311_v38 = vpop.f32.mrb[16].mxu1 }
  0xfa   :  { %979 = vst.msk [vmem:[%s1841_s3 + $0x3c] sm:$0xf] %vm963_vm2, %v1177_v32  ;;  %1011 = vst.msk [vmem:[%s1841_s3 + $0xbc] sm:$0xf] %vm963_vm2, %v1209_v33  ;;  %v461_v39 = vadd.f32 %v1279_v37, %v1516_v34  ;;  %v589_v40 = vadd.f32 %v1311_v38, %v1516_v34  ;;  %v452_v41 = vpop.f32.mrb[17].mxu0  ;;  %v580_v42 = vpop.f32.mrb[17].mxu1 }
  0xfb   :  { %977 = vst.msk [vmem:[%s1841_s3 + $0x34] sm:$0xf] %vm963_vm2, %v1175_v35  ;;  %1009 = vst.msk [vmem:[%s1841_s3 + $0xb4] sm:$0xf] %vm963_vm2, %v1207_v36  ;;  %v453_v43 = vadd.f32 %v1516_v34, %v452_v41  ;;  %v581_v44 = vadd.f32 %v1516_v34, %v580_v42  ;;  %v1280_v45 = vpop.f32.mrb[18].mxu0  ;;  %v1312_v46 = vpop.f32.mrb[18].mxu1 }
  0xfc   :  { %v661_v47 = vmax.f32 %v461_v39, 0.0  ;;  %v693_v48 = vmax.f32 %v589_v40, 0.0  ;;  %v464_v49 = vadd.f32 %v1280_v45, %v1516_v34  ;;  %v592_v50 = vadd.f32 %v1312_v46, %v1516_v34  ;;  %v455_v51 = vpop.f32.mrb[19].mxu0  ;;  %v583_v52 = vpop.f32.mrb[19].mxu1 }
  0xfd   :  { %v659_v53 = vmax.f32 %v453_v43, 0.0  ;;  %v691_v54 = vmax.f32 %v581_v44, 0.0  ;;  %v456_v55 = vadd.f32 %v1516_v34, %v455_v51  ;;  %v584_v56 = vadd.f32 %v1516_v34, %v583_v52 }
  0xfe   :  { %v1180_v57 = vpack.c.bf16 %v661_v47, %v661_v47  ;;  %v1212_v58 = vpack.c.bf16 %v693_v48, %v693_v48  ;;  %v662_v59 = vmax.f32 %v464_v49, 0.0  ;;  %v694_v60 = vmax.f32 %v592_v50, 0.0 }
  0xff   :  { %v1178_v61 = vpack.c.bf16 %v659_v53, %v659_v53  ;;  %v1210_v62 = vpack.c.bf16 %v691_v54, %v691_v54  ;;  %v660_v63 = vmax.f32 %v456_v55, 0.0  ;;  %v692_v0 = vmax.f32 %v584_v56, 0.0 }
 0x100   :  { %982 = vst.msk [vmem:[%s1841_s3 + $0x48] sm:$0xf] %vm963_vm2, %v1180_v57  ;;  %1014 = vst.msk [vmem:[%s1841_s3 + $0xc8] sm:$0xf] %vm963_vm2, %v1212_v58  ;;  %v1181_v1 = vpack.c.bf16 %v662_v59, %v662_v59  ;;  %v1213_v2 = vpack.c.bf16 %v694_v60, %v694_v60 }
 0x101   :  { %980 = vst.msk [vmem:[%s1841_s3 + $0x40] sm:$0xf] %vm963_vm2, %v1178_v61  ;;  %1012 = vst.msk [vmem:[%s1841_s3 + $0xc0] sm:$0xf] %vm963_vm2, %v1210_v62  ;;  %v1179_v3 = vpack.c.bf16 %v660_v63, %v660_v63  ;;  %v1211_v4 = vpack.c.bf16 %v692_v0, %v692_v0  ;;  %v1283_v5 = vpop.f32.mrb[20].mxu0  ;;  %v1315_v6 = vpop.f32.mrb[20].mxu1 }
 0x102   :  { %983 = vst.msk [vmem:[%s1841_s3 + $0x4c] sm:$0xf] %vm963_vm2, %v1181_v1  ;;  %1015 = vst.msk [vmem:[%s1841_s3 + $0xcc] sm:$0xf] %vm963_vm2, %v1213_v2  ;;  %v477_v7 = vadd.f32 %v1283_v5, %v1516_v34  ;;  %v605_v8 = vadd.f32 %v1315_v6, %v1516_v34  ;;  %v468_v9 = vpop.f32.mrb[21].mxu0  ;;  %v596_v10 = vpop.f32.mrb[21].mxu1 }
 0x103   :  { %981 = vst.msk [vmem:[%s1841_s3 + $0x44] sm:$0xf] %vm963_vm2, %v1179_v3  ;;  %1013 = vst.msk [vmem:[%s1841_s3 + $0xc4] sm:$0xf] %vm963_vm2, %v1211_v4  ;;  %v469_v11 = vadd.f32 %v1516_v34, %v468_v9  ;;  %v597_v12 = vadd.f32 %v1516_v34, %v596_v10  ;;  %v1284_v13 = vpop.f32.mrb[22].mxu0  ;;  %v1316_v14 = vpop.f32.mrb[22].mxu1 }
 0x104   :  { %v665_v15 = vmax.f32 %v477_v7, 0.0  ;;  %v697_v16 = vmax.f32 %v605_v8, 0.0  ;;  %v480_v17 = vadd.f32 %v1284_v13, %v1516_v34  ;;  %v608_v18 = vadd.f32 %v1316_v14, %v1516_v34  ;;  %v471_v19 = vpop.f32.mrb[23].mxu0  ;;  %v599_v20 = vpop.f32.mrb[23].mxu1 }
 0x105   :  { %v663_v21 = vmax.f32 %v469_v11, 0.0  ;;  %v695_v22 = vmax.f32 %v597_v12, 0.0  ;;  %v472_v23 = vadd.f32 %v1516_v34, %v471_v19  ;;  %v600_v24 = vadd.f32 %v1516_v34, %v599_v20 }
 0x106   :  { %v1184_v25 = vpack.c.bf16 %v665_v15, %v665_v15  ;;  %v1216_v26 = vpack.c.bf16 %v697_v16, %v697_v16  ;;  %v666_v27 = vmax.f32 %v480_v17, 0.0  ;;  %v698_v28 = vmax.f32 %v608_v18, 0.0 }
 0x107   :  { %v1182_v29 = vpack.c.bf16 %v663_v21, %v663_v21  ;;  %v1214_v30 = vpack.c.bf16 %v695_v22, %v695_v22  ;;  %v664_v31 = vmax.f32 %v472_v23, 0.0  ;;  %v696_v32 = vmax.f32 %v600_v24, 0.0 }
 0x108   :  { %986 = vst.msk [vmem:[%s1841_s3 + $0x58] sm:$0xf] %vm963_vm2, %v1184_v25  ;;  %1018 = vst.msk [vmem:[%s1841_s3 + $0xd8] sm:$0xf] %vm963_vm2, %v1216_v26  ;;  %v1185_v33 = vpack.c.bf16 %v666_v27, %v666_v27  ;;  %v1217_v35 = vpack.c.bf16 %v698_v28, %v698_v28 }
 0x109   :  { %984 = vst.msk [vmem:[%s1841_s3 + $0x50] sm:$0xf] %vm963_vm2, %v1182_v29  ;;  %1016 = vst.msk [vmem:[%s1841_s3 + $0xd0] sm:$0xf] %vm963_vm2, %v1214_v30  ;;  %v1183_v36 = vpack.c.bf16 %v664_v31, %v664_v31  ;;  %v1215_v37 = vpack.c.bf16 %v696_v32, %v696_v32  ;;  %v1287_v38 = vpop.f32.mrb[24].mxu0  ;;  %v1319_v39 = vpop.f32.mrb[24].mxu1 }
 0x10a   :  { %987 = vst.msk [vmem:[%s1841_s3 + $0x5c] sm:$0xf] %vm963_vm2, %v1185_v33  ;;  %1019 = vst.msk [vmem:[%s1841_s3 + $0xdc] sm:$0xf] %vm963_vm2, %v1217_v35  ;;  %v493_v40 = vadd.f32 %v1287_v38, %v1516_v34  ;;  %v621_v41 = vadd.f32 %v1319_v39, %v1516_v34  ;;  %v484_v42 = vpop.f32.mrb[25].mxu0  ;;  %v612_v43 = vpop.f32.mrb[25].mxu1 }
 0x10b   :  { %985 = vst.msk [vmem:[%s1841_s3 + $0x54] sm:$0xf] %vm963_vm2, %v1183_v36  ;;  %1017 = vst.msk [vmem:[%s1841_s3 + $0xd4] sm:$0xf] %vm963_vm2, %v1215_v37  ;;  %v485_v44 = vadd.f32 %v1516_v34, %v484_v42  ;;  %v613_v45 = vadd.f32 %v1516_v34, %v612_v43  ;;  %v1288_v46 = vpop.f32.mrb[26].mxu0  ;;  %v1320_v47 = vpop.f32.mrb[26].mxu1 }
 0x10c   :  { %v669_v48 = vmax.f32 %v493_v40, 0.0  ;;  %v701_v49 = vmax.f32 %v621_v41, 0.0  ;;  %v496_v50 = vadd.f32 %v1288_v46, %v1516_v34  ;;  %v624_v51 = vadd.f32 %v1320_v47, %v1516_v34  ;;  %v487_v52 = vpop.f32.mrb[27].mxu0  ;;  %v615_v53 = vpop.f32.mrb[27].mxu1 }
 0x10d   :  { %v667_v54 = vmax.f32 %v485_v44, 0.0  ;;  %v699_v55 = vmax.f32 %v613_v45, 0.0  ;;  %v488_v56 = vadd.f32 %v1516_v34, %v487_v52  ;;  %v616_v57 = vadd.f32 %v1516_v34, %v615_v53 }
 0x10e   :  { %v1188_v58 = vpack.c.bf16 %v669_v48, %v669_v48  ;;  %v1220_v59 = vpack.c.bf16 %v701_v49, %v701_v49  ;;  %v670_v60 = vmax.f32 %v496_v50, 0.0  ;;  %v702_v61 = vmax.f32 %v624_v51, 0.0 }
 0x10f   :  { %v1186_v62 = vpack.c.bf16 %v667_v54, %v667_v54  ;;  %v1218_v63 = vpack.c.bf16 %v699_v55, %v699_v55  ;;  %v668_v0 = vmax.f32 %v488_v56, 0.0  ;;  %v700_v1 = vmax.f32 %v616_v57, 0.0 }
 0x110   :  { %990 = vst.msk [vmem:[%s1841_s3 + $0x68] sm:$0xf] %vm963_vm2, %v1188_v58  ;;  %1022 = vst.msk [vmem:[%s1841_s3 + $0xe8] sm:$0xf] %vm963_vm2, %v1220_v59  ;;  %v1189_v2 = vpack.c.bf16 %v670_v60, %v670_v60  ;;  %v1221_v3 = vpack.c.bf16 %v702_v61, %v702_v61 }
 0x111   :  { %988 = vst.msk [vmem:[%s1841_s3 + $0x60] sm:$0xf] %vm963_vm2, %v1186_v62  ;;  %1020 = vst.msk [vmem:[%s1841_s3 + $0xe0] sm:$0xf] %vm963_vm2, %v1218_v63  ;;  %v1187_v4 = vpack.c.bf16 %v668_v0, %v668_v0  ;;  %v1219_v5 = vpack.c.bf16 %v700_v1, %v700_v1  ;;  %v1291_v6 = vpop.f32.mrb[28].mxu0  ;;  %v1323_v7 = vpop.f32.mrb[28].mxu1 }
 0x112   :  { %991 = vst.msk [vmem:[%s1841_s3 + $0x6c] sm:$0xf] %vm963_vm2, %v1189_v2  ;;  %1023 = vst.msk [vmem:[%s1841_s3 + $0xec] sm:$0xf] %vm963_vm2, %v1221_v3  ;;  %v509_v8 = vadd.f32 %v1291_v6, %v1516_v34  ;;  %v637_v9 = vadd.f32 %v1323_v7, %v1516_v34  ;;  %v500_v10 = vpop.f32.mrb[29].mxu0  ;;  %v628_v11 = vpop.f32.mrb[29].mxu1 }
 0x113   :  { %989 = vst.msk [vmem:[%s1841_s3 + $0x64] sm:$0xf] %vm963_vm2, %v1187_v4  ;;  %1021 = vst.msk [vmem:[%s1841_s3 + $0xe4] sm:$0xf] %vm963_vm2, %v1219_v5  ;;  %v501_v12 = vadd.f32 %v1516_v34, %v500_v10  ;;  %v629_v13 = vadd.f32 %v1516_v34, %v628_v11  ;;  %v1292_v14 = vpop.f32.mrb[30].mxu0  ;;  %v1324_v15 = vpop.f32.mrb[30].mxu1 }
 0x114   :  { %v673_v16 = vmax.f32 %v509_v8, 0.0  ;;  %v705_v17 = vmax.f32 %v637_v9, 0.0  ;;  %v512_v18 = vadd.f32 %v1292_v14, %v1516_v34  ;;  %v640_v19 = vadd.f32 %v1324_v15, %v1516_v34  ;;  %v503_v20 = vpop.f32.mrb[31].mxu0  ;;  %v631_v21 = vpop.f32.mrb[31].mxu1 }
 0x115   :  { %v671_v22 = vmax.f32 %v501_v12, 0.0  ;;  %v703_v23 = vmax.f32 %v629_v13, 0.0  ;;  %v504_v24 = vadd.f32 %v1516_v34, %v503_v20  ;;  %v632_v25 = vadd.f32 %v1516_v34, %v631_v21 }
 0x116   :  { %v1192_v26 = vpack.c.bf16 %v673_v16, %v673_v16  ;;  %v1224_v27 = vpack.c.bf16 %v705_v17, %v705_v17  ;;  %v674_v28 = vmax.f32 %v512_v18, 0.0  ;;  %v706_v29 = vmax.f32 %v640_v19, 0.0 }
 0x117   :  { %v1190_v30 = vpack.c.bf16 %v671_v22, %v671_v22  ;;  %v1222_v31 = vpack.c.bf16 %v703_v23, %v703_v23  ;;  %v672_v32 = vmax.f32 %v504_v24, 0.0  ;;  %v704_v33 = vmax.f32 %v632_v25, 0.0 }
 0x118   :  { %994 = vst.msk [vmem:[%s1841_s3 + $0x78] sm:$0xf] %vm963_vm2, %v1192_v26  ;;  %1026 = vst.msk [vmem:[%s1841_s3 + $0xf8] sm:$0xf] %vm963_vm2, %v1224_v27  ;;  %v1193_v35 = vpack.c.bf16 %v674_v28, %v674_v28  ;;  %v1225_v34 = vpack.c.bf16 %v706_v29, %v706_v29 }
 0x119   :  { %992 = vst.msk [vmem:[%s1841_s3 + $0x70] sm:$0xf] %vm963_vm2, %v1190_v30  ;;  %1024 = vst.msk [vmem:[%s1841_s3 + $0xf0] sm:$0xf] %vm963_vm2, %v1222_v31  ;;  %v1191_v36 = vpack.c.bf16 %v672_v32, %v672_v32  ;;  %v1223_v37 = vpack.c.bf16 %v704_v33, %v704_v33 }
 0x11a   :  { %995 = vst.msk [vmem:[%s1841_s3 + $0x7c] sm:$0xf] %vm963_vm2, %v1193_v35  ;;  %1027 = vst.msk [vmem:[%s1841_s3 + $0xfc] sm:$0xf] %vm963_vm2, %v1225_v34 }
 0x11b   :  { %993 = vst.msk [vmem:[%s1841_s3 + $0x74] sm:$0xf] %vm963_vm2, %v1191_v36  ;;  %1025 = vst.msk [vmem:[%s1841_s3 + $0xf4] sm:$0xf] %vm963_vm2, %v1223_v37 }

// kernel: slowfast_forward.13
= control target key start
LH: loop header
LB: loop body
LE: loop exit
PB: predicated region body
PF: predicated region fallthrough
CT: control target
= control target key end

     0   :  { %vm350_vm0 = vcmask 1045504   ;;  %vm253_vm1 = vcmask 97280   ;;  %vm963_vm2 = vcmask 257024   ;;  %s1838_s1 = inlined_call_operand.vmem [shape: bf16[12,32], index: 1, kind: input, shape index: {}]   ;;  %s1839_s0 = inlined_call_operand.vmem [shape: bf16[512,12], index: 0, kind: input, shape index: {}]   ;;  %s1840_s2 = inlined_call_operand.vmem [shape: f32[1,32], index: 2, kind: input, shape index: {}]   ;;  %s1841_s3 = inlined_call_operand.vmem [shape: bf16[512,32], index: 3, kind: output, shape index: {}]  }
   0x1   :  { %v1329_v0 = vld [vmem:[%s1838_s1] sm:$0x3f]   ;;  %v1332_v4 = vld [vmem:[%s1839_s0 + $0x8] sm:$0xff]   ;;  %v1334_v6 = vld [vmem:[%s1839_s0 + $0x10] sm:$0xff]  }
   0x2   :  { %v1330_v1 = vld [vmem:[%s1839_s0] sm:$0xff]   ;;  %1327 = vmatprep.subr.msk.bf16.mxu0 %vm350_vm0, %v1329_v0  ;;  %1328 = vmatprep.subr.msk.bf16.mxu1 %vm350_vm0, %v1329_v0  ;;  %v352_v2 = vsel %vm350_vm0, %v1329_v0, 0  ;;  %v1333_v5 = vld [vmem:[%s1839_s0 + $0x88] sm:$0xff]   ;;  %v1335_v7 = vld [vmem:[%s1839_s0 + $0x90] sm:$0xff]  }
   0x3   :  { %v1331_v3 = vld [vmem:[%s1839_s0 + $0x80] sm:$0xff]   ;;  %1260 = vmatpush3.bf16.msra.mxu0 %v352_v2  ;;  %1326 = vmatpush3.bf16.msra.mxu1 %v352_v2  ;;  %v1336_v8 = vld [vmem:[%s1839_s0 + $0x18] sm:$0xff]   ;;  %v1340_v12 = vld [vmem:[%s1839_s0 + $0x28] sm:$0xff]  }
   0x4   :  { %1261 = vmatprep.mubr.msk.bf16.mxu0 %vm253_vm1, %v1330_v1  ;;  %1293 = vmatprep.mubr.msk.bf16.mxu1 %vm253_vm1, %v1331_v3  ;;  %v1337_v9 = vld [vmem:[%s1839_s0 + $0x98] sm:$0xff]   ;;  %v1338_v10 = vld [vmem:[%s1839_s0 + $0x20] sm:$0xff]   ;;  %v1341_v13 = vld [vmem:[%s1839_s0 + $0xa8] sm:$0xff]  }
   0x5   :  { %v1339_v11 = vld [vmem:[%s1839_s0 + $0xa0] sm:$0xff]   ;;  %v1342_v14 = vld [vmem:[%s1839_s0 + $0x30] sm:$0xff]   ;;  %v1344_v16 = vld [vmem:[%s1839_s0 + $0x38] sm:$0xff]  }
   0x6   :  { %1262 = vmatmul.mubr.msk.bf16.vlgmr.msra.gmra.mrb[0].mxu0 %vm253_vm1, %v1332_v4  ;;  %1294 = vmatmul.mubr.msk.bf16.vlgmr.msra.gmra.mrb[0].mxu1 %vm253_vm1, %v1333_v5  ;;  %v1343_v15 = vld [vmem:[%s1839_s0 + $0xb0] sm:$0xff]   ;;  %v1345_v17 = vld [vmem:[%s1839_s0 + $0xb8] sm:$0xff]   ;;  %v1346_v18 = vld [vmem:[%s1839_s0 + $0x40] sm:$0xff]  }
   0x7   :  { %1265 = vmatprep.mubr.msk.bf16.mxu0 %vm253_vm1, %v1334_v6  ;;  %1297 = vmatprep.mubr.msk.bf16.mxu1 %vm253_vm1, %v1335_v7  ;;  %v1347_v19 = vld [vmem:[%s1839_s0 + $0xc0] sm:$0xff]   ;;  %v1348_v20 = vld [vmem:[%s1839_s0 + $0x48] sm:$0xff]   ;;  %v1350_v22 = vld [vmem:[%s1839_s0 + $0x50] sm:$0xff]  }
   0x8   :  { %v1349_v21 = vld [vmem:[%s1839_s0 + $0xc8] sm:$0xff]   ;;  %v1351_v23 = vld [vmem:[%s1839_s0 + $0xd0] sm:$0xff]   ;;  %v1352_v24 = vld [vmem:[%s1839_s0 + $0x58] sm:$0xff]  }
   0x9   :  { %v1353_v25 = vld [vmem:[%s1839_s0 + $0xd8] sm:$0xff]   ;;  %v1354_v26 = vld [vmem:[%s1839_s0 + $0x60] sm:$0xff]   ;;  %v1356_v28 = vld [vmem:[%s1839_s0 + $0x68] sm:$0xff]  }
   0xa   :  { %v1355_v27 = vld [vmem:[%s1839_s0 + $0xe0] sm:$0xff]   ;;  %v1357_v29 = vld [vmem:[%s1839_s0 + $0xe8] sm:$0xff]   ;;  %v1358_v30 = vld [vmem:[%s1839_s0 + $0x70] sm:$0xff]  }
   0xb   :  { %v1359_v31 = vld [vmem:[%s1839_s0 + $0xf0] sm:$0xff]   ;;  %v1360_v32 = vld [vmem:[%s1839_s0 + $0x78] sm:$0xff]   ;;  %v1516_v34 = vld [vmem:[%s1840_s2] ss:$0 sm:$0xff] }
   0xc   :  { %v1361_v33 = vld [vmem:[%s1839_s0 + $0xf8] sm:$0xff]  }
   0xe   :  { %1266 = vmatmul.mubr.msk.bf16.gmra.mrb[4].mxu0 %vm253_vm1, %v1336_v8  ;;  %1298 = vmatmul.mubr.msk.bf16.gmra.mrb[4].mxu1 %vm253_vm1, %v1337_v9 }
   0xf   :  { %1269 = vmatprep.mubr.msk.bf16.mxu0 %vm253_vm1, %v1338_v10  ;;  %1301 = vmatprep.mubr.msk.bf16.mxu1 %vm253_vm1, %v1339_v11 }
  0x16   :  { %1270 = vmatmul.mubr.msk.bf16.gmra.mrb[8].mxu0 %vm253_vm1, %v1340_v12  ;;  %1302 = vmatmul.mubr.msk.bf16.gmra.mrb[8].mxu1 %vm253_vm1, %v1341_v13 }
  0x17   :  { %1273 = vmatprep.mubr.msk.bf16.mxu0 %vm253_vm1, %v1342_v14  ;;  %1305 = vmatprep.mubr.msk.bf16.mxu1 %vm253_vm1, %v1343_v15 }
  0x1e   :  { %1274 = vmatmul.mubr.msk.bf16.gmra.mrb[12].mxu0 %vm253_vm1, %v1344_v16  ;;  %1306 = vmatmul.mubr.msk.bf16.gmra.mrb[12].mxu1 %vm253_vm1, %v1345_v17 }
  0x1f   :  { %1277 = vmatprep.mubr.msk.bf16.mxu0 %vm253_vm1, %v1346_v18  ;;  %1309 = vmatprep.mubr.msk.bf16.mxu1 %vm253_vm1, %v1347_v19 }
  0x26   :  { %1278 = vmatmul.mubr.msk.bf16.gmra.mrb[16].mxu0 %vm253_vm1, %v1348_v20  ;;  %1310 = vmatmul.mubr.msk.bf16.gmra.mrb[16].mxu1 %vm253_vm1, %v1349_v21 }
  0x27   :  { %1281 = vmatprep.mubr.msk.bf16.mxu0 %vm253_vm1, %v1350_v22  ;;  %1313 = vmatprep.mubr.msk.bf16.mxu1 %vm253_vm1, %v1351_v23 }
  0x2e   :  { %1282 = vmatmul.mubr.msk.bf16.gmra.mrb[20].mxu0 %vm253_vm1, %v1352_v24  ;;  %1314 = vmatmul.mubr.msk.bf16.gmra.mrb[20].mxu1 %vm253_vm1, %v1353_v25 }
  0x2f   :  { %1285 = vmatprep.mubr.msk.bf16.mxu0 %vm253_vm1, %v1354_v26  ;;  %1317 = vmatprep.mubr.msk.bf16.mxu1 %vm253_vm1, %v1355_v27 }
  0x36   :  { %1286 = vmatmul.mubr.msk.bf16.gmra.mrb[24].mxu0 %vm253_vm1, %v1356_v28  ;;  %1318 = vmatmul.mubr.msk.bf16.gmra.mrb[24].mxu1 %vm253_vm1, %v1357_v29 }
  0x37   :  { %1289 = vmatprep.mubr.msk.bf16.mxu0 %vm253_vm1, %v1358_v30  ;;  %1321 = vmatprep.mubr.msk.bf16.mxu1 %vm253_vm1, %v1359_v31 }
  0x3e   :  { %1290 = vmatmul.mubr.msk.bf16.gmra.mrb[28].mxu0 %vm253_vm1, %v1360_v32  ;;  %1322 = vmatmul.mubr.msk.bf16.gmra.mrb[28].mxu1 %vm253_vm1, %v1361_v33 }
  0xd9   :  { %v1263_v35 = vpop.f32.mrb[0].mxu0  ;;  %v1295_v36 = vpop.f32.mrb[0].mxu1 }
  0xda   :  { %v397_v37 = vadd.f32 %v1263_v35, %v1516_v34  ;;  %v525_v38 = vadd.f32 %v1295_v36, %v1516_v34  ;;  %v388_v39 = vpop.f32.mrb[1].mxu0  ;;  %v516_v40 = vpop.f32.mrb[1].mxu1 }
  0xdb   :  { %v389_v41 = vadd.f32 %v1516_v34, %v388_v39  ;;  %v517_v42 = vadd.f32 %v1516_v34, %v516_v40  ;;  %v1264_v43 = vpop.f32.mrb[2].mxu0  ;;  %v1296_v44 = vpop.f32.mrb[2].mxu1 }
  0xdc   :  { %v645_v45 = vmax.f32 %v397_v37, 0.0  ;;  %v677_v46 = vmax.f32 %v525_v38, 0.0  ;;  %v400_v47 = vadd.f32 %v1264_v43, %v1516_v34  ;;  %v528_v48 = vadd.f32 %v1296_v44, %v1516_v34  ;;  %v391_v49 = vpop.f32.mrb[3].mxu0  ;;  %v519_v50 = vpop.f32.mrb[3].mxu1 }
  0xdd   :  { %v643_v51 = vmax.f32 %v389_v41, 0.0  ;;  %v675_v52 = vmax.f32 %v517_v42, 0.0  ;;  %v392_v53 = vadd.f32 %v1516_v34, %v391_v49  ;;  %v520_v54 = vadd.f32 %v1516_v34, %v519_v50 }
  0xde   :  { %v1164_v55 = vpack.c.bf16 %v645_v45, %v645_v45  ;;  %v1196_v56 = vpack.c.bf16 %v677_v46, %v677_v46  ;;  %v646_v57 = vmax.f32 %v400_v47, 0.0  ;;  %v678_v58 = vmax.f32 %v528_v48, 0.0 }
  0xdf   :  { %v1162_v59 = vpack.c.bf16 %v643_v51, %v643_v51  ;;  %v1194_v60 = vpack.c.bf16 %v675_v52, %v675_v52  ;;  %v644_v61 = vmax.f32 %v392_v53, 0.0  ;;  %v676_v62 = vmax.f32 %v520_v54, 0.0 }
  0xe0   :  { %966 = vst.msk [vmem:[%s1841_s3 + $0x8] sm:$0xf] %vm963_vm2, %v1164_v55  ;;  %998 = vst.msk [vmem:[%s1841_s3 + $0x88] sm:$0xf] %vm963_vm2, %v1196_v56  ;;  %v1165_v63 = vpack.c.bf16 %v646_v57, %v646_v57  ;;  %v1197_v0 = vpack.c.bf16 %v678_v58, %v678_v58 }
  0xe1   :  { %964 = vst.msk [vmem:[%s1841_s3] sm:$0xf] %vm963_vm2, %v1162_v59  ;;  %996 = vst.msk [vmem:[%s1841_s3 + $0x80] sm:$0xf] %vm963_vm2, %v1194_v60  ;;  %v1163_v1 = vpack.c.bf16 %v644_v61, %v644_v61  ;;  %v1195_v2 = vpack.c.bf16 %v676_v62, %v676_v62  ;;  %v1267_v3 = vpop.f32.mrb[4].mxu0  ;;  %v1299_v4 = vpop.f32.mrb[4].mxu1 }
  0xe2   :  { %967 = vst.msk [vmem:[%s1841_s3 + $0xc] sm:$0xf] %vm963_vm2, %v1165_v63  ;;  %999 = vst.msk [vmem:[%s1841_s3 + $0x8c] sm:$0xf] %vm963_vm2, %v1197_v0  ;;  %v413_v5 = vadd.f32 %v1267_v3, %v1516_v34  ;;  %v541_v6 = vadd.f32 %v1299_v4, %v1516_v34  ;;  %v404_v7 = vpop.f32.mrb[5].mxu0  ;;  %v532_v8 = vpop.f32.mrb[5].mxu1 }
  0xe3   :  { %965 = vst.msk [vmem:[%s1841_s3 + $0x4] sm:$0xf] %vm963_vm2, %v1163_v1  ;;  %997 = vst.msk [vmem:[%s1841_s3 + $0x84] sm:$0xf] %vm963_vm2, %v1195_v2  ;;  %v405_v9 = vadd.f32 %v1516_v34, %v404_v7  ;;  %v533_v10 = vadd.f32 %v1516_v34, %v532_v8  ;;  %v1268_v11 = vpop.f32.mrb[6].mxu0  ;;  %v1300_v12 = vpop.f32.mrb[6].mxu1 }
  0xe4   :  { %v649_v13 = vmax.f32 %v413_v5, 0.0  ;;  %v681_v14 = vmax.f32 %v541_v6, 0.0  ;;  %v416_v15 = vadd.f32 %v1268_v11, %v1516_v34  ;;  %v544_v16 = vadd.f32 %v1300_v12, %v1516_v34  ;;  %v407_v17 = vpop.f32.mrb[7].mxu0  ;;  %v535_v18 = vpop.f32.mrb[7].mxu1 }
  0xe5   :  { %v647_v19 = vmax.f32 %v405_v9, 0.0  ;;  %v679_v20 = vmax.f32 %v533_v10, 0.0  ;;  %v408_v21 = vadd.f32 %v1516_v34, %v407_v17  ;;  %v536_v22 = vadd.f32 %v1516_v34, %v535_v18 }
  0xe6   :  { %v1168_v23 = vpack.c.bf16 %v649_v13, %v649_v13  ;;  %v1200_v24 = vpack.c.bf16 %v681_v14, %v681_v14  ;;  %v650_v25 = vmax.f32 %v416_v15, 0.0  ;;  %v682_v26 = vmax.f32 %v544_v16, 0.0 }
  0xe7   :  { %v1166_v27 = vpack.c.bf16 %v647_v19, %v647_v19  ;;  %v1198_v28 = vpack.c.bf16 %v679_v20, %v679_v20  ;;  %v648_v29 = vmax.f32 %v408_v21, 0.0  ;;  %v680_v30 = vmax.f32 %v536_v22, 0.0 }
  0xe8   :  { %970 = vst.msk [vmem:[%s1841_s3 + $0x18] sm:$0xf] %vm963_vm2, %v1168_v23  ;;  %1002 = vst.msk [vmem:[%s1841_s3 + $0x98] sm:$0xf] %vm963_vm2, %v1200_v24  ;;  %v1169_v31 = vpack.c.bf16 %v650_v25, %v650_v25  ;;  %v1201_v32 = vpack.c.bf16 %v682_v26, %v682_v26 }
  0xe9   :  { %968 = vst.msk [vmem:[%s1841_s3 + $0x10] sm:$0xf] %vm963_vm2, %v1166_v27  ;;  %1000 = vst.msk [vmem:[%s1841_s3 + $0x90] sm:$0xf] %vm963_vm2, %v1198_v28  ;;  %v1167_v33 = vpack.c.bf16 %v648_v29, %v648_v29  ;;  %v1199_v35 = vpack.c.bf16 %v680_v30, %v680_v30  ;;  %v1271_v36 = vpop.f32.mrb[8].mxu0  ;;  %v1303_v37 = vpop.f32.mrb[8].mxu1 }
  0xea   :  { %971 = vst.msk [vmem:[%s1841_s3 + $0x1c] sm:$0xf] %vm963_vm2, %v1169_v31  ;;  %1003 = vst.msk [vmem:[%s1841_s3 + $0x9c] sm:$0xf] %vm963_vm2, %v1201_v32  ;;  %v429_v38 = vadd.f32 %v1271_v36, %v1516_v34  ;;  %v557_v39 = vadd.f32 %v1303_v37, %v1516_v34  ;;  %v420_v40 = vpop.f32.mrb[9].mxu0  ;;  %v548_v41 = vpop.f32.mrb[9].mxu1 }
  0xeb   :  { %969 = vst.msk [vmem:[%s1841_s3 + $0x14] sm:$0xf] %vm963_vm2, %v1167_v33  ;;  %1001 = vst.msk [vmem:[%s1841_s3 + $0x94] sm:$0xf] %vm963_vm2, %v1199_v35  ;;  %v421_v42 = vadd.f32 %v1516_v34, %v420_v40  ;;  %v549_v43 = vadd.f32 %v1516_v34, %v548_v41  ;;  %v1272_v44 = vpop.f32.mrb[10].mxu0  ;;  %v1304_v45 = vpop.f32.mrb[10].mxu1 }
  0xec   :  { %v653_v46 = vmax.f32 %v429_v38, 0.0  ;;  %v685_v47 = vmax.f32 %v557_v39, 0.0  ;;  %v432_v48 = vadd.f32 %v1272_v44, %v1516_v34  ;;  %v560_v49 = vadd.f32 %v1304_v45, %v1516_v34  ;;  %v423_v50 = vpop.f32.mrb[11].mxu0  ;;  %v551_v51 = vpop.f32.mrb[11].mxu1 }
  0xed   :  { %v651_v52 = vmax.f32 %v421_v42, 0.0  ;;  %v683_v53 = vmax.f32 %v549_v43, 0.0  ;;  %v424_v54 = vadd.f32 %v1516_v34, %v423_v50  ;;  %v552_v55 = vadd.f32 %v1516_v34, %v551_v51 }
  0xee   :  { %v1172_v56 = vpack.c.bf16 %v653_v46, %v653_v46  ;;  %v1204_v57 = vpack.c.bf16 %v685_v47, %v685_v47  ;;  %v654_v58 = vmax.f32 %v432_v48, 0.0  ;;  %v686_v59 = vmax.f32 %v560_v49, 0.0 }
  0xef   :  { %v1170_v60 = vpack.c.bf16 %v651_v52, %v651_v52  ;;  %v1202_v61 = vpack.c.bf16 %v683_v53, %v683_v53  ;;  %v652_v62 = vmax.f32 %v424_v54, 0.0  ;;  %v684_v63 = vmax.f32 %v552_v55, 0.0 }
  0xf0   :  { %974 = vst.msk [vmem:[%s1841_s3 + $0x28] sm:$0xf] %vm963_vm2, %v1172_v56  ;;  %1006 = vst.msk [vmem:[%s1841_s3 + $0xa8] sm:$0xf] %vm963_vm2, %v1204_v57  ;;  %v1173_v0 = vpack.c.bf16 %v654_v58, %v654_v58  ;;  %v1205_v1 = vpack.c.bf16 %v686_v59, %v686_v59 }
  0xf1   :  { %972 = vst.msk [vmem:[%s1841_s3 + $0x20] sm:$0xf] %vm963_vm2, %v1170_v60  ;;  %1004 = vst.msk [vmem:[%s1841_s3 + $0xa0] sm:$0xf] %vm963_vm2, %v1202_v61  ;;  %v1171_v2 = vpack.c.bf16 %v652_v62, %v652_v62  ;;  %v1203_v3 = vpack.c.bf16 %v684_v63, %v684_v63  ;;  %v1275_v4 = vpop.f32.mrb[12].mxu0  ;;  %v1307_v5 = vpop.f32.mrb[12].mxu1 }
  0xf2   :  { %975 = vst.msk [vmem:[%s1841_s3 + $0x2c] sm:$0xf] %vm963_vm2, %v1173_v0  ;;  %1007 = vst.msk [vmem:[%s1841_s3 + $0xac] sm:$0xf] %vm963_vm2, %v1205_v1  ;;  %v445_v6 = vadd.f32 %v1275_v4, %v1516_v34  ;;  %v573_v7 = vadd.f32 %v1307_v5, %v1516_v34  ;;  %v436_v8 = vpop.f32.mrb[13].mxu0  ;;  %v564_v9 = vpop.f32.mrb[13].mxu1 }
  0xf3   :  { %973 = vst.msk [vmem:[%s1841_s3 + $0x24] sm:$0xf] %vm963_vm2, %v1171_v2  ;;  %1005 = vst.msk [vmem:[%s1841_s3 + $0xa4] sm:$0xf] %vm963_vm2, %v1203_v3  ;;  %v437_v10 = vadd.f32 %v1516_v34, %v436_v8  ;;  %v565_v11 = vadd.f32 %v1516_v34, %v564_v9  ;;  %v1276_v12 = vpop.f32.mrb[14].mxu0  ;;  %v1308_v13 = vpop.f32.mrb[14].mxu1 }
  0xf4   :  { %v657_v14 = vmax.f32 %v445_v6, 0.0  ;;  %v689_v15 = vmax.f32 %v573_v7, 0.0  ;;  %v448_v16 = vadd.f32 %v1276_v12, %v1516_v34  ;;  %v576_v17 = vadd.f32 %v1308_v13, %v1516_v34  ;;  %v439_v18 = vpop.f32.mrb[15].mxu0  ;;  %v567_v19 = vpop.f32.mrb[15].mxu1 }
  0xf5   :  { %v655_v20 = vmax.f32 %v437_v10, 0.0  ;;  %v687_v21 = vmax.f32 %v565_v11, 0.0  ;;  %v440_v22 = vadd.f32 %v1516_v34, %v439_v18  ;;  %v568_v23 = vadd.f32 %v1516_v34, %v567_v19 }
  0xf6   :  { %v1176_v24 = vpack.c.bf16 %v657_v14, %v657_v14  ;;  %v1208_v25 = vpack.c.bf16 %v689_v15, %v689_v15  ;;  %v658_v26 = vmax.f32 %v448_v16, 0.0  ;;  %v690_v27 = vmax.f32 %v576_v17, 0.0 }
  0xf7   :  { %v1174_v28 = vpack.c.bf16 %v655_v20, %v655_v20  ;;  %v1206_v29 = vpack.c.bf16 %v687_v21, %v687_v21  ;;  %v656_v30 = vmax.f32 %v440_v22, 0.0  ;;  %v688_v31 = vmax.f32 %v568_v23, 0.0 }
  0xf8   :  { %978 = vst.msk [vmem:[%s1841_s3 + $0x38] sm:$0xf] %vm963_vm2, %v1176_v24  ;;  %1010 = vst.msk [vmem:[%s1841_s3 + $0xb8] sm:$0xf] %vm963_vm2, %v1208_v25  ;;  %v1177_v32 = vpack.c.bf16 %v658_v26, %v658_v26  ;;  %v1209_v33 = vpack.c.bf16 %v690_v27, %v690_v27 }
  0xf9   :  { %976 = vst.msk [vmem:[%s1841_s3 + $0x30] sm:$0xf] %vm963_vm2, %v1174_v28  ;;  %1008 = vst.msk [vmem:[%s1841_s3 + $0xb0] sm:$0xf] %vm963_vm2, %v1206_v29  ;;  %v1175_v35 = vpack.c.bf16 %v656_v30, %v656_v30  ;;  %v1207_v36 = vpack.c.bf16 %v688_v31, %v688_v31  ;;  %v1279_v37 = vpop.f32.mrb[16].mxu0  ;;  %v1311_v38 = vpop.f32.mrb[16].mxu1 }
  0xfa   :  { %979 = vst.msk [vmem:[%s1841_s3 + $0x3c] sm:$0xf] %vm963_vm2, %v1177_v32  ;;  %1011 = vst.msk [vmem:[%s1841_s3 + $0xbc] sm:$0xf] %vm963_vm2, %v1209_v33  ;;  %v461_v39 = vadd.f32 %v1279_v37, %v1516_v34  ;;  %v589_v40 = vadd.f32 %v1311_v38, %v1516_v34  ;;  %v452_v41 = vpop.f32.mrb[17].mxu0  ;;  %v580_v42 = vpop.f32.mrb[17].mxu1 }
  0xfb   :  { %977 = vst.msk [vmem:[%s1841_s3 + $0x34] sm:$0xf] %vm963_vm2, %v1175_v35  ;;  %1009 = vst.msk [vmem:[%s1841_s3 + $0xb4] sm:$0xf] %vm963_vm2, %v1207_v36  ;;  %v453_v43 = vadd.f32 %v1516_v34, %v452_v41  ;;  %v581_v44 = vadd.f32 %v1516_v34, %v580_v42  ;;  %v1280_v45 = vpop.f32.mrb[18].mxu0  ;;  %v1312_v46 = vpop.f32.mrb[18].mxu1 }
  0xfc   :  { %v661_v47 = vmax.f32 %v461_v39, 0.0  ;;  %v693_v48 = vmax.f32 %v589_v40, 0.0  ;;  %v464_v49 = vadd.f32 %v1280_v45, %v1516_v34  ;;  %v592_v50 = vadd.f32 %v1312_v46, %v1516_v34  ;;  %v455_v51 = vpop.f32.mrb[19].mxu0  ;;  %v583_v52 = vpop.f32.mrb[19].mxu1 }
  0xfd   :  { %v659_v53 = vmax.f32 %v453_v43, 0.0  ;;  %v691_v54 = vmax.f32 %v581_v44, 0.0  ;;  %v456_v55 = vadd.f32 %v1516_v34, %v455_v51  ;;  %v584_v56 = vadd.f32 %v1516_v34, %v583_v52 }
  0xfe   :  { %v1180_v57 = vpack.c.bf16 %v661_v47, %v661_v47  ;;  %v1212_v58 = vpack.c.bf16 %v693_v48, %v693_v48  ;;  %v662_v59 = vmax.f32 %v464_v49, 0.0  ;;  %v694_v60 = vmax.f32 %v592_v50, 0.0 }
  0xff   :  { %v1178_v61 = vpack.c.bf16 %v659_v53, %v659_v53  ;;  %v1210_v62 = vpack.c.bf16 %v691_v54, %v691_v54  ;;  %v660_v63 = vmax.f32 %v456_v55, 0.0  ;;  %v692_v0 = vmax.f32 %v584_v56, 0.0 }
 0x100   :  { %982 = vst.msk [vmem:[%s1841_s3 + $0x48] sm:$0xf] %vm963_vm2, %v1180_v57  ;;  %1014 = vst.msk [vmem:[%s1841_s3 + $0xc8] sm:$0xf] %vm963_vm2, %v1212_v58  ;;  %v1181_v1 = vpack.c.bf16 %v662_v59, %v662_v59  ;;  %v1213_v2 = vpack.c.bf16 %v694_v60, %v694_v60 }
 0x101   :  { %980 = vst.msk [vmem:[%s1841_s3 + $0x40] sm:$0xf] %vm963_vm2, %v1178_v61  ;;  %1012 = vst.msk [vmem:[%s1841_s3 + $0xc0] sm:$0xf] %vm963_vm2, %v1210_v62  ;;  %v1179_v3 = vpack.c.bf16 %v660_v63, %v660_v63  ;;  %v1211_v4 = vpack.c.bf16 %v692_v0, %v692_v0  ;;  %v1283_v5 = vpop.f32.mrb[20].mxu0  ;;  %v1315_v6 = vpop.f32.mrb[20].mxu1 }
 0x102   :  { %983 = vst.msk [vmem:[%s1841_s3 + $0x4c] sm:$0xf] %vm963_vm2, %v1181_v1  ;;  %1015 = vst.msk [vmem:[%s1841_s3 + $0xcc] sm:$0xf] %vm963_vm2, %v1213_v2  ;;  %v477_v7 = vadd.f32 %v1283_v5, %v1516_v34  ;;  %v605_v8 = vadd.f32 %v1315_v6, %v1516_v34  ;;  %v468_v9 = vpop.f32.mrb[21].mxu0  ;;  %v596_v10 = vpop.f32.mrb[21].mxu1 }
 0x103   :  { %981 = vst.msk [vmem:[%s1841_s3 + $0x44] sm:$0xf] %vm963_vm2, %v1179_v3  ;;  %1013 = vst.msk [vmem:[%s1841_s3 + $0xc4] sm:$0xf] %vm963_vm2, %v1211_v4  ;;  %v469_v11 = vadd.f32 %v1516_v34, %v468_v9  ;;  %v597_v12 = vadd.f32 %v1516_v34, %v596_v10  ;;  %v1284_v13 = vpop.f32.mrb[22].mxu0  ;;  %v1316_v14 = vpop.f32.mrb[22].mxu1 }
 0x104   :  { %v665_v15 = vmax.f32 %v477_v7, 0.0  ;;  %v697_v16 = vmax.f32 %v605_v8, 0.0  ;;  %v480_v17 = vadd.f32 %v1284_v13, %v1516_v34  ;;  %v608_v18 = vadd.f32 %v1316_v14, %v1516_v34  ;;  %v471_v19 = vpop.f32.mrb[23].mxu0  ;;  %v599_v20 = vpop.f32.mrb[23].mxu1 }
 0x105   :  { %v663_v21 = vmax.f32 %v469_v11, 0.0  ;;  %v695_v22 = vmax.f32 %v597_v12, 0.0  ;;  %v472_v23 = vadd.f32 %v1516_v34, %v471_v19  ;;  %v600_v24 = vadd.f32 %v1516_v34, %v599_v20 }
 0x106   :  { %v1184_v25 = vpack.c.bf16 %v665_v15, %v665_v15  ;;  %v1216_v26 = vpack.c.bf16 %v697_v16, %v697_v16  ;;  %v666_v27 = vmax.f32 %v480_v17, 0.0  ;;  %v698_v28 = vmax.f32 %v608_v18, 0.0 }
 0x107   :  { %v1182_v29 = vpack.c.bf16 %v663_v21, %v663_v21  ;;  %v1214_v30 = vpack.c.bf16 %v695_v22, %v695_v22  ;;  %v664_v31 = vmax.f32 %v472_v23, 0.0  ;;  %v696_v32 = vmax.f32 %v600_v24, 0.0 }
 0x108   :  { %986 = vst.msk [vmem:[%s1841_s3 + $0x58] sm:$0xf] %vm963_vm2, %v1184_v25  ;;  %1018 = vst.msk [vmem:[%s1841_s3 + $0xd8] sm:$0xf] %vm963_vm2, %v1216_v26  ;;  %v1185_v33 = vpack.c.bf16 %v666_v27, %v666_v27  ;;  %v1217_v35 = vpack.c.bf16 %v698_v28, %v698_v28 }
 0x109   :  { %984 = vst.msk [vmem:[%s1841_s3 + $0x50] sm:$0xf] %vm963_vm2, %v1182_v29  ;;  %1016 = vst.msk [vmem:[%s1841_s3 + $0xd0] sm:$0xf] %vm963_vm2, %v1214_v30  ;;  %v1183_v36 = vpack.c.bf16 %v664_v31, %v664_v31  ;;  %v1215_v37 = vpack.c.bf16 %v696_v32, %v696_v32  ;;  %v1287_v38 = vpop.f32.mrb[24].mxu0  ;;  %v1319_v39 = vpop.f32.mrb[24].mxu1 }
 0x10a   :  { %987 = vst.msk [vmem:[%s1841_s3 + $0x5c] sm:$0xf] %vm963_vm2, %v1185_v33  ;;  %1019 = vst.msk [vmem:[%s1841_s3 + $0xdc] sm:$0xf] %vm963_vm2, %v1217_v35  ;;  %v493_v40 = vadd.f32 %v1287_v38, %v1516_v34  ;;  %v621_v41 = vadd.f32 %v1319_v39, %v1516_v34  ;;  %v484_v42 = vpop.f32.mrb[25].mxu0  ;;  %v612_v43 = vpop.f32.mrb[25].mxu1 }
 0x10b   :  { %985 = vst.msk [vmem:[%s1841_s3 + $0x54] sm:$0xf] %vm963_vm2, %v1183_v36  ;;  %1017 = vst.msk [vmem:[%s1841_s3 + $0xd4] sm:$0xf] %vm963_vm2, %v1215_v37  ;;  %v485_v44 = vadd.f32 %v1516_v34, %v484_v42  ;;  %v613_v45 = vadd.f32 %v1516_v34, %v612_v43  ;;  %v1288_v46 = vpop.f32.mrb[26].mxu0  ;;  %v1320_v47 = vpop.f32.mrb[26].mxu1 }
 0x10c   :  { %v669_v48 = vmax.f32 %v493_v40, 0.0  ;;  %v701_v49 = vmax.f32 %v621_v41, 0.0  ;;  %v496_v50 = vadd.f32 %v1288_v46, %v1516_v34  ;;  %v624_v51 = vadd.f32 %v1320_v47, %v1516_v34  ;;  %v487_v52 = vpop.f32.mrb[27].mxu0  ;;  %v615_v53 = vpop.f32.mrb[27].mxu1 }
 0x10d   :  { %v667_v54 = vmax.f32 %v485_v44, 0.0  ;;  %v699_v55 = vmax.f32 %v613_v45, 0.0  ;;  %v488_v56 = vadd.f32 %v1516_v34, %v487_v52  ;;  %v616_v57 = vadd.f32 %v1516_v34, %v615_v53 }
 0x10e   :  { %v1188_v58 = vpack.c.bf16 %v669_v48, %v669_v48  ;;  %v1220_v59 = vpack.c.bf16 %v701_v49, %v701_v49  ;;  %v670_v60 = vmax.f32 %v496_v50, 0.0  ;;  %v702_v61 = vmax.f32 %v624_v51, 0.0 }
 0x10f   :  { %v1186_v62 = vpack.c.bf16 %v667_v54, %v667_v54  ;;  %v1218_v63 = vpack.c.bf16 %v699_v55, %v699_v55  ;;  %v668_v0 = vmax.f32 %v488_v56, 0.0  ;;  %v700_v1 = vmax.f32 %v616_v57, 0.0 }
 0x110   :  { %990 = vst.msk [vmem:[%s1841_s3 + $0x68] sm:$0xf] %vm963_vm2, %v1188_v58  ;;  %1022 = vst.msk [vmem:[%s1841_s3 + $0xe8] sm:$0xf] %vm963_vm2, %v1220_v59  ;;  %v1189_v2 = vpack.c.bf16 %v670_v60, %v670_v60  ;;  %v1221_v3 = vpack.c.bf16 %v702_v61, %v702_v61 }
 0x111   :  { %988 = vst.msk [vmem:[%s1841_s3 + $0x60] sm:$0xf] %vm963_vm2, %v1186_v62  ;;  %1020 = vst.msk [vmem:[%s1841_s3 + $0xe0] sm:$0xf] %vm963_vm2, %v1218_v63  ;;  %v1187_v4 = vpack.c.bf16 %v668_v0, %v668_v0  ;;  %v1219_v5 = vpack.c.bf16 %v700_v1, %v700_v1  ;;  %v1291_v6 = vpop.f32.mrb[28].mxu0  ;;  %v1323_v7 = vpop.f32.mrb[28].mxu1 }
 0x112   :  { %991 = vst.msk [vmem:[%s1841_s3 + $0x6c] sm:$0xf] %vm963_vm2, %v1189_v2  ;;  %1023 = vst.msk [vmem:[%s1841_s3 + $0xec] sm:$0xf] %vm963_vm2, %v1221_v3  ;;  %v509_v8 = vadd.f32 %v1291_v6, %v1516_v34  ;;  %v637_v9 = vadd.f32 %v1323_v7, %v1516_v34  ;;  %v500_v10 = vpop.f32.mrb[29].mxu0  ;;  %v628_v11 = vpop.f32.mrb[29].mxu1 }
 0x113   :  { %989 = vst.msk [vmem:[%s1841_s3 + $0x64] sm:$0xf] %vm963_vm2, %v1187_v4  ;;  %1021 = vst.msk [vmem:[%s1841_s3 + $0xe4] sm:$0xf] %vm963_vm2, %v1219_v5  ;;  %v501_v12 = vadd.f32 %v1516_v34, %v500_v10  ;;  %v629_v13 = vadd.f32 %v1516_v34, %v628_v11  ;;  %v1292_v14 = vpop.f32.mrb[30].mxu0  ;;  %v1324_v15 = vpop.f32.mrb[30].mxu1 }
 0x114   :  { %v673_v16 = vmax.f32 %v509_v8, 0.0  ;;  %v705_v17 = vmax.f32 %v637_v9, 0.0  ;;  %v512_v18 = vadd.f32 %v1292_v14, %v1516_v34  ;;  %v640_v19 = vadd.f32 %v1324_v15, %v1516_v34  ;;  %v503_v20 = vpop.f32.mrb[31].mxu0  ;;  %v631_v21 = vpop.f32.mrb[31].mxu1 }
 0x115   :  { %v671_v22 = vmax.f32 %v501_v12, 0.0  ;;  %v703_v23 = vmax.f32 %v629_v13, 0.0  ;;  %v504_v24 = vadd.f32 %v1516_v34, %v503_v20  ;;  %v632_v25 = vadd.f32 %v1516_v34, %v631_v21 }
 0x116   :  { %v1192_v26 = vpack.c.bf16 %v673_v16, %v673_v16  ;;  %v1224_v27 = vpack.c.bf16 %v705_v17, %v705_v17  ;;  %v674_v28 = vmax.f32 %v512_v18, 0.0  ;;  %v706_v29 = vmax.f32 %v640_v19, 0.0 }
 0x117   :  { %v1190_v30 = vpack.c.bf16 %v671_v22, %v671_v22  ;;  %v1222_v31 = vpack.c.bf16 %v703_v23, %v703_v23  ;;  %v672_v32 = vmax.f32 %v504_v24, 0.0  ;;  %v704_v33 = vmax.f32 %v632_v25, 0.0 }
 0x118   :  { %994 = vst.msk [vmem:[%s1841_s3 + $0x78] sm:$0xf] %vm963_vm2, %v1192_v26  ;;  %1026 = vst.msk [vmem:[%s1841_s3 + $0xf8] sm:$0xf] %vm963_vm2, %v1224_v27  ;;  %v1193_v35 = vpack.c.bf16 %v674_v28, %v674_v28  ;;  %v1225_v34 = vpack.c.bf16 %v706_v29, %v706_v29 }
 0x119   :  { %992 = vst.msk [vmem:[%s1841_s3 + $0x70] sm:$0xf] %vm963_vm2, %v1190_v30  ;;  %1024 = vst.msk [vmem:[%s1841_s3 + $0xf0] sm:$0xf] %vm963_vm2, %v1222_v31  ;;  %v1191_v36 = vpack.c.bf16 %v672_v32, %v672_v32  ;;  %v1223_v37 = vpack.c.bf16 %v704_v33, %v704_v33 }
 0x11a   :  { %995 = vst.msk [vmem:[%s1841_s3 + $0x7c] sm:$0xf] %vm963_vm2, %v1193_v35  ;;  %1027 = vst.msk [vmem:[%s1841_s3 + $0xfc] sm:$0xf] %vm963_vm2, %v1225_v34 }
 0x11b   :  { %993 = vst.msk [vmem:[%s1841_s3 + $0x74] sm:$0xf] %vm963_vm2, %v1191_v36  ;;  %1025 = vst.msk [vmem:[%s1841_s3 + $0xf4] sm:$0xf] %vm963_vm2, %v1223_v37 }

// kernel: slowfast_forward.16
= control target key start
LH: loop header
LB: loop body
LE: loop exit
PB: predicated region body
PF: predicated region fallthrough
CT: control target
= control target key end

     0   :  { %vm102_vm0 = vcmask 392192   ;;  %vm304_vm1 = vcmask 519168   ;;  %s555_s1 = inlined_call_operand.vmem [shape: bf16[48,64], index: 1, kind: input, shape index: {}]   ;;  %s556_s0 = inlined_call_operand.vmem [shape: bf16[128,48], index: 0, kind: input, shape index: {}]   ;;  %s557_s2 = inlined_call_operand.vmem [shape: f32[1,64], index: 2, kind: input, shape index: {}]   ;;  %s558_s3 = inlined_call_operand.vmem [shape: bf16[128,64], index: 3, kind: output, shape index: {}]  }
   0x1   :  { %v416_v0 = vld [vmem:[%s555_s1] sm:$0xff]   ;;  %v417_v1 = vld [vmem:[%s555_s1 + $0x8] sm:$0xff]   ;;  %v418_v2 = vld [vmem:[%s555_s1 + $0x10] sm:$0xff]  }
   0x2   :  { %388 = vmatprep.subr.bf16.mxu0 %v416_v0  ;;  %410 = vmatprep.subr.bf16.mxu1 %v416_v0  ;;  %v419_v3 = vld [vmem:[%s556_s0] sm:$0xff]   ;;  %v421_v5 = vld [vmem:[%s556_s0 + $0x8] sm:$0xff]   ;;  %v423_v7 = vld [vmem:[%s556_s0 + $0x10] sm:$0xff]  }
   0x3   :  { %389 = vmatpush3.bf16.msra.mxu0 %v416_v0  ;;  %413 = vmatpush3.bf16.msra.mxu1 %v416_v0  ;;  %v420_v4 = vld [vmem:[%s556_s0 + $0x20] sm:$0xff]   ;;  %v422_v6 = vld [vmem:[%s556_s0 + $0x28] sm:$0xff]   ;;  %v424_v8 = vld [vmem:[%s556_s0 + $0x30] sm:$0xff]  }
   0x4   :  { %390 = vmatprep.subr.bf16.mxu0 %v417_v1  ;;  %411 = vmatprep.subr.bf16.mxu1 %v417_v1  ;;  %v425_v9 = vld [vmem:[%s556_s0 + $0x18] sm:$0xff]   ;;  %v325_v11 = vld [vmem:[%s557_s2] ss:$0 sm:$0xff] }
   0x5   :  { %394 = vmatprep.mubr.msk.bf16.mxu0 %vm102_vm0, %v419_v3  ;;  %402 = vmatprep.mubr.msk.bf16.mxu1 %vm102_vm0, %v420_v4  ;;  %v426_v10 = vld [vmem:[%s556_s0 + $0x38] sm:$0xff]  }
   0x7   :  { %391 = vmatpush3.bf16.msra.mxu0 %v417_v1  ;;  %414 = vmatpush3.bf16.msra.mxu1 %v417_v1 }
   0x8   :  { %392 = vmatprep.subr.bf16.mxu0 %v418_v2  ;;  %412 = vmatprep.subr.bf16.mxu1 %v418_v2 }
   0xb   :  { %393 = vmatpush3.bf16.msra.mxu0 %v418_v2  ;;  %415 = vmatpush3.bf16.msra.mxu1 %v418_v2 }
   0xe   :  { %395 = vmatmul.mubr.msk.bf16.vlgmr.msra.gmra.mrb[0].mxu0 %vm102_vm0, %v421_v5  ;;  %403 = vmatmul.mubr.msk.bf16.vlgmr.msra.gmra.mrb[0].mxu1 %vm102_vm0, %v422_v6 }
   0xf   :  { %398 = vmatprep.mubr.msk.bf16.mxu0 %vm102_vm0, %v423_v7  ;;  %406 = vmatprep.mubr.msk.bf16.mxu1 %vm102_vm0, %v424_v8 }
  0x16   :  { %399 = vmatmul.mubr.msk.bf16.gmra.mrb[4].mxu0 %vm102_vm0, %v425_v9  ;;  %407 = vmatmul.mubr.msk.bf16.gmra.mrb[4].mxu1 %vm102_vm0, %v426_v10 }
  0xe1   :  { %v396_v12 = vpop.f32.mrb[0].mxu0  ;;  %v404_v13 = vpop.f32.mrb[0].mxu1 }
  0xe2   :  { %v170_v14 = vadd.f32 %v396_v12, %v325_v11  ;;  %v202_v15 = vadd.f32 %v404_v13, %v325_v11  ;;  %v161_v16 = vpop.f32.mrb[1].mxu0  ;;  %v193_v17 = vpop.f32.mrb[1].mxu1 }
  0xe3   :  { %v162_v18 = vadd.f32 %v325_v11, %v161_v16  ;;  %v194_v19 = vadd.f32 %v325_v11, %v193_v17  ;;  %v397_v20 = vpop.f32.mrb[2].mxu0  ;;  %v405_v21 = vpop.f32.mrb[2].mxu1 }
  0xe4   :  { %v226_v22 = vmax.f32 %v170_v14, 0.0  ;;  %v234_v23 = vmax.f32 %v202_v15, 0.0  ;;  %v173_v24 = vadd.f32 %v397_v20, %v325_v11  ;;  %v205_v25 = vadd.f32 %v405_v21, %v325_v11  ;;  %v164_v26 = vpop.f32.mrb[3].mxu0  ;;  %v196_v27 = vpop.f32.mrb[3].mxu1 }
  0xe5   :  { %v224_v28 = vmax.f32 %v162_v18, 0.0  ;;  %v232_v29 = vmax.f32 %v194_v19, 0.0  ;;  %v165_v30 = vadd.f32 %v325_v11, %v164_v26  ;;  %v197_v31 = vadd.f32 %v325_v11, %v196_v27 }
  0xe6   :  { %v363_v32 = vpack.c.bf16 %v226_v22, %v226_v22  ;;  %v371_v33 = vpack.c.bf16 %v234_v23, %v234_v23  ;;  %v227_v34 = vmax.f32 %v173_v24, 0.0  ;;  %v235_v35 = vmax.f32 %v205_v25, 0.0 }
  0xe7   :  { %v361_v36 = vpack.c.bf16 %v224_v28, %v224_v28  ;;  %v369_v37 = vpack.c.bf16 %v232_v29, %v232_v29  ;;  %v225_v38 = vmax.f32 %v165_v30, 0.0  ;;  %v233_v39 = vmax.f32 %v197_v31, 0.0 }
  0xe8   :  { %307 = vst.msk [vmem:[%s558_s3 + $0x8] sm:$0xf] %vm304_vm1, %v363_v32  ;;  %315 = vst.msk [vmem:[%s558_s3 + $0x28] sm:$0xf] %vm304_vm1, %v371_v33  ;;  %v364_v40 = vpack.c.bf16 %v227_v34, %v227_v34  ;;  %v372_v41 = vpack.c.bf16 %v235_v35, %v235_v35 }
  0xe9   :  { %305 = vst.msk [vmem:[%s558_s3] sm:$0xf] %vm304_vm1, %v361_v36  ;;  %313 = vst.msk [vmem:[%s558_s3 + $0x20] sm:$0xf] %vm304_vm1, %v369_v37  ;;  %v362_v42 = vpack.c.bf16 %v225_v38, %v225_v38  ;;  %v370_v43 = vpack.c.bf16 %v233_v39, %v233_v39  ;;  %v400_v44 = vpop.f32.mrb[4].mxu0  ;;  %v408_v45 = vpop.f32.mrb[4].mxu1 }
  0xea   :  { %308 = vst.msk [vmem:[%s558_s3 + $0xc] sm:$0xf] %vm304_vm1, %v364_v40  ;;  %316 = vst.msk [vmem:[%s558_s3 + $0x2c] sm:$0xf] %vm304_vm1, %v372_v41  ;;  %v186_v46 = vadd.f32 %v400_v44, %v325_v11  ;;  %v218_v47 = vadd.f32 %v408_v45, %v325_v11  ;;  %v177_v48 = vpop.f32.mrb[5].mxu0  ;;  %v209_v49 = vpop.f32.mrb[5].mxu1 }
  0xeb   :  { %306 = vst.msk [vmem:[%s558_s3 + $0x4] sm:$0xf] %vm304_vm1, %v362_v42  ;;  %314 = vst.msk [vmem:[%s558_s3 + $0x24] sm:$0xf] %vm304_vm1, %v370_v43  ;;  %v178_v50 = vadd.f32 %v325_v11, %v177_v48  ;;  %v210_v51 = vadd.f32 %v325_v11, %v209_v49  ;;  %v401_v52 = vpop.f32.mrb[6].mxu0  ;;  %v409_v53 = vpop.f32.mrb[6].mxu1 }
  0xec   :  { %v230_v54 = vmax.f32 %v186_v46, 0.0  ;;  %v238_v55 = vmax.f32 %v218_v47, 0.0  ;;  %v189_v56 = vadd.f32 %v401_v52, %v325_v11  ;;  %v221_v57 = vadd.f32 %v409_v53, %v325_v11  ;;  %v180_v58 = vpop.f32.mrb[7].mxu0  ;;  %v212_v59 = vpop.f32.mrb[7].mxu1 }
  0xed   :  { %v228_v60 = vmax.f32 %v178_v50, 0.0  ;;  %v236_v61 = vmax.f32 %v210_v51, 0.0  ;;  %v181_v62 = vadd.f32 %v325_v11, %v180_v58  ;;  %v213_v63 = vadd.f32 %v325_v11, %v212_v59 }
  0xee   :  { %v367_v0 = vpack.c.bf16 %v230_v54, %v230_v54  ;;  %v375_v1 = vpack.c.bf16 %v238_v55, %v238_v55  ;;  %v231_v2 = vmax.f32 %v189_v56, 0.0  ;;  %v239_v3 = vmax.f32 %v221_v57, 0.0 }
  0xef   :  { %v365_v4 = vpack.c.bf16 %v228_v60, %v228_v60  ;;  %v373_v5 = vpack.c.bf16 %v236_v61, %v236_v61  ;;  %v229_v6 = vmax.f32 %v181_v62, 0.0  ;;  %v237_v7 = vmax.f32 %v213_v63, 0.0 }
  0xf0   :  { %311 = vst.msk [vmem:[%s558_s3 + $0x18] sm:$0xf] %vm304_vm1, %v367_v0  ;;  %319 = vst.msk [vmem:[%s558_s3 + $0x38] sm:$0xf] %vm304_vm1, %v375_v1  ;;  %v368_v8 = vpack.c.bf16 %v231_v2, %v231_v2  ;;  %v376_v9 = vpack.c.bf16 %v239_v3, %v239_v3 }
  0xf1   :  { %309 = vst.msk [vmem:[%s558_s3 + $0x10] sm:$0xf] %vm304_vm1, %v365_v4  ;;  %317 = vst.msk [vmem:[%s558_s3 + $0x30] sm:$0xf] %vm304_vm1, %v373_v5  ;;  %v366_v10 = vpack.c.bf16 %v229_v6, %v229_v6  ;;  %v374_v11 = vpack.c.bf16 %v237_v7, %v237_v7 }
  0xf2   :  { %312 = vst.msk [vmem:[%s558_s3 + $0x1c] sm:$0xf] %vm304_vm1, %v368_v8  ;;  %320 = vst.msk [vmem:[%s558_s3 + $0x3c] sm:$0xf] %vm304_vm1, %v376_v9 }
  0xf3   :  { %310 = vst.msk [vmem:[%s558_s3 + $0x14] sm:$0xf] %vm304_vm1, %v366_v10  ;;  %318 = vst.msk [vmem:[%s558_s3 + $0x34] sm:$0xf] %vm304_vm1, %v374_v11 }

// kernel: slowfast_forward.17
= control target key start
LH: loop header
LB: loop body
LE: loop exit
PB: predicated region body
PF: predicated region fallthrough
CT: control target
= control target key end

     0   :  { %vm344_vm0 = vcmask 1043456   ;;  %vm247_vm1 = vcmask 64512   ;;  %vm957_vm2 = vcmask 125952   ;;  %s1830_s1 = inlined_call_operand.vmem [shape: bf16[8,16], index: 1, kind: input, shape index: {}]   ;;  %s1831_s0 = inlined_call_operand.vmem [shape: bf16[512,8], index: 0, kind: input, shape index: {}]   ;;  %s1832_s2 = inlined_call_operand.vmem [shape: f32[1,16], index: 2, kind: input, shape index: {}]   ;;  %s1833_s3 = inlined_call_operand.vmem [shape: bf16[512,16], index: 3, kind: output, shape index: {}]  }
   0x1   :  { %v79_v0 = vld [vmem:[%s1830_s1] sm:$0xf]  ;;  %v1324_v4 = vld [vmem:[%s1831_s0 + $0x8] sm:$0xff]   ;;  %v1326_v6 = vld [vmem:[%s1831_s0 + $0x10] sm:$0xff]  }
   0x2   :  { %1320 = vmatprep.subr.msk.bf16.mxu0 %vm344_vm0, %v79_v0  ;;  %1321 = vmatprep.subr.msk.bf16.mxu1 %vm344_vm0, %v79_v0  ;;  %v346_v1 = vsel %vm344_vm0, %v79_v0, 0  ;;  %v1322_v2 = vld [vmem:[%s1831_s0] sm:$0xff]   ;;  %v1325_v5 = vld [vmem:[%s1831_s0 + $0x88] sm:$0xff]   ;;  %v1327_v7 = vld [vmem:[%s1831_s0 + $0x90] sm:$0xff]  }
   0x3   :  { %1253 = vmatpush3.bf16.msra.mxu0 %v346_v1  ;;  %1319 = vmatpush3.bf16.msra.mxu1 %v346_v1  ;;  %v1323_v3 = vld [vmem:[%s1831_s0 + $0x80] sm:$0xff]   ;;  %v1328_v8 = vld [vmem:[%s1831_s0 + $0x18] sm:$0xff]   ;;  %v1332_v12 = vld [vmem:[%s1831_s0 + $0x28] sm:$0xff]  }
   0x4   :  { %1254 = vmatprep.mubr.msk.bf16.mxu0 %vm247_vm1, %v1322_v2  ;;  %1286 = vmatprep.mubr.msk.bf16.mxu1 %vm247_vm1, %v1323_v3  ;;  %v1329_v9 = vld [vmem:[%s1831_s0 + $0x98] sm:$0xff]   ;;  %v1330_v10 = vld [vmem:[%s1831_s0 + $0x20] sm:$0xff]   ;;  %v1333_v13 = vld [vmem:[%s1831_s0 + $0xa8] sm:$0xff]  }
   0x5   :  { %v1331_v11 = vld [vmem:[%s1831_s0 + $0xa0] sm:$0xff]   ;;  %v1334_v14 = vld [vmem:[%s1831_s0 + $0x30] sm:$0xff]   ;;  %v1336_v16 = vld [vmem:[%s1831_s0 + $0x38] sm:$0xff]  }
   0x6   :  { %1255 = vmatmul.mubr.msk.bf16.vlgmr.msra.gmra.mrb[0].mxu0 %vm247_vm1, %v1324_v4  ;;  %1287 = vmatmul.mubr.msk.bf16.vlgmr.msra.gmra.mrb[0].mxu1 %vm247_vm1, %v1325_v5  ;;  %v1335_v15 = vld [vmem:[%s1831_s0 + $0xb0] sm:$0xff]   ;;  %v1337_v17 = vld [vmem:[%s1831_s0 + $0xb8] sm:$0xff]   ;;  %v1338_v18 = vld [vmem:[%s1831_s0 + $0x40] sm:$0xff]  }
   0x7   :  { %1258 = vmatprep.mubr.msk.bf16.mxu0 %vm247_vm1, %v1326_v6  ;;  %1290 = vmatprep.mubr.msk.bf16.mxu1 %vm247_vm1, %v1327_v7  ;;  %v1339_v19 = vld [vmem:[%s1831_s0 + $0xc0] sm:$0xff]   ;;  %v1340_v20 = vld [vmem:[%s1831_s0 + $0x48] sm:$0xff]   ;;  %v1342_v22 = vld [vmem:[%s1831_s0 + $0x50] sm:$0xff]  }
   0x8   :  { %v1341_v21 = vld [vmem:[%s1831_s0 + $0xc8] sm:$0xff]   ;;  %v1343_v23 = vld [vmem:[%s1831_s0 + $0xd0] sm:$0xff]   ;;  %v1344_v24 = vld [vmem:[%s1831_s0 + $0x58] sm:$0xff]  }
   0x9   :  { %v1345_v25 = vld [vmem:[%s1831_s0 + $0xd8] sm:$0xff]   ;;  %v1346_v26 = vld [vmem:[%s1831_s0 + $0x60] sm:$0xff]   ;;  %v1348_v28 = vld [vmem:[%s1831_s0 + $0x68] sm:$0xff]  }
   0xa   :  { %v1347_v27 = vld [vmem:[%s1831_s0 + $0xe0] sm:$0xff]   ;;  %v1349_v29 = vld [vmem:[%s1831_s0 + $0xe8] sm:$0xff]   ;;  %v1350_v30 = vld [vmem:[%s1831_s0 + $0x70] sm:$0xff]  }
   0xb   :  { %v1351_v31 = vld [vmem:[%s1831_s0 + $0xf0] sm:$0xff]   ;;  %v1352_v32 = vld [vmem:[%s1831_s0 + $0x78] sm:$0xff]   ;;  %v1508_v34 = vld [vmem:[%s1832_s2] ss:$0 sm:$0xff] }
   0xc   :  { %v1353_v33 = vld [vmem:[%s1831_s0 + $0xf8] sm:$0xff]  }
   0xe   :  { %1259 = vmatmul.mubr.msk.bf16.gmra.mrb[4].mxu0 %vm247_vm1, %v1328_v8  ;;  %1291 = vmatmul.mubr.msk.bf16.gmra.mrb[4].mxu1 %vm247_vm1, %v1329_v9 }
   0xf   :  { %1262 = vmatprep.mubr.msk.bf16.mxu0 %vm247_vm1, %v1330_v10  ;;  %1294 = vmatprep.mubr.msk.bf16.mxu1 %vm247_vm1, %v1331_v11 }
  0x16   :  { %1263 = vmatmul.mubr.msk.bf16.gmra.mrb[8].mxu0 %vm247_vm1, %v1332_v12  ;;  %1295 = vmatmul.mubr.msk.bf16.gmra.mrb[8].mxu1 %vm247_vm1, %v1333_v13 }
  0x17   :  { %1266 = vmatprep.mubr.msk.bf16.mxu0 %vm247_vm1, %v1334_v14  ;;  %1298 = vmatprep.mubr.msk.bf16.mxu1 %vm247_vm1, %v1335_v15 }
  0x1e   :  { %1267 = vmatmul.mubr.msk.bf16.gmra.mrb[12].mxu0 %vm247_vm1, %v1336_v16  ;;  %1299 = vmatmul.mubr.msk.bf16.gmra.mrb[12].mxu1 %vm247_vm1, %v1337_v17 }
  0x1f   :  { %1270 = vmatprep.mubr.msk.bf16.mxu0 %vm247_vm1, %v1338_v18  ;;  %1302 = vmatprep.mubr.msk.bf16.mxu1 %vm247_vm1, %v1339_v19 }
  0x26   :  { %1271 = vmatmul.mubr.msk.bf16.gmra.mrb[16].mxu0 %vm247_vm1, %v1340_v20  ;;  %1303 = vmatmul.mubr.msk.bf16.gmra.mrb[16].mxu1 %vm247_vm1, %v1341_v21 }
  0x27   :  { %1274 = vmatprep.mubr.msk.bf16.mxu0 %vm247_vm1, %v1342_v22  ;;  %1306 = vmatprep.mubr.msk.bf16.mxu1 %vm247_vm1, %v1343_v23 }
  0x2e   :  { %1275 = vmatmul.mubr.msk.bf16.gmra.mrb[20].mxu0 %vm247_vm1, %v1344_v24  ;;  %1307 = vmatmul.mubr.msk.bf16.gmra.mrb[20].mxu1 %vm247_vm1, %v1345_v25 }
  0x2f   :  { %1278 = vmatprep.mubr.msk.bf16.mxu0 %vm247_vm1, %v1346_v26  ;;  %1310 = vmatprep.mubr.msk.bf16.mxu1 %vm247_vm1, %v1347_v27 }
  0x36   :  { %1279 = vmatmul.mubr.msk.bf16.gmra.mrb[24].mxu0 %vm247_vm1, %v1348_v28  ;;  %1311 = vmatmul.mubr.msk.bf16.gmra.mrb[24].mxu1 %vm247_vm1, %v1349_v29 }
  0x37   :  { %1282 = vmatprep.mubr.msk.bf16.mxu0 %vm247_vm1, %v1350_v30  ;;  %1314 = vmatprep.mubr.msk.bf16.mxu1 %vm247_vm1, %v1351_v31 }
  0x3e   :  { %1283 = vmatmul.mubr.msk.bf16.gmra.mrb[28].mxu0 %vm247_vm1, %v1352_v32  ;;  %1315 = vmatmul.mubr.msk.bf16.gmra.mrb[28].mxu1 %vm247_vm1, %v1353_v33 }
  0xd9   :  { %v1256_v35 = vpop.f32.mrb[0].mxu0  ;;  %v1288_v37 = vpop.f32.mrb[0].mxu1 }
  0xda   :  { %v391_v36 = vadd.f32 %v1256_v35, %v1508_v34  ;;  %v382_v38 = vpop.f32.mrb[1].mxu0  ;;  %v519_v39 = vadd.f32 %v1288_v37, %v1508_v34  ;;  %v510_v41 = vpop.f32.mrb[1].mxu1 }
  0xdb   :  { %v383_v40 = vadd.f32 %v1508_v34, %v382_v38  ;;  %v1257_v42 = vpop.f32.mrb[2].mxu0  ;;  %v511_v44 = vadd.f32 %v1508_v34, %v510_v41  ;;  %v1289_v46 = vpop.f32.mrb[2].mxu1 }
  0xdc   :  { %v639_v43 = vmax.f32 %v391_v36, 0.0  ;;  %v394_v45 = vadd.f32 %v1257_v42, %v1508_v34  ;;  %v385_v47 = vpop.f32.mrb[3].mxu0  ;;  %v671_v48 = vmax.f32 %v519_v39, 0.0  ;;  %v522_v50 = vadd.f32 %v1289_v46, %v1508_v34  ;;  %v513_v52 = vpop.f32.mrb[3].mxu1 }
  0xdd   :  { %v637_v49 = vmax.f32 %v383_v40, 0.0  ;;  %v386_v51 = vadd.f32 %v1508_v34, %v385_v47  ;;  %v669_v54 = vmax.f32 %v511_v44, 0.0  ;;  %v514_v56 = vadd.f32 %v1508_v34, %v513_v52 }
  0xde   :  { %v1157_v53 = vpack.c.bf16 %v639_v43, %v639_v43  ;;  %v640_v55 = vmax.f32 %v394_v45, 0.0  ;;  %v1189_v57 = vpack.c.bf16 %v671_v48, %v671_v48  ;;  %v672_v59 = vmax.f32 %v522_v50, 0.0 }
  0xdf   :  { %v1155_v58 = vpack.c.bf16 %v637_v49, %v637_v49  ;;  %v638_v60 = vmax.f32 %v386_v51, 0.0  ;;  %v1187_v61 = vpack.c.bf16 %v669_v54, %v669_v54  ;;  %v670_v63 = vmax.f32 %v514_v56, 0.0 }
  0xe0   :  { %960 = vst.msk [vmem:[%s1833_s3 + $0x8] sm:$0xf] %vm957_vm2, %v1157_v53  ;;  %v1158_v62 = vpack.c.bf16 %v640_v55, %v640_v55  ;;  %992 = vst.msk [vmem:[%s1833_s3 + $0x88] sm:$0xf] %vm957_vm2, %v1189_v57  ;;  %v1190_v0 = vpack.c.bf16 %v672_v59, %v672_v59 }
  0xe1   :  { %958 = vst.msk [vmem:[%s1833_s3] sm:$0xf] %vm957_vm2, %v1155_v58  ;;  %v1156_v1 = vpack.c.bf16 %v638_v60, %v638_v60  ;;  %v1260_v2 = vpop.f32.mrb[4].mxu0  ;;  %990 = vst.msk [vmem:[%s1833_s3 + $0x80] sm:$0xf] %vm957_vm2, %v1187_v61  ;;  %v1188_v3 = vpack.c.bf16 %v670_v63, %v670_v63  ;;  %v1292_v5 = vpop.f32.mrb[4].mxu1 }
  0xe2   :  { %961 = vst.msk [vmem:[%s1833_s3 + $0xc] sm:$0xf] %vm957_vm2, %v1158_v62  ;;  %v407_v4 = vadd.f32 %v1260_v2, %v1508_v34  ;;  %v398_v6 = vpop.f32.mrb[5].mxu0  ;;  %993 = vst.msk [vmem:[%s1833_s3 + $0x8c] sm:$0xf] %vm957_vm2, %v1190_v0  ;;  %v535_v7 = vadd.f32 %v1292_v5, %v1508_v34  ;;  %v526_v9 = vpop.f32.mrb[5].mxu1 }
  0xe3   :  { %959 = vst.msk [vmem:[%s1833_s3 + $0x4] sm:$0xf] %vm957_vm2, %v1156_v1  ;;  %v399_v8 = vadd.f32 %v1508_v34, %v398_v6  ;;  %v1261_v10 = vpop.f32.mrb[6].mxu0  ;;  %991 = vst.msk [vmem:[%s1833_s3 + $0x84] sm:$0xf] %vm957_vm2, %v1188_v3  ;;  %v527_v12 = vadd.f32 %v1508_v34, %v526_v9  ;;  %v1293_v14 = vpop.f32.mrb[6].mxu1 }
  0xe4   :  { %v643_v11 = vmax.f32 %v407_v4, 0.0  ;;  %v410_v13 = vadd.f32 %v1261_v10, %v1508_v34  ;;  %v401_v15 = vpop.f32.mrb[7].mxu0  ;;  %v675_v16 = vmax.f32 %v535_v7, 0.0  ;;  %v538_v18 = vadd.f32 %v1293_v14, %v1508_v34  ;;  %v529_v20 = vpop.f32.mrb[7].mxu1 }
  0xe5   :  { %v641_v17 = vmax.f32 %v399_v8, 0.0  ;;  %v402_v19 = vadd.f32 %v1508_v34, %v401_v15  ;;  %v673_v22 = vmax.f32 %v527_v12, 0.0  ;;  %v530_v24 = vadd.f32 %v1508_v34, %v529_v20 }
  0xe6   :  { %v1161_v21 = vpack.c.bf16 %v643_v11, %v643_v11  ;;  %v644_v23 = vmax.f32 %v410_v13, 0.0  ;;  %v1193_v25 = vpack.c.bf16 %v675_v16, %v675_v16  ;;  %v676_v27 = vmax.f32 %v538_v18, 0.0 }
  0xe7   :  { %v1159_v26 = vpack.c.bf16 %v641_v17, %v641_v17  ;;  %v642_v28 = vmax.f32 %v402_v19, 0.0  ;;  %v1191_v29 = vpack.c.bf16 %v673_v22, %v673_v22  ;;  %v674_v31 = vmax.f32 %v530_v24, 0.0 }
  0xe8   :  { %964 = vst.msk [vmem:[%s1833_s3 + $0x18] sm:$0xf] %vm957_vm2, %v1161_v21  ;;  %v1162_v30 = vpack.c.bf16 %v644_v23, %v644_v23  ;;  %996 = vst.msk [vmem:[%s1833_s3 + $0x98] sm:$0xf] %vm957_vm2, %v1193_v25  ;;  %v1194_v32 = vpack.c.bf16 %v676_v27, %v676_v27 }
  0xe9   :  { %962 = vst.msk [vmem:[%s1833_s3 + $0x10] sm:$0xf] %vm957_vm2, %v1159_v26  ;;  %v1160_v33 = vpack.c.bf16 %v642_v28, %v642_v28  ;;  %v1264_v35 = vpop.f32.mrb[8].mxu0  ;;  %994 = vst.msk [vmem:[%s1833_s3 + $0x90] sm:$0xf] %vm957_vm2, %v1191_v29  ;;  %v1192_v36 = vpack.c.bf16 %v674_v31, %v674_v31  ;;  %v1296_v38 = vpop.f32.mrb[8].mxu1 }
  0xea   :  { %965 = vst.msk [vmem:[%s1833_s3 + $0x1c] sm:$0xf] %vm957_vm2, %v1162_v30  ;;  %v423_v37 = vadd.f32 %v1264_v35, %v1508_v34  ;;  %v414_v39 = vpop.f32.mrb[9].mxu0  ;;  %997 = vst.msk [vmem:[%s1833_s3 + $0x9c] sm:$0xf] %vm957_vm2, %v1194_v32  ;;  %v551_v40 = vadd.f32 %v1296_v38, %v1508_v34  ;;  %v542_v42 = vpop.f32.mrb[9].mxu1 }
  0xeb   :  { %963 = vst.msk [vmem:[%s1833_s3 + $0x14] sm:$0xf] %vm957_vm2, %v1160_v33  ;;  %v415_v41 = vadd.f32 %v1508_v34, %v414_v39  ;;  %v1265_v43 = vpop.f32.mrb[10].mxu0  ;;  %995 = vst.msk [vmem:[%s1833_s3 + $0x94] sm:$0xf] %vm957_vm2, %v1192_v36  ;;  %v543_v45 = vadd.f32 %v1508_v34, %v542_v42  ;;  %v1297_v47 = vpop.f32.mrb[10].mxu1 }
  0xec   :  { %v647_v44 = vmax.f32 %v423_v37, 0.0  ;;  %v426_v46 = vadd.f32 %v1265_v43, %v1508_v34  ;;  %v417_v48 = vpop.f32.mrb[11].mxu0  ;;  %v679_v49 = vmax.f32 %v551_v40, 0.0  ;;  %v554_v51 = vadd.f32 %v1297_v47, %v1508_v34  ;;  %v545_v53 = vpop.f32.mrb[11].mxu1 }
  0xed   :  { %v645_v50 = vmax.f32 %v415_v41, 0.0  ;;  %v418_v52 = vadd.f32 %v1508_v34, %v417_v48  ;;  %v677_v55 = vmax.f32 %v543_v45, 0.0  ;;  %v546_v57 = vadd.f32 %v1508_v34, %v545_v53 }
  0xee   :  { %v1165_v54 = vpack.c.bf16 %v647_v44, %v647_v44  ;;  %v648_v56 = vmax.f32 %v426_v46, 0.0  ;;  %v1197_v58 = vpack.c.bf16 %v679_v49, %v679_v49  ;;  %v680_v60 = vmax.f32 %v554_v51, 0.0 }
  0xef   :  { %v1163_v59 = vpack.c.bf16 %v645_v50, %v645_v50  ;;  %v646_v61 = vmax.f32 %v418_v52, 0.0  ;;  %v1195_v62 = vpack.c.bf16 %v677_v55, %v677_v55  ;;  %v678_v0 = vmax.f32 %v546_v57, 0.0 }
  0xf0   :  { %968 = vst.msk [vmem:[%s1833_s3 + $0x28] sm:$0xf] %vm957_vm2, %v1165_v54  ;;  %v1166_v63 = vpack.c.bf16 %v648_v56, %v648_v56  ;;  %1000 = vst.msk [vmem:[%s1833_s3 + $0xa8] sm:$0xf] %vm957_vm2, %v1197_v58  ;;  %v1198_v1 = vpack.c.bf16 %v680_v60, %v680_v60 }
  0xf1   :  { %966 = vst.msk [vmem:[%s1833_s3 + $0x20] sm:$0xf] %vm957_vm2, %v1163_v59  ;;  %v1164_v2 = vpack.c.bf16 %v646_v61, %v646_v61  ;;  %v1268_v3 = vpop.f32.mrb[12].mxu0  ;;  %998 = vst.msk [vmem:[%s1833_s3 + $0xa0] sm:$0xf] %vm957_vm2, %v1195_v62  ;;  %v1196_v4 = vpack.c.bf16 %v678_v0, %v678_v0  ;;  %v1300_v6 = vpop.f32.mrb[12].mxu1 }
  0xf2   :  { %969 = vst.msk [vmem:[%s1833_s3 + $0x2c] sm:$0xf] %vm957_vm2, %v1166_v63  ;;  %v439_v5 = vadd.f32 %v1268_v3, %v1508_v34  ;;  %v430_v7 = vpop.f32.mrb[13].mxu0  ;;  %1001 = vst.msk [vmem:[%s1833_s3 + $0xac] sm:$0xf] %vm957_vm2, %v1198_v1  ;;  %v567_v8 = vadd.f32 %v1300_v6, %v1508_v34  ;;  %v558_v10 = vpop.f32.mrb[13].mxu1 }
  0xf3   :  { %967 = vst.msk [vmem:[%s1833_s3 + $0x24] sm:$0xf] %vm957_vm2, %v1164_v2  ;;  %v431_v9 = vadd.f32 %v1508_v34, %v430_v7  ;;  %v1269_v11 = vpop.f32.mrb[14].mxu0  ;;  %999 = vst.msk [vmem:[%s1833_s3 + $0xa4] sm:$0xf] %vm957_vm2, %v1196_v4  ;;  %v559_v13 = vadd.f32 %v1508_v34, %v558_v10  ;;  %v1301_v15 = vpop.f32.mrb[14].mxu1 }
  0xf4   :  { %v651_v12 = vmax.f32 %v439_v5, 0.0  ;;  %v442_v14 = vadd.f32 %v1269_v11, %v1508_v34  ;;  %v433_v16 = vpop.f32.mrb[15].mxu0  ;;  %v683_v17 = vmax.f32 %v567_v8, 0.0  ;;  %v570_v19 = vadd.f32 %v1301_v15, %v1508_v34  ;;  %v561_v21 = vpop.f32.mrb[15].mxu1 }
  0xf5   :  { %v649_v18 = vmax.f32 %v431_v9, 0.0  ;;  %v434_v20 = vadd.f32 %v1508_v34, %v433_v16  ;;  %v681_v23 = vmax.f32 %v559_v13, 0.0  ;;  %v562_v25 = vadd.f32 %v1508_v34, %v561_v21 }
  0xf6   :  { %v1169_v22 = vpack.c.bf16 %v651_v12, %v651_v12  ;;  %v652_v24 = vmax.f32 %v442_v14, 0.0  ;;  %v1201_v26 = vpack.c.bf16 %v683_v17, %v683_v17  ;;  %v684_v28 = vmax.f32 %v570_v19, 0.0 }
  0xf7   :  { %v1167_v27 = vpack.c.bf16 %v649_v18, %v649_v18  ;;  %v650_v29 = vmax.f32 %v434_v20, 0.0  ;;  %v1199_v30 = vpack.c.bf16 %v681_v23, %v681_v23  ;;  %v682_v32 = vmax.f32 %v562_v25, 0.0 }
  0xf8   :  { %972 = vst.msk [vmem:[%s1833_s3 + $0x38] sm:$0xf] %vm957_vm2, %v1169_v22  ;;  %v1170_v31 = vpack.c.bf16 %v652_v24, %v652_v24  ;;  %1004 = vst.msk [vmem:[%s1833_s3 + $0xb8] sm:$0xf] %vm957_vm2, %v1201_v26  ;;  %v1202_v33 = vpack.c.bf16 %v684_v28, %v684_v28 }
  0xf9   :  { %970 = vst.msk [vmem:[%s1833_s3 + $0x30] sm:$0xf] %vm957_vm2, %v1167_v27  ;;  %v1168_v35 = vpack.c.bf16 %v650_v29, %v650_v29  ;;  %v1272_v36 = vpop.f32.mrb[16].mxu0  ;;  %1002 = vst.msk [vmem:[%s1833_s3 + $0xb0] sm:$0xf] %vm957_vm2, %v1199_v30  ;;  %v1200_v37 = vpack.c.bf16 %v682_v32, %v682_v32  ;;  %v1304_v39 = vpop.f32.mrb[16].mxu1 }
  0xfa   :  { %973 = vst.msk [vmem:[%s1833_s3 + $0x3c] sm:$0xf] %vm957_vm2, %v1170_v31  ;;  %v455_v38 = vadd.f32 %v1272_v36, %v1508_v34  ;;  %v446_v40 = vpop.f32.mrb[17].mxu0  ;;  %1005 = vst.msk [vmem:[%s1833_s3 + $0xbc] sm:$0xf] %vm957_vm2, %v1202_v33  ;;  %v583_v41 = vadd.f32 %v1304_v39, %v1508_v34  ;;  %v574_v43 = vpop.f32.mrb[17].mxu1 }
  0xfb   :  { %971 = vst.msk [vmem:[%s1833_s3 + $0x34] sm:$0xf] %vm957_vm2, %v1168_v35  ;;  %v447_v42 = vadd.f32 %v1508_v34, %v446_v40  ;;  %v1273_v44 = vpop.f32.mrb[18].mxu0  ;;  %1003 = vst.msk [vmem:[%s1833_s3 + $0xb4] sm:$0xf] %vm957_vm2, %v1200_v37  ;;  %v575_v46 = vadd.f32 %v1508_v34, %v574_v43  ;;  %v1305_v48 = vpop.f32.mrb[18].mxu1 }
  0xfc   :  { %v655_v45 = vmax.f32 %v455_v38, 0.0  ;;  %v458_v47 = vadd.f32 %v1273_v44, %v1508_v34  ;;  %v449_v49 = vpop.f32.mrb[19].mxu0  ;;  %v687_v50 = vmax.f32 %v583_v41, 0.0  ;;  %v586_v52 = vadd.f32 %v1305_v48, %v1508_v34  ;;  %v577_v54 = vpop.f32.mrb[19].mxu1 }
  0xfd   :  { %v653_v51 = vmax.f32 %v447_v42, 0.0  ;;  %v450_v53 = vadd.f32 %v1508_v34, %v449_v49  ;;  %v685_v56 = vmax.f32 %v575_v46, 0.0  ;;  %v578_v58 = vadd.f32 %v1508_v34, %v577_v54 }
  0xfe   :  { %v1173_v55 = vpack.c.bf16 %v655_v45, %v655_v45  ;;  %v656_v57 = vmax.f32 %v458_v47, 0.0  ;;  %v1205_v59 = vpack.c.bf16 %v687_v50, %v687_v50  ;;  %v688_v61 = vmax.f32 %v586_v52, 0.0 }
  0xff   :  { %v1171_v60 = vpack.c.bf16 %v653_v51, %v653_v51  ;;  %v654_v62 = vmax.f32 %v450_v53, 0.0  ;;  %v1203_v63 = vpack.c.bf16 %v685_v56, %v685_v56  ;;  %v686_v1 = vmax.f32 %v578_v58, 0.0 }
 0x100   :  { %976 = vst.msk [vmem:[%s1833_s3 + $0x48] sm:$0xf] %vm957_vm2, %v1173_v55  ;;  %v1174_v0 = vpack.c.bf16 %v656_v57, %v656_v57  ;;  %1008 = vst.msk [vmem:[%s1833_s3 + $0xc8] sm:$0xf] %vm957_vm2, %v1205_v59  ;;  %v1206_v2 = vpack.c.bf16 %v688_v61, %v688_v61 }
 0x101   :  { %974 = vst.msk [vmem:[%s1833_s3 + $0x40] sm:$0xf] %vm957_vm2, %v1171_v60  ;;  %v1172_v3 = vpack.c.bf16 %v654_v62, %v654_v62  ;;  %v1276_v4 = vpop.f32.mrb[20].mxu0  ;;  %1006 = vst.msk [vmem:[%s1833_s3 + $0xc0] sm:$0xf] %vm957_vm2, %v1203_v63  ;;  %v1204_v5 = vpack.c.bf16 %v686_v1, %v686_v1  ;;  %v1308_v7 = vpop.f32.mrb[20].mxu1 }
 0x102   :  { %977 = vst.msk [vmem:[%s1833_s3 + $0x4c] sm:$0xf] %vm957_vm2, %v1174_v0  ;;  %v471_v6 = vadd.f32 %v1276_v4, %v1508_v34  ;;  %v462_v8 = vpop.f32.mrb[21].mxu0  ;;  %1009 = vst.msk [vmem:[%s1833_s3 + $0xcc] sm:$0xf] %vm957_vm2, %v1206_v2  ;;  %v599_v9 = vadd.f32 %v1308_v7, %v1508_v34  ;;  %v590_v11 = vpop.f32.mrb[21].mxu1 }
 0x103   :  { %975 = vst.msk [vmem:[%s1833_s3 + $0x44] sm:$0xf] %vm957_vm2, %v1172_v3  ;;  %v463_v10 = vadd.f32 %v1508_v34, %v462_v8  ;;  %v1277_v12 = vpop.f32.mrb[22].mxu0  ;;  %1007 = vst.msk [vmem:[%s1833_s3 + $0xc4] sm:$0xf] %vm957_vm2, %v1204_v5  ;;  %v591_v14 = vadd.f32 %v1508_v34, %v590_v11  ;;  %v1309_v16 = vpop.f32.mrb[22].mxu1 }
 0x104   :  { %v659_v13 = vmax.f32 %v471_v6, 0.0  ;;  %v474_v15 = vadd.f32 %v1277_v12, %v1508_v34  ;;  %v465_v17 = vpop.f32.mrb[23].mxu0  ;;  %v691_v18 = vmax.f32 %v599_v9, 0.0  ;;  %v602_v20 = vadd.f32 %v1309_v16, %v1508_v34  ;;  %v593_v22 = vpop.f32.mrb[23].mxu1 }
 0x105   :  { %v657_v19 = vmax.f32 %v463_v10, 0.0  ;;  %v466_v21 = vadd.f32 %v1508_v34, %v465_v17  ;;  %v689_v24 = vmax.f32 %v591_v14, 0.0  ;;  %v594_v26 = vadd.f32 %v1508_v34, %v593_v22 }
 0x106   :  { %v1177_v23 = vpack.c.bf16 %v659_v13, %v659_v13  ;;  %v660_v25 = vmax.f32 %v474_v15, 0.0  ;;  %v1209_v27 = vpack.c.bf16 %v691_v18, %v691_v18  ;;  %v692_v29 = vmax.f32 %v602_v20, 0.0 }
 0x107   :  { %v1175_v28 = vpack.c.bf16 %v657_v19, %v657_v19  ;;  %v658_v30 = vmax.f32 %v466_v21, 0.0  ;;  %v1207_v31 = vpack.c.bf16 %v689_v24, %v689_v24  ;;  %v690_v33 = vmax.f32 %v594_v26, 0.0 }
 0x108   :  { %980 = vst.msk [vmem:[%s1833_s3 + $0x58] sm:$0xf] %vm957_vm2, %v1177_v23  ;;  %v1178_v32 = vpack.c.bf16 %v660_v25, %v660_v25  ;;  %1012 = vst.msk [vmem:[%s1833_s3 + $0xd8] sm:$0xf] %vm957_vm2, %v1209_v27  ;;  %v1210_v35 = vpack.c.bf16 %v692_v29, %v692_v29 }
 0x109   :  { %978 = vst.msk [vmem:[%s1833_s3 + $0x50] sm:$0xf] %vm957_vm2, %v1175_v28  ;;  %v1176_v36 = vpack.c.bf16 %v658_v30, %v658_v30  ;;  %v1280_v37 = vpop.f32.mrb[24].mxu0  ;;  %1010 = vst.msk [vmem:[%s1833_s3 + $0xd0] sm:$0xf] %vm957_vm2, %v1207_v31  ;;  %v1208_v38 = vpack.c.bf16 %v690_v33, %v690_v33  ;;  %v1312_v40 = vpop.f32.mrb[24].mxu1 }
 0x10a   :  { %981 = vst.msk [vmem:[%s1833_s3 + $0x5c] sm:$0xf] %vm957_vm2, %v1178_v32  ;;  %v487_v39 = vadd.f32 %v1280_v37, %v1508_v34  ;;  %v478_v41 = vpop.f32.mrb[25].mxu0  ;;  %1013 = vst.msk [vmem:[%s1833_s3 + $0xdc] sm:$0xf] %vm957_vm2, %v1210_v35  ;;  %v615_v42 = vadd.f32 %v1312_v40, %v1508_v34  ;;  %v606_v44 = vpop.f32.mrb[25].mxu1 }
 0x10b   :  { %979 = vst.msk [vmem:[%s1833_s3 + $0x54] sm:$0xf] %vm957_vm2, %v1176_v36  ;;  %v479_v43 = vadd.f32 %v1508_v34, %v478_v41  ;;  %v1281_v45 = vpop.f32.mrb[26].mxu0  ;;  %1011 = vst.msk [vmem:[%s1833_s3 + $0xd4] sm:$0xf] %vm957_vm2, %v1208_v38  ;;  %v607_v47 = vadd.f32 %v1508_v34, %v606_v44  ;;  %v1313_v49 = vpop.f32.mrb[26].mxu1 }
 0x10c   :  { %v663_v46 = vmax.f32 %v487_v39, 0.0  ;;  %v490_v48 = vadd.f32 %v1281_v45, %v1508_v34  ;;  %v481_v50 = vpop.f32.mrb[27].mxu0  ;;  %v695_v51 = vmax.f32 %v615_v42, 0.0  ;;  %v618_v53 = vadd.f32 %v1313_v49, %v1508_v34  ;;  %v609_v55 = vpop.f32.mrb[27].mxu1 }
 0x10d   :  { %v661_v52 = vmax.f32 %v479_v43, 0.0  ;;  %v482_v54 = vadd.f32 %v1508_v34, %v481_v50  ;;  %v693_v57 = vmax.f32 %v607_v47, 0.0  ;;  %v610_v59 = vadd.f32 %v1508_v34, %v609_v55 }
 0x10e   :  { %v1181_v56 = vpack.c.bf16 %v663_v46, %v663_v46  ;;  %v664_v58 = vmax.f32 %v490_v48, 0.0  ;;  %v1213_v60 = vpack.c.bf16 %v695_v51, %v695_v51  ;;  %v696_v62 = vmax.f32 %v618_v53, 0.0 }
 0x10f   :  { %v1179_v61 = vpack.c.bf16 %v661_v52, %v661_v52  ;;  %v662_v63 = vmax.f32 %v482_v54, 0.0  ;;  %v1211_v0 = vpack.c.bf16 %v693_v57, %v693_v57  ;;  %v694_v2 = vmax.f32 %v610_v59, 0.0 }
 0x110   :  { %984 = vst.msk [vmem:[%s1833_s3 + $0x68] sm:$0xf] %vm957_vm2, %v1181_v56  ;;  %v1182_v1 = vpack.c.bf16 %v664_v58, %v664_v58  ;;  %1016 = vst.msk [vmem:[%s1833_s3 + $0xe8] sm:$0xf] %vm957_vm2, %v1213_v60  ;;  %v1214_v3 = vpack.c.bf16 %v696_v62, %v696_v62 }
 0x111   :  { %982 = vst.msk [vmem:[%s1833_s3 + $0x60] sm:$0xf] %vm957_vm2, %v1179_v61  ;;  %v1180_v4 = vpack.c.bf16 %v662_v63, %v662_v63  ;;  %v1284_v5 = vpop.f32.mrb[28].mxu0  ;;  %1014 = vst.msk [vmem:[%s1833_s3 + $0xe0] sm:$0xf] %vm957_vm2, %v1211_v0  ;;  %v1212_v6 = vpack.c.bf16 %v694_v2, %v694_v2  ;;  %v1316_v8 = vpop.f32.mrb[28].mxu1 }
 0x112   :  { %985 = vst.msk [vmem:[%s1833_s3 + $0x6c] sm:$0xf] %vm957_vm2, %v1182_v1  ;;  %v503_v7 = vadd.f32 %v1284_v5, %v1508_v34  ;;  %v494_v9 = vpop.f32.mrb[29].mxu0  ;;  %1017 = vst.msk [vmem:[%s1833_s3 + $0xec] sm:$0xf] %vm957_vm2, %v1214_v3  ;;  %v631_v10 = vadd.f32 %v1316_v8, %v1508_v34  ;;  %v622_v12 = vpop.f32.mrb[29].mxu1 }
 0x113   :  { %983 = vst.msk [vmem:[%s1833_s3 + $0x64] sm:$0xf] %vm957_vm2, %v1180_v4  ;;  %v495_v11 = vadd.f32 %v1508_v34, %v494_v9  ;;  %v1285_v13 = vpop.f32.mrb[30].mxu0  ;;  %1015 = vst.msk [vmem:[%s1833_s3 + $0xe4] sm:$0xf] %vm957_vm2, %v1212_v6  ;;  %v623_v15 = vadd.f32 %v1508_v34, %v622_v12  ;;  %v1317_v17 = vpop.f32.mrb[30].mxu1 }
 0x114   :  { %v667_v14 = vmax.f32 %v503_v7, 0.0  ;;  %v506_v16 = vadd.f32 %v1285_v13, %v1508_v34  ;;  %v497_v18 = vpop.f32.mrb[31].mxu0  ;;  %v699_v19 = vmax.f32 %v631_v10, 0.0  ;;  %v634_v21 = vadd.f32 %v1317_v17, %v1508_v34  ;;  %v625_v23 = vpop.f32.mrb[31].mxu1 }
 0x115   :  { %v665_v20 = vmax.f32 %v495_v11, 0.0  ;;  %v498_v22 = vadd.f32 %v1508_v34, %v497_v18  ;;  %v697_v25 = vmax.f32 %v623_v15, 0.0  ;;  %v626_v27 = vadd.f32 %v1508_v34, %v625_v23 }
 0x116   :  { %v1185_v24 = vpack.c.bf16 %v667_v14, %v667_v14  ;;  %v668_v26 = vmax.f32 %v506_v16, 0.0  ;;  %v1217_v28 = vpack.c.bf16 %v699_v19, %v699_v19  ;;  %v700_v30 = vmax.f32 %v634_v21, 0.0 }
 0x117   :  { %v1183_v29 = vpack.c.bf16 %v665_v20, %v665_v20  ;;  %v666_v31 = vmax.f32 %v498_v22, 0.0  ;;  %v1215_v32 = vpack.c.bf16 %v697_v25, %v697_v25  ;;  %v698_v35 = vmax.f32 %v626_v27, 0.0 }
 0x118   :  { %988 = vst.msk [vmem:[%s1833_s3 + $0x78] sm:$0xf] %vm957_vm2, %v1185_v24  ;;  %v1186_v33 = vpack.c.bf16 %v668_v26, %v668_v26  ;;  %1020 = vst.msk [vmem:[%s1833_s3 + $0xf8] sm:$0xf] %vm957_vm2, %v1217_v28  ;;  %v1218_v34 = vpack.c.bf16 %v700_v30, %v700_v30 }
 0x119   :  { %986 = vst.msk [vmem:[%s1833_s3 + $0x70] sm:$0xf] %vm957_vm2, %v1183_v29  ;;  %v1184_v36 = vpack.c.bf16 %v666_v31, %v666_v31  ;;  %1018 = vst.msk [vmem:[%s1833_s3 + $0xf0] sm:$0xf] %vm957_vm2, %v1215_v32  ;;  %v1216_v37 = vpack.c.bf16 %v698_v35, %v698_v35 }
 0x11a   :  { %989 = vst.msk [vmem:[%s1833_s3 + $0x7c] sm:$0xf] %vm957_vm2, %v1186_v33  ;;  %1021 = vst.msk [vmem:[%s1833_s3 + $0xfc] sm:$0xf] %vm957_vm2, %v1218_v34 }
 0x11b   :  { %987 = vst.msk [vmem:[%s1833_s3 + $0x74] sm:$0xf] %vm957_vm2, %v1184_v36  ;;  %1019 = vst.msk [vmem:[%s1833_s3 + $0xf4] sm:$0xf] %vm957_vm2, %v1216_v37 }

// kernel: slowfast_forward.18
= control target key start
LH: loop header
LB: loop body
LE: loop exit
PB: predicated region body
PF: predicated region fallthrough
CT: control target
= control target key end

     0   :  { %vm118_vm0 = vcmask 654336   ;;  %vm320_vm1 = vcmask 257024   ;;  %s591_s1 = inlined_call_operand.vmem [shape: bf16[80,32], index: 1, kind: input, shape index: {}]   ;;  %s592_s0 = inlined_call_operand.vmem [shape: bf16[128,80], index: 0, kind: input, shape index: {}]   ;;  %s593_s2 = inlined_call_operand.vmem [shape: f32[1,32], index: 2, kind: input, shape index: {}]   ;;  %s594_s3 = inlined_call_operand.vmem [shape: bf16[128,32], index: 3, kind: output, shape index: {}]  }
   0x1   :  { %v444_v0 = vld [vmem:[%s591_s1] sm:$0xff]   ;;  %v445_v1 = vld [vmem:[%s591_s1 + $0x8] sm:$0xff]   ;;  %v446_v2 = vld [vmem:[%s591_s1 + $0x10] sm:$0xff]  }
   0x2   :  { %408 = vmatprep.subr.bf16.mxu0 %v444_v0  ;;  %434 = vmatprep.subr.bf16.mxu1 %v444_v0  ;;  %v449_v3 = vld [vmem:[%s592_s0] sm:$0xff]   ;;  %v447_v5 = vld [vmem:[%s591_s1 + $0x18] sm:$0xff]   ;;  %v451_v7 = vld [vmem:[%s592_s0 + $0x8] sm:$0xff]  }
   0x3   :  { %409 = vmatpush3.bf16.msra.mxu0 %v444_v0  ;;  %439 = vmatpush3.bf16.msra.mxu1 %v444_v0  ;;  %v450_v4 = vld [vmem:[%s592_s0 + $0x20] sm:$0xff]   ;;  %v452_v8 = vld [vmem:[%s592_s0 + $0x28] sm:$0xff]   ;;  %v453_v9 = vld [vmem:[%s592_s0 + $0x10] sm:$0xff]  }
   0x4   :  { %410 = vmatprep.subr.bf16.mxu0 %v445_v1  ;;  %435 = vmatprep.subr.bf16.mxu1 %v445_v1  ;;  %v448_v6 = vld [vmem:[%s591_s1 + $0x20] sm:$0xff]   ;;  %v454_v10 = vld [vmem:[%s592_s0 + $0x30] sm:$0xff]   ;;  %v455_v11 = vld [vmem:[%s592_s0 + $0x18] sm:$0xff]  }
   0x5   :  { %418 = vmatprep.mubr.msk.bf16.mxu0 %vm118_vm0, %v449_v3  ;;  %426 = vmatprep.mubr.msk.bf16.mxu1 %vm118_vm0, %v450_v4  ;;  %v456_v12 = vld [vmem:[%s592_s0 + $0x38] sm:$0xff]   ;;  %v341_v13 = vld [vmem:[%s593_s2] ss:$0 sm:$0xff] }
   0x7   :  { %411 = vmatpush3.bf16.msra.mxu0 %v445_v1  ;;  %440 = vmatpush3.bf16.msra.mxu1 %v445_v1 }
   0x8   :  { %412 = vmatprep.subr.bf16.mxu0 %v446_v2  ;;  %436 = vmatprep.subr.bf16.mxu1 %v446_v2 }
   0xb   :  { %413 = vmatpush3.bf16.msra.mxu0 %v446_v2  ;;  %441 = vmatpush3.bf16.msra.mxu1 %v446_v2 }
   0xc   :  { %414 = vmatprep.subr.bf16.mxu0 %v447_v5  ;;  %437 = vmatprep.subr.bf16.mxu1 %v447_v5 }
   0xf   :  { %415 = vmatpush3.bf16.msra.mxu0 %v447_v5  ;;  %442 = vmatpush3.bf16.msra.mxu1 %v447_v5 }
  0x10   :  { %416 = vmatprep.subr.bf16.mxu0 %v448_v6  ;;  %438 = vmatprep.subr.bf16.mxu1 %v448_v6 }
  0x13   :  { %417 = vmatpush3.bf16.msra.mxu0 %v448_v6  ;;  %443 = vmatpush3.bf16.msra.mxu1 %v448_v6 }
  0x16   :  { %419 = vmatmul.mubr.msk.bf16.vlgmr.msra.gmra.mrb[0].mxu0 %vm118_vm0, %v451_v7  ;;  %427 = vmatmul.mubr.msk.bf16.vlgmr.msra.gmra.mrb[0].mxu1 %vm118_vm0, %v452_v8 }
  0x17   :  { %422 = vmatprep.mubr.msk.bf16.mxu0 %vm118_vm0, %v453_v9  ;;  %430 = vmatprep.mubr.msk.bf16.mxu1 %vm118_vm0, %v454_v10 }
  0x1e   :  { %423 = vmatmul.mubr.msk.bf16.gmra.mrb[4].mxu0 %vm118_vm0, %v455_v11  ;;  %431 = vmatmul.mubr.msk.bf16.gmra.mrb[4].mxu1 %vm118_vm0, %v456_v12 }
  0xe9   :  { %v420_v14 = vpop.f32.mrb[0].mxu0  ;;  %v428_v15 = vpop.f32.mrb[0].mxu1 }
  0xea   :  { %v186_v16 = vadd.f32 %v420_v14, %v341_v13  ;;  %v218_v17 = vadd.f32 %v428_v15, %v341_v13  ;;  %v177_v18 = vpop.f32.mrb[1].mxu0  ;;  %v209_v19 = vpop.f32.mrb[1].mxu1 }
  0xeb   :  { %v178_v20 = vadd.f32 %v341_v13, %v177_v18  ;;  %v210_v21 = vadd.f32 %v341_v13, %v209_v19  ;;  %v421_v22 = vpop.f32.mrb[2].mxu0  ;;  %v429_v23 = vpop.f32.mrb[2].mxu1 }
  0xec   :  { %v242_v24 = vmax.f32 %v186_v16, 0.0  ;;  %v250_v25 = vmax.f32 %v218_v17, 0.0  ;;  %v189_v26 = vadd.f32 %v421_v22, %v341_v13  ;;  %v221_v27 = vadd.f32 %v429_v23, %v341_v13  ;;  %v180_v28 = vpop.f32.mrb[3].mxu0  ;;  %v212_v29 = vpop.f32.mrb[3].mxu1 }
  0xed   :  { %v240_v30 = vmax.f32 %v178_v20, 0.0  ;;  %v248_v31 = vmax.f32 %v210_v21, 0.0  ;;  %v181_v32 = vadd.f32 %v341_v13, %v180_v28  ;;  %v213_v33 = vadd.f32 %v341_v13, %v212_v29 }
  0xee   :  { %v381_v34 = vpack.c.bf16 %v242_v24, %v242_v24  ;;  %v389_v35 = vpack.c.bf16 %v250_v25, %v250_v25  ;;  %v243_v36 = vmax.f32 %v189_v26, 0.0  ;;  %v251_v37 = vmax.f32 %v221_v27, 0.0 }
  0xef   :  { %v379_v38 = vpack.c.bf16 %v240_v30, %v240_v30  ;;  %v387_v39 = vpack.c.bf16 %v248_v31, %v248_v31  ;;  %v241_v40 = vmax.f32 %v181_v32, 0.0  ;;  %v249_v41 = vmax.f32 %v213_v33, 0.0 }
  0xf0   :  { %323 = vst.msk [vmem:[%s594_s3 + $0x8] sm:$0xf] %vm320_vm1, %v381_v34  ;;  %331 = vst.msk [vmem:[%s594_s3 + $0x28] sm:$0xf] %vm320_vm1, %v389_v35  ;;  %v382_v42 = vpack.c.bf16 %v243_v36, %v243_v36  ;;  %v390_v43 = vpack.c.bf16 %v251_v37, %v251_v37 }
  0xf1   :  { %321 = vst.msk [vmem:[%s594_s3] sm:$0xf] %vm320_vm1, %v379_v38  ;;  %329 = vst.msk [vmem:[%s594_s3 + $0x20] sm:$0xf] %vm320_vm1, %v387_v39  ;;  %v380_v44 = vpack.c.bf16 %v241_v40, %v241_v40  ;;  %v388_v45 = vpack.c.bf16 %v249_v41, %v249_v41  ;;  %v424_v46 = vpop.f32.mrb[4].mxu0  ;;  %v432_v47 = vpop.f32.mrb[4].mxu1 }
  0xf2   :  { %324 = vst.msk [vmem:[%s594_s3 + $0xc] sm:$0xf] %vm320_vm1, %v382_v42  ;;  %332 = vst.msk [vmem:[%s594_s3 + $0x2c] sm:$0xf] %vm320_vm1, %v390_v43  ;;  %v202_v48 = vadd.f32 %v424_v46, %v341_v13  ;;  %v234_v49 = vadd.f32 %v432_v47, %v341_v13  ;;  %v193_v50 = vpop.f32.mrb[5].mxu0  ;;  %v225_v51 = vpop.f32.mrb[5].mxu1 }
  0xf3   :  { %322 = vst.msk [vmem:[%s594_s3 + $0x4] sm:$0xf] %vm320_vm1, %v380_v44  ;;  %330 = vst.msk [vmem:[%s594_s3 + $0x24] sm:$0xf] %vm320_vm1, %v388_v45  ;;  %v194_v52 = vadd.f32 %v341_v13, %v193_v50  ;;  %v226_v53 = vadd.f32 %v341_v13, %v225_v51  ;;  %v425_v54 = vpop.f32.mrb[6].mxu0  ;;  %v433_v55 = vpop.f32.mrb[6].mxu1 }
  0xf4   :  { %v246_v56 = vmax.f32 %v202_v48, 0.0  ;;  %v254_v57 = vmax.f32 %v234_v49, 0.0  ;;  %v205_v58 = vadd.f32 %v425_v54, %v341_v13  ;;  %v237_v59 = vadd.f32 %v433_v55, %v341_v13  ;;  %v196_v60 = vpop.f32.mrb[7].mxu0  ;;  %v228_v61 = vpop.f32.mrb[7].mxu1 }
  0xf5   :  { %v244_v62 = vmax.f32 %v194_v52, 0.0  ;;  %v252_v63 = vmax.f32 %v226_v53, 0.0  ;;  %v197_v0 = vadd.f32 %v341_v13, %v196_v60  ;;  %v229_v1 = vadd.f32 %v341_v13, %v228_v61 }
  0xf6   :  { %v385_v2 = vpack.c.bf16 %v246_v56, %v246_v56  ;;  %v393_v3 = vpack.c.bf16 %v254_v57, %v254_v57  ;;  %v247_v4 = vmax.f32 %v205_v58, 0.0  ;;  %v255_v5 = vmax.f32 %v237_v59, 0.0 }
  0xf7   :  { %v383_v6 = vpack.c.bf16 %v244_v62, %v244_v62  ;;  %v391_v7 = vpack.c.bf16 %v252_v63, %v252_v63  ;;  %v245_v8 = vmax.f32 %v197_v0, 0.0  ;;  %v253_v9 = vmax.f32 %v229_v1, 0.0 }
  0xf8   :  { %327 = vst.msk [vmem:[%s594_s3 + $0x18] sm:$0xf] %vm320_vm1, %v385_v2  ;;  %335 = vst.msk [vmem:[%s594_s3 + $0x38] sm:$0xf] %vm320_vm1, %v393_v3  ;;  %v386_v10 = vpack.c.bf16 %v247_v4, %v247_v4  ;;  %v394_v11 = vpack.c.bf16 %v255_v5, %v255_v5 }
  0xf9   :  { %325 = vst.msk [vmem:[%s594_s3 + $0x10] sm:$0xf] %vm320_vm1, %v383_v6  ;;  %333 = vst.msk [vmem:[%s594_s3 + $0x30] sm:$0xf] %vm320_vm1, %v391_v7  ;;  %v384_v12 = vpack.c.bf16 %v245_v8, %v245_v8  ;;  %v392_v13 = vpack.c.bf16 %v253_v9, %v253_v9 }
  0xfa   :  { %328 = vst.msk [vmem:[%s594_s3 + $0x1c] sm:$0xf] %vm320_vm1, %v386_v10  ;;  %336 = vst.msk [vmem:[%s594_s3 + $0x3c] sm:$0xf] %vm320_vm1, %v394_v11 }
  0xfb   :  { %326 = vst.msk [vmem:[%s594_s3 + $0x14] sm:$0xf] %vm320_vm1, %v384_v12  ;;  %334 = vst.msk [vmem:[%s594_s3 + $0x34] sm:$0xf] %vm320_vm1, %v392_v13 }

// kernel: slowfast_forward.19
= control target key start
LH: loop header
LB: loop body
LE: loop exit
PB: predicated region body
PF: predicated region fallthrough
CT: control target
= control target key end

     0   :  { %vm84_vm0 = vcmask 785408   ;;  %s285_s1 = inlined_call_operand.vmem [shape: bf16[96,128], index: 1, kind: input, shape index: {}]   ;;  %s286_s0 = inlined_call_operand.vmem [shape: bf16[32,96], index: 0, kind: input, shape index: {}]   ;;  %s287_s2 = inlined_call_operand.vmem [shape: f32[1,128], index: 2, kind: input, shape index: {}]   ;;  %s288_s3 = inlined_call_operand.vmem [shape: bf16[32,128], index: 3, kind: output, shape index: {}]  }
   0x1   :  { %v222_v0 = vld [vmem:[%s285_s1] sm:$0xff]   ;;  %v223_v1 = vld [vmem:[%s285_s1 + $0x8] sm:$0xff]   ;;  %v224_v2 = vld [vmem:[%s285_s1 + $0x10] sm:$0xff]  }
   0x2   :  { %206 = vmatprep.subr.bf16.mxu0 %v222_v0  ;;  %v228_v3 = vld [vmem:[%s286_s0] sm:$0xff]   ;;  %v225_v4 = vld [vmem:[%s285_s1 + $0x18] sm:$0xff]   ;;  %v227_v6 = vld [vmem:[%s285_s1 + $0x28] sm:$0xff]  }
   0x3   :  { %207 = vmatpush3.bf16.msra.mxu0 %v222_v0  ;;  %218 = vmatprep.mubr.msk.bf16.mxu0 %vm84_vm0, %v228_v3  ;;  %v226_v5 = vld [vmem:[%s285_s1 + $0x20] sm:$0xff]   ;;  %v229_v7 = vld [vmem:[%s286_s0 + $0x8] sm:$0xff]  }
   0x4   :  { %208 = vmatprep.subr.bf16.mxu0 %v223_v1  ;;  %v168_v8 = vld [vmem:[%s287_s2] ss:$0 sm:$0xff] }
   0x7   :  { %209 = vmatpush3.bf16.msra.mxu0 %v223_v1 }
   0x8   :  { %210 = vmatprep.subr.bf16.mxu0 %v224_v2 }
   0xb   :  { %211 = vmatpush3.bf16.msra.mxu0 %v224_v2 }
   0xc   :  { %212 = vmatprep.subr.bf16.mxu0 %v225_v4 }
   0xf   :  { %213 = vmatpush3.bf16.msra.mxu0 %v225_v4 }
  0x10   :  { %214 = vmatprep.subr.bf16.mxu0 %v226_v5 }
  0x13   :  { %215 = vmatpush3.bf16.msra.mxu0 %v226_v5 }
  0x14   :  { %216 = vmatprep.subr.bf16.mxu0 %v227_v6 }
  0x17   :  { %217 = vmatpush3.bf16.msra.mxu0 %v227_v6 }
  0x1a   :  { %219 = vmatmul.mubr.msk.bf16.vlgmr.msra.gmra.mrb[0].mxu0 %vm84_vm0, %v229_v7 }
  0xed   :  { %v220_v9 = vpop.f32.mrb[0].mxu0 }
  0xee   :  { %v134_v10 = vadd.f32 %v220_v9, %v168_v8  ;;  %v125_v11 = vpop.f32.mrb[1].mxu0 }
  0xef   :  { %v126_v12 = vadd.f32 %v168_v8, %v125_v11  ;;  %v221_v13 = vpop.f32.mrb[2].mxu0 }
  0xf0   :  { %v137_v14 = vadd.f32 %v221_v13, %v168_v8  ;;  %v128_v15 = vpop.f32.mrb[3].mxu0  ;;  %v142_v17 = vmax.f32 %v134_v10, 0.0 }
  0xf1   :  { %v129_v16 = vadd.f32 %v168_v8, %v128_v15  ;;  %v140_v19 = vmax.f32 %v126_v12, 0.0 }
  0xf2   :  { %v143_v18 = vmax.f32 %v137_v14, 0.0 }
  0xf3   :  { %v141_v20 = vmax.f32 %v129_v16, 0.0 }
  0xf4   :  { %v195_v21 = vpack.c.bf16 %v143_v18, %v142_v17 }
  0xf5   :  { %v190_v22 = vpack.c.bf16 %v141_v20, %v140_v19 }
  0xf6   :  { %197 = vst [vmem:[%s288_s3 + $0x8] sm:$0xff] %v195_v21  }
  0xf7   :  { %191 = vst [vmem:[%s288_s3] sm:$0xff] %v190_v22  }

// kernel: slowfast_forward.20
= control target key start
LH: loop header
LB: loop body
LE: loop exit
PB: predicated region body
PF: predicated region fallthrough
CT: control target
= control target key end

     0   :  { %vm86_vm0 = vcmask 130048   ;;  %vm288_vm1 = vcmask 257024   ;;  %s519_s1 = inlined_call_operand.vmem [shape: bf16[16,32], index: 1, kind: input, shape index: {}]   ;;  %s520_s0 = inlined_call_operand.vmem [shape: bf16[128,16], index: 0, kind: input, shape index: {}]   ;;  %s521_s2 = inlined_call_operand.vmem [shape: f32[1,32], index: 2, kind: input, shape index: {}]   ;;  %s522_s3 = inlined_call_operand.vmem [shape: bf16[128,32], index: 3, kind: output, shape index: {}]  }
   0x1   :  { %v388_v0 = vld [vmem:[%s519_s1] sm:$0xff]   ;;  %v391_v3 = vld [vmem:[%s520_s0 + $0x8] sm:$0xff]   ;;  %v393_v5 = vld [vmem:[%s520_s0 + $0x10] sm:$0xff]  }
   0x2   :  { %v389_v1 = vld [vmem:[%s520_s0] sm:$0xff]   ;;  %368 = vmatprep.subr.bf16.mxu0 %v388_v0  ;;  %386 = vmatprep.subr.bf16.mxu1 %v388_v0  ;;  %v392_v4 = vld [vmem:[%s520_s0 + $0x28] sm:$0xff]   ;;  %v394_v6 = vld [vmem:[%s520_s0 + $0x30] sm:$0xff]  }
   0x3   :  { %v390_v2 = vld [vmem:[%s520_s0 + $0x20] sm:$0xff]   ;;  %369 = vmatpush3.bf16.msra.mxu0 %v388_v0  ;;  %387 = vmatpush3.bf16.msra.mxu1 %v388_v0  ;;  %v395_v7 = vld [vmem:[%s520_s0 + $0x18] sm:$0xff]  }
   0x4   :  { %370 = vmatprep.mubr.msk.bf16.mxu0 %vm86_vm0, %v389_v1  ;;  %378 = vmatprep.mubr.msk.bf16.mxu1 %vm86_vm0, %v390_v2  ;;  %v396_v8 = vld [vmem:[%s520_s0 + $0x38] sm:$0xff]   ;;  %v309_v9 = vld [vmem:[%s521_s2] ss:$0 sm:$0xff] }
   0x6   :  { %371 = vmatmul.mubr.msk.bf16.vlgmr.msra.gmra.mrb[0].mxu0 %vm86_vm0, %v391_v3  ;;  %379 = vmatmul.mubr.msk.bf16.vlgmr.msra.gmra.mrb[0].mxu1 %vm86_vm0, %v392_v4 }
   0x7   :  { %374 = vmatprep.mubr.msk.bf16.mxu0 %vm86_vm0, %v393_v5  ;;  %382 = vmatprep.mubr.msk.bf16.mxu1 %vm86_vm0, %v394_v6 }
   0xe   :  { %375 = vmatmul.mubr.msk.bf16.gmra.mrb[4].mxu0 %vm86_vm0, %v395_v7  ;;  %383 = vmatmul.mubr.msk.bf16.gmra.mrb[4].mxu1 %vm86_vm0, %v396_v8 }
  0xd9   :  { %v372_v10 = vpop.f32.mrb[0].mxu0  ;;  %v380_v11 = vpop.f32.mrb[0].mxu1 }
  0xda   :  { %v154_v12 = vadd.f32 %v372_v10, %v309_v9  ;;  %v186_v13 = vadd.f32 %v380_v11, %v309_v9  ;;  %v145_v14 = vpop.f32.mrb[1].mxu0  ;;  %v177_v15 = vpop.f32.mrb[1].mxu1 }
  0xdb   :  { %v146_v16 = vadd.f32 %v309_v9, %v145_v14  ;;  %v178_v17 = vadd.f32 %v309_v9, %v177_v15  ;;  %v373_v18 = vpop.f32.mrb[2].mxu0  ;;  %v381_v19 = vpop.f32.mrb[2].mxu1 }
  0xdc   :  { %v210_v20 = vmax.f32 %v154_v12, 0.0  ;;  %v218_v21 = vmax.f32 %v186_v13, 0.0  ;;  %v157_v22 = vadd.f32 %v373_v18, %v309_v9  ;;  %v189_v23 = vadd.f32 %v381_v19, %v309_v9  ;;  %v148_v24 = vpop.f32.mrb[3].mxu0  ;;  %v180_v25 = vpop.f32.mrb[3].mxu1 }
  0xdd   :  { %v208_v26 = vmax.f32 %v146_v16, 0.0  ;;  %v216_v27 = vmax.f32 %v178_v17, 0.0  ;;  %v149_v28 = vadd.f32 %v309_v9, %v148_v24  ;;  %v181_v29 = vadd.f32 %v309_v9, %v180_v25 }
  0xde   :  { %v345_v30 = vpack.c.bf16 %v210_v20, %v210_v20  ;;  %v353_v31 = vpack.c.bf16 %v218_v21, %v218_v21  ;;  %v211_v32 = vmax.f32 %v157_v22, 0.0  ;;  %v219_v33 = vmax.f32 %v189_v23, 0.0 }
  0xdf   :  { %v343_v34 = vpack.c.bf16 %v208_v26, %v208_v26  ;;  %v351_v35 = vpack.c.bf16 %v216_v27, %v216_v27  ;;  %v209_v36 = vmax.f32 %v149_v28, 0.0  ;;  %v217_v37 = vmax.f32 %v181_v29, 0.0 }
  0xe0   :  { %291 = vst.msk [vmem:[%s522_s3 + $0x8] sm:$0xf] %vm288_vm1, %v345_v30  ;;  %299 = vst.msk [vmem:[%s522_s3 + $0x28] sm:$0xf] %vm288_vm1, %v353_v31  ;;  %v346_v38 = vpack.c.bf16 %v211_v32, %v211_v32  ;;  %v354_v39 = vpack.c.bf16 %v219_v33, %v219_v33 }
  0xe1   :  { %289 = vst.msk [vmem:[%s522_s3] sm:$0xf] %vm288_vm1, %v343_v34  ;;  %297 = vst.msk [vmem:[%s522_s3 + $0x20] sm:$0xf] %vm288_vm1, %v351_v35  ;;  %v344_v40 = vpack.c.bf16 %v209_v36, %v209_v36  ;;  %v352_v41 = vpack.c.bf16 %v217_v37, %v217_v37  ;;  %v376_v42 = vpop.f32.mrb[4].mxu0  ;;  %v384_v43 = vpop.f32.mrb[4].mxu1 }
  0xe2   :  { %292 = vst.msk [vmem:[%s522_s3 + $0xc] sm:$0xf] %vm288_vm1, %v346_v38  ;;  %300 = vst.msk [vmem:[%s522_s3 + $0x2c] sm:$0xf] %vm288_vm1, %v354_v39  ;;  %v170_v44 = vadd.f32 %v376_v42, %v309_v9  ;;  %v202_v45 = vadd.f32 %v384_v43, %v309_v9  ;;  %v161_v46 = vpop.f32.mrb[5].mxu0  ;;  %v193_v47 = vpop.f32.mrb[5].mxu1 }
  0xe3   :  { %290 = vst.msk [vmem:[%s522_s3 + $0x4] sm:$0xf] %vm288_vm1, %v344_v40  ;;  %298 = vst.msk [vmem:[%s522_s3 + $0x24] sm:$0xf] %vm288_vm1, %v352_v41  ;;  %v162_v48 = vadd.f32 %v309_v9, %v161_v46  ;;  %v194_v49 = vadd.f32 %v309_v9, %v193_v47  ;;  %v377_v50 = vpop.f32.mrb[6].mxu0  ;;  %v385_v51 = vpop.f32.mrb[6].mxu1 }
  0xe4   :  { %v214_v52 = vmax.f32 %v170_v44, 0.0  ;;  %v222_v53 = vmax.f32 %v202_v45, 0.0  ;;  %v173_v54 = vadd.f32 %v377_v50, %v309_v9  ;;  %v205_v55 = vadd.f32 %v385_v51, %v309_v9  ;;  %v164_v56 = vpop.f32.mrb[7].mxu0  ;;  %v196_v57 = vpop.f32.mrb[7].mxu1 }
  0xe5   :  { %v212_v58 = vmax.f32 %v162_v48, 0.0  ;;  %v220_v59 = vmax.f32 %v194_v49, 0.0  ;;  %v165_v60 = vadd.f32 %v309_v9, %v164_v56  ;;  %v197_v61 = vadd.f32 %v309_v9, %v196_v57 }
  0xe6   :  { %v349_v62 = vpack.c.bf16 %v214_v52, %v214_v52  ;;  %v357_v63 = vpack.c.bf16 %v222_v53, %v222_v53  ;;  %v215_v0 = vmax.f32 %v173_v54, 0.0  ;;  %v223_v1 = vmax.f32 %v205_v55, 0.0 }
  0xe7   :  { %v347_v2 = vpack.c.bf16 %v212_v58, %v212_v58  ;;  %v355_v3 = vpack.c.bf16 %v220_v59, %v220_v59  ;;  %v213_v4 = vmax.f32 %v165_v60, 0.0  ;;  %v221_v5 = vmax.f32 %v197_v61, 0.0 }
  0xe8   :  { %295 = vst.msk [vmem:[%s522_s3 + $0x18] sm:$0xf] %vm288_vm1, %v349_v62  ;;  %303 = vst.msk [vmem:[%s522_s3 + $0x38] sm:$0xf] %vm288_vm1, %v357_v63  ;;  %v350_v6 = vpack.c.bf16 %v215_v0, %v215_v0  ;;  %v358_v7 = vpack.c.bf16 %v223_v1, %v223_v1 }
  0xe9   :  { %293 = vst.msk [vmem:[%s522_s3 + $0x10] sm:$0xf] %vm288_vm1, %v347_v2  ;;  %301 = vst.msk [vmem:[%s522_s3 + $0x30] sm:$0xf] %vm288_vm1, %v355_v3  ;;  %v348_v8 = vpack.c.bf16 %v213_v4, %v213_v4  ;;  %v356_v9 = vpack.c.bf16 %v221_v5, %v221_v5 }
  0xea   :  { %296 = vst.msk [vmem:[%s522_s3 + $0x1c] sm:$0xf] %vm288_vm1, %v350_v6  ;;  %304 = vst.msk [vmem:[%s522_s3 + $0x3c] sm:$0xf] %vm288_vm1, %v358_v7 }
  0xeb   :  { %294 = vst.msk [vmem:[%s522_s3 + $0x14] sm:$0xf] %vm288_vm1, %v348_v8  ;;  %302 = vst.msk [vmem:[%s522_s3 + $0x34] sm:$0xf] %vm288_vm1, %v356_v9 }

// kernel: slowfast_forward.21
= control target key start
LH: loop header
LB: loop body
LE: loop exit
PB: predicated region body
PF: predicated region fallthrough
CT: control target
= control target key end

     0   :  { %v271_v0 = vmov 0   ;;  %vm124_vm0 = vcmask 261120   ;;  %vm200_vm1 = vcmask 519168   ;;  %s349_s1 = inlined_call_operand.vmem [shape: bf16[160,64], index: 1, kind: input, shape index: {}]   ;;  %s350_s0 = inlined_call_operand.vmem [shape: bf16[32,160], index: 0, kind: input, shape index: {}]   ;;  %s351_s2 = inlined_call_operand.vmem [shape: f32[1,64], index: 2, kind: input, shape index: {}]   ;;  %s352_s3 = inlined_call_operand.vmem [shape: bf16[32,64], index: 3, kind: output, shape index: {}]  }
   0x1   :  { %131 = vmatprep.subr.bf16.mxu0 %v271_v0  ;;  %234 = vmatprep.subr.bf16.mxu1 %v271_v0  ;;  %v255_v1 = vld [vmem:[%s349_s1] sm:$0xff]   ;;  %v256_v2 = vld [vmem:[%s349_s1 + $0x8] sm:$0xff]   ;;  %v257_v3 = vld [vmem:[%s349_s1 + $0x10] sm:$0xff]  }
   0x2   :  { %132 = vmatpush1.bf16.msra.mxu0 %v255_v1  ;;  %244 = vmatpush1.bf16.msra.mxu1 %v255_v1  ;;  %v258_v4 = vld [vmem:[%s349_s1 + $0x18] sm:$0xff]   ;;  %v267_v5 = vld [vmem:[%s350_s0 + $0x4] ss:$8 sps:$4 sm:$0xff]   ;;  %v261_v9 = vld [vmem:[%s349_s1 + $0x30] sm:$0xff]  }
   0x3   :  { %133 = vmatprep.subr.bf16.mxu0 %v271_v0  ;;  %235 = vmatprep.subr.bf16.mxu1 %v271_v0  ;;  %v270_v6 = vld [vmem:[%s350_s0 + $0x14] ss:$8 sps:$4 sm:$0xff]   ;;  %v259_v7 = vld [vmem:[%s349_s1 + $0x20] sm:$0xff]   ;;  %v260_v8 = vld [vmem:[%s349_s1 + $0x28] sm:$0xff]  }
   0x4   :  { %224 = vmatprep.mubr.msk.bf16.mxu0 %vm124_vm0, %v267_v5  ;;  %225 = vmatprep.mubr.msk.bf16.mxu1 %vm124_vm0, %v270_v6  ;;  %v262_v10 = vld [vmem:[%s349_s1 + $0x38] sm:$0xff]   ;;  %v263_v11 = vld [vmem:[%s349_s1 + $0x40] sm:$0xff]   ;;  %v264_v12 = vld [vmem:[%s349_s1 + $0x48] sm:$0xff]  }
   0x5   :  { %v265_v13 = vld [vmem:[%s350_s0] ss:$8 sps:$4 sm:$0xff]   ;;  %v268_v14 = vld [vmem:[%s350_s0 + $0x10] ss:$8 sps:$4 sm:$0xff]  }
   0x6   :  { %134 = vmatpush1.bf16.msra.mxu0 %v256_v2  ;;  %245 = vmatpush1.bf16.msra.mxu1 %v256_v2  ;;  %v209_v15 = vld [vmem:[%s351_s2] ss:$0 sm:$0xff] }
   0x7   :  { %135 = vmatprep.subr.bf16.mxu0 %v271_v0  ;;  %236 = vmatprep.subr.bf16.mxu1 %v271_v0 }
   0xa   :  { %136 = vmatpush1.bf16.msra.mxu0 %v257_v3  ;;  %246 = vmatpush1.bf16.msra.mxu1 %v257_v3 }
   0xb   :  { %137 = vmatprep.subr.bf16.mxu0 %v271_v0  ;;  %237 = vmatprep.subr.bf16.mxu1 %v271_v0 }
   0xe   :  { %138 = vmatpush1.bf16.msra.mxu0 %v258_v4  ;;  %247 = vmatpush1.bf16.msra.mxu1 %v258_v4 }
   0xf   :  { %139 = vmatprep.subr.bf16.mxu0 %v271_v0  ;;  %238 = vmatprep.subr.bf16.mxu1 %v271_v0 }
  0x12   :  { %140 = vmatpush1.bf16.msra.mxu0 %v259_v7  ;;  %248 = vmatpush1.bf16.msra.mxu1 %v259_v7 }
  0x13   :  { %141 = vmatprep.subr.bf16.mxu0 %v271_v0  ;;  %239 = vmatprep.subr.bf16.mxu1 %v271_v0 }
  0x16   :  { %142 = vmatpush1.bf16.msra.mxu0 %v260_v8  ;;  %249 = vmatpush1.bf16.msra.mxu1 %v260_v8 }
  0x17   :  { %143 = vmatprep.subr.bf16.mxu0 %v271_v0  ;;  %240 = vmatprep.subr.bf16.mxu1 %v271_v0 }
  0x1a   :  { %144 = vmatpush1.bf16.msra.mxu0 %v261_v9  ;;  %250 = vmatpush1.bf16.msra.mxu1 %v261_v9 }
  0x1b   :  { %145 = vmatprep.subr.bf16.mxu0 %v271_v0  ;;  %241 = vmatprep.subr.bf16.mxu1 %v271_v0 }
  0x1e   :  { %146 = vmatpush1.bf16.msra.mxu0 %v262_v10  ;;  %251 = vmatpush1.bf16.msra.mxu1 %v262_v10 }
  0x1f   :  { %147 = vmatprep.subr.bf16.mxu0 %v271_v0  ;;  %242 = vmatprep.subr.bf16.mxu1 %v271_v0 }
  0x22   :  { %148 = vmatpush1.bf16.msra.mxu0 %v263_v11  ;;  %252 = vmatpush1.bf16.msra.mxu1 %v263_v11 }
  0x23   :  { %149 = vmatprep.subr.bf16.mxu0 %v271_v0  ;;  %243 = vmatprep.subr.bf16.mxu1 %v271_v0 }
  0x26   :  { %150 = vmatpush1.bf16.msra.mxu0 %v264_v12  ;;  %253 = vmatpush1.bf16.msra.mxu1 %v264_v12 }
  0x29   :  { %164 = vmatmul.mubr.bf16.vlgmr.msra.gmra.mrb[0].mxu0 %v265_v13  ;;  %172 = vmatmul.mubr.bf16.vlgmr.msra.gmra.mrb[0].mxu1 %v268_v14 }
  0xfc   :  { %v165_v16 = vpop.f32.mrb[0].mxu0  ;;  %v173_v17 = vpop.f32.mrb[0].mxu1 }
  0xfd   :  { %v166_v18 = vadd.f32 %v209_v15, %v165_v16  ;;  %v174_v19 = vadd.f32 %v209_v15, %v173_v17  ;;  %v167_v20 = vpop.f32.mrb[1].mxu0  ;;  %v175_v21 = vpop.f32.mrb[1].mxu1 }
  0xfe   :  { %v168_v22 = vpop.f32.mrb[2].mxu0  ;;  %v176_v23 = vpop.f32.mrb[2].mxu1 }
  0xff   :  { %v180_v24 = vmax.f32 %v166_v18, 0.0  ;;  %v182_v25 = vmax.f32 %v174_v19, 0.0  ;;  %v169_v26 = vadd.f32 %v209_v15, %v168_v22  ;;  %v177_v27 = vadd.f32 %v209_v15, %v176_v23  ;;  %v170_v28 = vpop.f32.mrb[3].mxu0  ;;  %v178_v29 = vpop.f32.mrb[3].mxu1 }
 0x101   :  { %v230_v30 = vpack.c.bf16 %v180_v24, %v180_v24  ;;  %v232_v31 = vpack.c.bf16 %v182_v25, %v182_v25  ;;  %v181_v32 = vmax.f32 %v169_v26, 0.0  ;;  %v183_v33 = vmax.f32 %v177_v27, 0.0 }
 0x103   :  { %201 = vst.msk [vmem:[%s352_s3] sm:$0xf] %vm200_vm1, %v230_v30  ;;  %203 = vst.msk [vmem:[%s352_s3 + $0x8] sm:$0xf] %vm200_vm1, %v232_v31  ;;  %v231_v34 = vpack.c.bf16 %v181_v32, %v181_v32  ;;  %v233_v35 = vpack.c.bf16 %v183_v33, %v183_v33 }
 0x105   :  { %202 = vst.msk [vmem:[%s352_s3 + $0x4] sm:$0xf] %vm200_vm1, %v231_v34  ;;  %204 = vst.msk [vmem:[%s352_s3 + $0xc] sm:$0xf] %vm200_vm1, %v233_v35 }

// kernel: slowfast_forward.22
= control target key start
LH: loop header
LB: loop body
LE: loop exit
PB: predicated region body
PF: predicated region fallthrough
CT: control target
= control target key end

     0   :  { %vm178_vm0 = vcmask 523264   ;;  %v42_v27 = vlaneseq  ;;  %s406_s1 = inlined_call_operand.vmem [shape: bf16[192,256], index: 1, kind: input, shape index: {}]   ;;  %s407_s0 = inlined_call_operand.vmem [shape: bf16[8,192], index: 0, kind: input, shape index: {}]   ;;  %s408_s2 = inlined_call_operand.vmem [shape: f32[1,256], index: 2, kind: input, shape index: {}]   ;;  %s409_s3 = inlined_call_operand.vmem [shape: bf16[8,256], index: 3, kind: output, shape index: {}]  }
   0x1   :  { %v267_v0 = vld [vmem:[%s406_s1 + $0x4] ss:$8 sps:$4 sm:$0xff]   ;;  %v269_v1 = vld [vmem:[%s406_s1] ss:$8 sps:$4 sm:$0xff]   ;;  %v270_v2 = vld [vmem:[%s406_s1 + $0x14] ss:$8 sps:$4 sm:$0xff]  }
   0x2   :  { %182 = vmatprep.subr.bf16.mxu0 %v267_v0  ;;  %v272_v3 = vld [vmem:[%s406_s1 + $0x10] ss:$8 sps:$4 sm:$0xff]   ;;  %v273_v4 = vld [vmem:[%s406_s1 + $0x24] ss:$8 sps:$4 sm:$0xff]   ;;  %v275_v5 = vld [vmem:[%s406_s1 + $0x20] ss:$8 sps:$4 sm:$0xff]  }
   0x3   :  { %183 = vmatpush1.bf16.msra.mxu0 %v269_v1  ;;  %v276_v6 = vld [vmem:[%s406_s1 + $0x34] ss:$8 sps:$4 sm:$0xff]   ;;  %v278_v7 = vld [vmem:[%s406_s1 + $0x30] ss:$8 sps:$4 sm:$0xff]   ;;  %v279_v8 = vld [vmem:[%s406_s1 + $0x44] ss:$8 sps:$4 sm:$0xff]  }
   0x4   :  { %184 = vmatprep.subr.bf16.mxu0 %v270_v2  ;;  %v281_v9 = vld [vmem:[%s406_s1 + $0x40] ss:$8 sps:$4 sm:$0xff]   ;;  %v282_v10 = vld [vmem:[%s406_s1 + $0x54] ss:$8 sps:$4 sm:$0xff]   ;;  %v284_v13 = vld [vmem:[%s406_s1 + $0x50] ss:$8 sps:$4 sm:$0xff]  }
   0x5   :  { %v15_v11 = vld [vmem:[%s407_s0] sm:$0xff]  ;;  %v288_v16 = vld [vmem:[%s406_s1 + $0x74] ss:$8 sps:$4 sm:$0xff]   ;;  %v290_v17 = vld [vmem:[%s406_s1 + $0x70] ss:$8 sps:$4 sm:$0xff]   ;;  %v43_v28 = vshrl.u32 %v42_v27, 7 }
   0x6   :  { %v239_v12 = vcombine.high %v15_v11, %v15_v11  ;;  %v285_v14 = vld [vmem:[%s406_s1 + $0x64] ss:$8 sps:$4 sm:$0xff]   ;;  %v287_v15 = vld [vmem:[%s406_s1 + $0x60] ss:$8 sps:$4 sm:$0xff]   ;;  %v294_v20 = vld [vmem:[%s406_s1 + $0x94] ss:$8 sps:$4 sm:$0xff]   ;;  %v238_v26 = vcombine.low %v15_v11, %v15_v11 }
   0x7   :  { %185 = vmatpush1.bf16.msra.mxu0 %v272_v3  ;;  %v291_v18 = vld [vmem:[%s406_s1 + $0x84] ss:$8 sps:$4 sm:$0xff]   ;;  %v293_v19 = vld [vmem:[%s406_s1 + $0x80] ss:$8 sps:$4 sm:$0xff]   ;;  %v296_v21 = vld [vmem:[%s406_s1 + $0x90] ss:$8 sps:$4 sm:$0xff]  }
   0x8   :  { %186 = vmatprep.subr.bf16.mxu0 %v273_v4  ;;  %264 = vmatprep.mubr.msk.bf16.mxu0 %vm178_vm0, %v239_v12  ;;  %v297_v22 = vld [vmem:[%s406_s1 + $0xa4] ss:$8 sps:$4 sm:$0xff]   ;;  %v299_v23 = vld [vmem:[%s406_s1 + $0xa0] ss:$8 sps:$4 sm:$0xff]   ;;  %v300_v24 = vld [vmem:[%s406_s1 + $0xb4] ss:$8 sps:$4 sm:$0xff]  }
   0x9   :  { %v302_v25 = vld [vmem:[%s406_s1 + $0xb0] ss:$8 sps:$4 sm:$0xff]   ;;  %v44_v29 = vsub.s32 0, %v43_v28  ;;  %v40_v30 = vld [vmem:[%s408_s2] sm:$0x3]  ;;  %v48_v31 = vsub.s32 1, %v43_v28 }
   0xb   :  { %187 = vmatpush1.bf16.msra.mxu0 %v275_v5  ;;  %v45_v32 = vrot.slane %v40_v30, %v44_v29  ;;  %v49_v33 = vrot.slane %v40_v30, %v48_v31 }
   0xc   :  { %188 = vmatprep.subr.bf16.mxu0 %v276_v6 }
   0xf   :  { %189 = vmatpush1.bf16.msra.mxu0 %v278_v7 }
  0x10   :  { %190 = vmatprep.subr.bf16.mxu0 %v279_v8 }
  0x13   :  { %191 = vmatpush1.bf16.msra.mxu0 %v281_v9 }
  0x14   :  { %192 = vmatprep.subr.bf16.mxu0 %v282_v10 }
  0x17   :  { %193 = vmatpush1.bf16.msra.mxu0 %v284_v13 }
  0x18   :  { %194 = vmatprep.subr.bf16.mxu0 %v285_v14 }
  0x1b   :  { %195 = vmatpush1.bf16.msra.mxu0 %v287_v15 }
  0x1c   :  { %196 = vmatprep.subr.bf16.mxu0 %v288_v16 }
  0x1f   :  { %197 = vmatpush1.bf16.msra.mxu0 %v290_v17 }
  0x20   :  { %198 = vmatprep.subr.bf16.mxu0 %v291_v18 }
  0x23   :  { %199 = vmatpush1.bf16.msra.mxu0 %v293_v19 }
  0x24   :  { %200 = vmatprep.subr.bf16.mxu0 %v294_v20 }
  0x27   :  { %201 = vmatpush1.bf16.msra.mxu0 %v296_v21 }
  0x28   :  { %202 = vmatprep.subr.bf16.mxu0 %v297_v22 }
  0x2b   :  { %203 = vmatpush1.bf16.msra.mxu0 %v299_v23 }
  0x2c   :  { %204 = vmatprep.subr.bf16.mxu0 %v300_v24 }
  0x2f   :  { %205 = vmatpush1.bf16.msra.mxu0 %v302_v25 }
  0x32   :  { %215 = vmatmul.mubr.bf16.vlgmr.msra.gmra.mrb[0].mxu0 %v238_v26 }
 0x105   :  { %v216_v34 = vpop.f32.mrb[0].mxu0 }
 0x106   :  { %v217_v35 = vadd.f32 %v216_v34, %v45_v32  ;;  %v218_v36 = vpop.f32.mrb[1].mxu0 }
 0x107   :  { %v219_v37 = vadd.f32 %v218_v36, %v49_v33  ;;  %v220_v38 = vpop.f32.mrb[2].mxu0 }
 0x108   :  { %v223_v39 = vmax.f32 %v217_v35, 0.0  ;;  %v221_v40 = vpop.f32.mrb[3].mxu0 }
 0x109   :  { %v224_v41 = vmax.f32 %v219_v37, 0.0 }
 0x10b   :  { %v266_v42 = vpack.c.bf16 %v224_v41, %v223_v39 }
 0x10d   :  { %233 = vst [vmem:[%s409_s3] sm:$0xff] %v266_v42 }

// kernel: slowfast_forward.23
= control target key start
LH: loop header
LB: loop body
LE: loop exit
PB: predicated region body
PF: predicated region fallthrough
CT: control target
= control target key end

     0   :  { %vm52_vm0 = vcmask 261120   ;;  %vm128_vm1 = vcmask 519168   ;;  %s215_s1 = inlined_call_operand.vmem [shape: bf16[32,64], index: 1, kind: input, shape index: {}]   ;;  %s216_s0 = inlined_call_operand.vmem [shape: bf16[32,32], index: 0, kind: input, shape index: {}]   ;;  %s217_s2 = inlined_call_operand.vmem [shape: f32[1,64], index: 2, kind: input, shape index: {}]   ;;  %s218_s3 = inlined_call_operand.vmem [shape: bf16[32,64], index: 3, kind: output, shape index: {}]  }
   0x1   :  { %v164_v0 = vld [vmem:[%s215_s1] sm:$0xff]   ;;  %v165_v1 = vld [vmem:[%s215_s1 + $0x8] sm:$0xff]  }
   0x2   :  { %156 = vmatprep.subr.bf16.mxu0 %v164_v0  ;;  %v166_v2 = vld [vmem:[%s216_s0] sm:$0xff]   ;;  %v167_v3 = vld [vmem:[%s216_s0 + $0x8] sm:$0xff]  }
   0x3   :  { %157 = vmatpush3.bf16.msra.mxu0 %v164_v0  ;;  %160 = vmatprep.mubr.msk.bf16.mxu0 %vm52_vm0, %v166_v2  ;;  %v137_v4 = vld [vmem:[%s217_s2] ss:$0 sm:$0xff] }
   0x4   :  { %158 = vmatprep.subr.bf16.mxu0 %v165_v1 }
   0x7   :  { %159 = vmatpush3.bf16.msra.mxu0 %v165_v1 }
   0xa   :  { %161 = vmatmul.mubr.msk.bf16.vlgmr.msra.gmra.mrb[0].mxu0 %vm52_vm0, %v167_v3 }
  0xdd   :  { %v162_v5 = vpop.f32.mrb[0].mxu0 }
  0xde   :  { %v102_v6 = vadd.f32 %v162_v5, %v137_v4  ;;  %v93_v7 = vpop.f32.mrb[1].mxu0 }
  0xdf   :  { %v94_v8 = vadd.f32 %v137_v4, %v93_v7  ;;  %v163_v9 = vpop.f32.mrb[2].mxu0 }
  0xe0   :  { %v110_v10 = vmax.f32 %v102_v6, 0.0  ;;  %v105_v11 = vadd.f32 %v163_v9, %v137_v4  ;;  %v96_v12 = vpop.f32.mrb[3].mxu0 }
  0xe1   :  { %v108_v13 = vmax.f32 %v94_v8, 0.0  ;;  %v97_v14 = vadd.f32 %v137_v4, %v96_v12 }
  0xe2   :  { %v150_v15 = vpack.c.bf16 %v110_v10, %v110_v10  ;;  %v111_v16 = vmax.f32 %v105_v11, 0.0 }
  0xe3   :  { %v148_v17 = vpack.c.bf16 %v108_v13, %v108_v13  ;;  %v109_v18 = vmax.f32 %v97_v14, 0.0 }
  0xe4   :  { %131 = vst.msk [vmem:[%s218_s3 + $0x8] sm:$0xf] %vm128_vm1, %v150_v15  ;;  %v151_v19 = vpack.c.bf16 %v111_v16, %v111_v16 }
  0xe5   :  { %129 = vst.msk [vmem:[%s218_s3] sm:$0xf] %vm128_vm1, %v148_v17  ;;  %v149_v20 = vpack.c.bf16 %v109_v18, %v109_v18 }
  0xe6   :  { %132 = vst.msk [vmem:[%s218_s3 + $0xc] sm:$0xf] %vm128_vm1, %v151_v19 }
  0xe7   :  { %130 = vst.msk [vmem:[%s218_s3 + $0x4] sm:$0xf] %vm128_vm1, %v149_v20 }

</bundles_post_ra>
